<compile_context>
chip_gen: v7x
topology: tpu7x:2x2x1
jax: 0.10.0
libtpu: 0.0.40
codegen_flags: <defaults>
</compile_context>

<pallas_src>
import math

import jax
import jax.numpy as jnp
from jax.experimental import pallas as pl
from jax.experimental.pallas import tpu as pltpu


# --------------------------------------------------------------------------
# Pallas kernel: radial MLP + depthwise tensor product + equivariant linear,
# all in "packed" layout: PACK edges per 128-lane row, lane = slot*C + channel.
# --------------------------------------------------------------------------
def _sep_fctp_kernel(xs_ref, xv_ref, ea_ref, es_ref,
                     w1_ref, b1_ref, g_ref, bt_ref, mavg_ref,
                     w2_ref, off_ref, ysel_ref,
                     ws0_ref, ws1_ref, bs_ref,
                     wv0_ref, wv1_ref, wv2_ref,
                     o_ref):
    lanes = xs_ref.shape[-1]                       # PACK * C = 128
    f32 = jnp.float32

    # ---- RadialProfile: Linear -> LayerNorm -> SiLU -> Linear (+ offset),
    #      executed in the packed layout via block-diagonal weights.
    es = es_ref[...]                                               # (TEp, PACK*F)
    hp = jnp.dot(es, w1_ref[...], preferred_element_type=f32) + b1_ref[...]
    mu_b = jnp.dot(hp, mavg_ref[...], preferred_element_type=f32)       # per-edge mean
    msq_b = jnp.dot(hp * hp, mavg_ref[...], preferred_element_type=f32)  # per-edge E[h^2]
    inv_b = jax.lax.rsqrt(msq_b - mu_b * mu_b + 1e-5)
    hn = (hp - mu_b) * inv_b * g_ref[...] + bt_ref[...]
    act = hn * jax.nn.sigmoid(hn)                                  # SiLU
    w_all = jnp.dot(act, w2_ref[...], preferred_element_type=f32) + off_ref[...]

    # 5 depthwise-TP weight groups, packed and 128-lane aligned (cheap slices).
    wA = w_all[:, 0 * lanes:1 * lanes]   # 0e x 0e -> 0e
    wB = w_all[:, 1 * lanes:2 * lanes]   # 0e x 1e -> 1e
    wC = w_all[:, 2 * lanes:3 * lanes]   # 1e x 0e -> 1e
    wD = w_all[:, 3 * lanes:4 * lanes]   # 1e x 1e -> 0e
    wE = w_all[:, 4 * lanes:5 * lanes]   # 1e x 1e -> 1e

    # ---- broadcast the 4 per-edge edge_attr scalars to packed lanes with one
    #      tiny selector matmul each (MXU; avoids cross-lane VPU/XLU shuffles).
    ysel = ysel_ref[...]
    y0 = jnp.dot(ea_ref[0], ysel, preferred_element_type=f32)      # l=0
    ya = jnp.dot(ea_ref[1], ysel, preferred_element_type=f32)      # l=1, m=-1
    yb = jnp.dot(ea_ref[2], ysel, preferred_element_type=f32)      # l=1, m= 0
    yc = jnp.dot(ea_ref[3], ysel, preferred_element_type=f32)      # l=1, m=+1

    xs = xs_ref[...]
    xv0 = xv_ref[0]
    xv1 = xv_ref[1]
    xv2 = xv_ref[2]

    inv_s3 = 1.0 / math.sqrt(3.0)
    inv_s2 = 1.0 / math.sqrt(2.0)

    # ---- depthwise ('uvu') tensor product, e3nn component normalization ----
    o_s0 = wA * xs * y0                                            # slot 0 (0e)
    o_s1 = wD * ((xv0 * ya + xv1 * yb + xv2 * yc) * inv_s3)        # slot 1 (0e)
    t_v2 = wB * xs                                                 # slot 2 operand (m-indep)
    t_v3 = wC * y0                                                 # slot 3 operand (m-indep)
    cr = (xv1 * yc - xv2 * yb,                                     # slot 4 (cross product)
          xv2 * ya - xv0 * yc,
          xv0 * yb - xv1 * ya)

    # ---- LinearRS: split block-diagonal weights keep the packed layout,
    #      no lane-axis concatenates.
    out_s = (jnp.dot(o_s0, ws0_ref[...], preferred_element_type=f32)
             + jnp.dot(o_s1, ws1_ref[...], preferred_element_type=f32)
             + bs_ref[...])
    o_ref[0] = out_s.astype(o_ref.dtype)

    t2mm = jnp.dot(t_v2, wv0_ref[...], preferred_element_type=f32)  # hoisted over m
    ym = (ya, yb, yc)
    xvm = (xv0, xv1, xv2)
    for m in range(3):
        vm = (ym[m] * t2mm
              + jnp.dot(t_v3 * xvm[m], wv1_ref[...], preferred_element_type=f32)
              + inv_s2 * jnp.dot(wE * cr[m], wv2_ref[...], preferred_element_type=f32))
        o_ref[1 + m] = vm.astype(o_ref.dtype)


def separable_fctp(xs, xv, edge_attr, edge_scalars, params, *, tile_e=512):
    E, C = xs.shape
    F = edge_scalars.shape[-1]
    H = params["w1"].shape[-1]
    assert 128 % C == 0, "channel count must divide 128 for lane packing"
    PACK = 128 // C                                   # edges packed per 128-lane row
    assert E % tile_e == 0 and tile_e % PACK == 0
    TEp = tile_e // PACK
    assert TEp % 8 == 0, "tile_e // PACK must be a multiple of 8"
    Ep = E // PACK
    f32 = jnp.float32

    # ---- packed views of the per-edge data (contiguous reshapes: free) ----
    xs_p = xs.reshape(Ep, PACK * C)
    xv_p = xv.reshape(3, Ep, PACK * C)
    ea_r = edge_attr.T.reshape(4, Ep, PACK)           # tiny (E*4) transpose
    es_p = edge_scalars.reshape(Ep, PACK * F)

    # ---- constant operands rebuilt for the packed layout (block-diagonal) ----
    eyeP = jnp.eye(PACK, dtype=f32)
    kron = jnp.kron
    w1bd = kron(eyeP, params["w1"])                                # (PACK*F, PACK*H)
    b1_t = jnp.tile(params["b1"], (1, PACK))
    g_t = jnp.tile(params["gamma"], (1, PACK))
    bt_t = jnp.tile(params["beta"], (1, PACK))
    mavg = kron(eyeP, jnp.full((H, H), 1.0 / H, f32))              # per-edge mean operator
    w2p = jnp.concatenate(
        [kron(eyeP, params["w2"][:, s * C:(s + 1) * C]) for s in range(5)], axis=1)
    off_p = jnp.concatenate(
        [jnp.tile(params["offset"][:, s * C:(s + 1) * C], (1, PACK)) for s in range(5)],
        axis=1)
    ysel = kron(eyeP, jnp.ones((1, C), f32))                       # (PACK, 128) lane-repeat
    ws0 = kron(eyeP, params["ws"][:C])
    ws1 = kron(eyeP, params["ws"][C:])
    bs_t = jnp.tile(params["bs"], (1, PACK))
    wv0 = kron(eyeP, params["wv"][0 * C:1 * C])
    wv1 = kron(eyeP, params["wv"][1 * C:2 * C])
    wv2 = kron(eyeP, params["wv"][2 * C:3 * C])

    def full_spec(arr):
        shape = arr.shape
        return pl.BlockSpec(shape, lambda i: tuple(0 for _ in shape))

    grid_spec = pltpu.PrefetchScalarGridSpec(
        num_scalar_prefetch=0,
        grid=(E // tile_e,),
        in_specs=[
            pl.BlockSpec((TEp, PACK * C), lambda i: (i, 0)),        # xs  (packed)
            pl.BlockSpec((3, TEp, PACK * C), lambda i: (0, i, 0)),  # xv  (packed)
            pl.BlockSpec((4, TEp, PACK), lambda i: (0, i, 0)),      # edge_attr
            pl.BlockSpec((TEp, PACK * F), lambda i: (i, 0)),        # edge_scalars (packed)
            full_spec(w1bd), full_spec(b1_t), full_spec(g_t), full_spec(bt_t),
            full_spec(mavg), full_spec(w2p), full_spec(off_p), full_spec(ysel),
            full_spec(ws0), full_spec(ws1), full_spec(bs_t),
            full_spec(wv0), full_spec(wv1), full_spec(wv2),
        ],
        out_specs=pl.BlockSpec((4, TEp, PACK * C), lambda i: (0, i, 0)),
    )

    io_elems = int(xs_p.size + xv_p.size + ea_r.size + es_p.size + 4 * Ep * PACK * C)
    const_elems = sum(int(a.size) for a in
                      (w1bd, b1_t, g_t, bt_t, mavg, w2p, off_p, ysel,
                       ws0, ws1, bs_t, wv0, wv1, wv2))
    flops = 2 * E * PACK * (F * H + 2 * H * H + 5 * H * C + 9 * C * C) + 8 * E * C
    cost = pl.CostEstimate(flops=int(flops),
                           transcendentals=int(2 * E * H),
                           bytes_accessed=int(4 * (io_elems + const_elems)))

    out = pl.pallas_call(
        _sep_fctp_kernel,
        grid_spec=grid_spec,
        out_shape=jax.ShapeDtypeStruct((4, Ep, PACK * C), f32),
        compiler_params=pltpu.CompilerParams(dimension_semantics=("parallel",)),
        cost_estimate=cost,
    )(xs_p, xv_p, ea_r, es_p,
      w1bd, b1_t, g_t, bt_t, mavg, w2p, off_p, ysel,
      ws0, ws1, bs_t, wv0, wv1, wv2)

    out_s = out[0].reshape(E, C)
    out_v = out[1:4].reshape(3, E, C)
    return out_s, out_v


# --------------------------------------------------------------------------
# Pure-JAX reference (same math, un-packed layout) for correctness check
# --------------------------------------------------------------------------
def _reference(xs, xv, ea, es, p):
    C = xs.shape[-1]
    h = es @ p["w1"] + p["b1"]
    mu = h.mean(-1, keepdims=True)
    var = ((h - mu) ** 2).mean(-1, keepdims=True)
    h = (h - mu) / jnp.sqrt(var + 1e-5) * p["gamma"] + p["beta"]
    h = h * jax.nn.sigmoid(h)
    w = h @ p["w2"] + p["offset"]
    wA, wB, wC, wD, wE = [w[:, i * C:(i + 1) * C] for i in range(5)]
    y0 = ea[:, 0:1]
    y1 = ea[:, 1:4]
    xvT = jnp.transpose(xv, (1, 0, 2))                             # (E,3,C)
    o_s0 = wA * xs * y0
    o_s1 = wD * jnp.einsum("emc,em->ec", xvT, y1) / math.sqrt(3.0)
    o_v2 = wB[:, None, :] * xs[:, None, :] * y1[:, :, None]
    o_v3 = wC[:, None, :] * xvT * y0[:, :, None]
    cr = jnp.stack([xvT[:, 1] * y1[:, 2:3] - xvT[:, 2] * y1[:, 1:2],
                    xvT[:, 2] * y1[:, 0:1] - xvT[:, 0] * y1[:, 2:3],
                    xvT[:, 0] * y1[:, 1:2] - xvT[:, 1] * y1[:, 0:1]], axis=1)
    o_v4 = wE[:, None, :] * cr / math.sqrt(2.0)
    out_s = jnp.concatenate([o_s0, o_s1], -1) @ p["ws"] + p["bs"]
    v_in = jnp.concatenate([o_v2, o_v3, o_v4], -1)                 # (E,3,3C)
    out_v = jnp.einsum("emk,kc->emc", v_in, p["wv"])
    return out_s, jnp.transpose(out_v, (1, 0, 2))


if __name__ == "__main__":
    E, C, F, H = 2048, 16, 16, 32      # edges, channels (mul), fc in, fc hidden
    tile_e = 512                        # grid = 4 (>= 2 keeps both v7x TCs busy)

    key = jax.random.PRNGKey(0)
    ks = jax.random.split(key, 16)
    f32 = jnp.float32

    # deterministic synthetic parameters (fan-in scaled; rescale factors folded in)
    params = {
        "w1":     jax.random.normal(ks[0], (F, H), f32) / math.sqrt(F),
        "b1":     jax.random.normal(ks[1], (1, H), f32) * 0.01,
        "gamma":  jnp.ones((1, H), f32),
        "beta":   jnp.zeros((1, H), f32),
        "w2":     jax.random.normal(ks[2], (H, 5 * C), f32) / math.sqrt(H),
        "offset": jax.random.normal(ks[3], (1, 5 * C), f32) / math.sqrt(H),
        "ws":     jax.random.normal(ks[4], (2 * C, C), f32) / math.sqrt(2 * C),
        "bs":     jnp.zeros((1, C), f32),
        "wv":     jax.random.normal(ks[5], (3 * C, C), f32) / math.sqrt(3 * C),
    }

    # deterministic example inputs
    xs = jax.random.normal(ks[6], (E, C), f32)          # node 0e features (per edge)
    xv = jax.random.normal(ks[7], (3, E, C), f32)       # node 1e features (per edge)
    ea_raw = jax.random.normal(ks[8], (E, 3), f32)      # edge vectors
    ea_dir = ea_raw / jnp.linalg.norm(ea_raw, axis=-1, keepdims=True)
    edge_attr = jnp.concatenate([jnp.ones((E, 1), f32), ea_dir], axis=-1)  # [Y0, Y1]
    edge_scalars = jax.random.normal(ks[9], (E, F), f32)

    out_s, out_v = separable_fctp(xs, xv, edge_attr, edge_scalars, params,
                                  tile_e=tile_e)
    jax.block_until_ready((out_s, out_v))

    with jax.default_matmul_precision("highest"):
        ref_s, ref_v = _reference(xs, xv, edge_attr, edge_scalars, params)
    assert jnp.allclose(out_s, ref_s, atol=2e-4, rtol=2e-4)
    assert jnp.allclose(out_v, ref_v, atol=2e-4, rtol=2e-4)

    print("KERNEL_OK")
</pallas_src>

<mosaic_0001>
module attributes {stable_mosaic.version = 11 : i64} {
  func.func @_sep_fctp_kernel(%arg0: i32, %arg1: memref<64x128xf32, #tpu.memory_space<vmem>>, %arg2: memref<3x64x128xf32, #tpu.memory_space<vmem>>, %arg3: memref<4x64x8xf32, #tpu.memory_space<vmem>>, %arg4: memref<64x128xf32, #tpu.memory_space<vmem>>, %arg5: memref<128x256xf32, #tpu.memory_space<vmem>>, %arg6: memref<1x256xf32, #tpu.memory_space<vmem>>, %arg7: memref<1x256xf32, #tpu.memory_space<vmem>>, %arg8: memref<1x256xf32, #tpu.memory_space<vmem>>, %arg9: memref<256x256xf32, #tpu.memory_space<vmem>>, %arg10: memref<256x640xf32, #tpu.memory_space<vmem>>, %arg11: memref<1x640xf32, #tpu.memory_space<vmem>>, %arg12: memref<8x128xf32, #tpu.memory_space<vmem>>, %arg13: memref<128x128xf32, #tpu.memory_space<vmem>>, %arg14: memref<128x128xf32, #tpu.memory_space<vmem>>, %arg15: memref<1x128xf32, #tpu.memory_space<vmem>>, %arg16: memref<128x128xf32, #tpu.memory_space<vmem>>, %arg17: memref<128x128xf32, #tpu.memory_space<vmem>>, %arg18: memref<128x128xf32, #tpu.memory_space<vmem>>, %arg19: memref<4x64x128xf32, #tpu.memory_space<vmem>>) attributes {dimension_semantics = [#tpu.dimension_semantics<parallel>], iteration_bounds = array<i64: 4>, scalar_prefetch = 0 : i64, scratch_operands = 0 : i64, tpu.core_type = #tpu.core_type<tc>, window_params = [{transform_indices = @transform_0, window_bounds = array<i64: 64, 128>}, {transform_indices = @transform_1, window_bounds = array<i64: 3, 64, 128>}, {transform_indices = @transform_2, window_bounds = array<i64: 4, 64, 8>}, {transform_indices = @transform_3, window_bounds = array<i64: 64, 128>}, {pipeline_mode = #tpu.pipeline_mode<synchronous>, transform_indices = @transform_4, window_bounds = array<i64: 128, 256>}, {pipeline_mode = #tpu.pipeline_mode<synchronous>, transform_indices = @transform_5, window_bounds = array<i64: 1, 256>}, {pipeline_mode = #tpu.pipeline_mode<synchronous>, transform_indices = @transform_6, window_bounds = array<i64: 1, 256>}, {pipeline_mode = #tpu.pipeline_mode<synchronous>, transform_indices = @transform_7, window_bounds = array<i64: 1, 256>}, {pipeline_mode = #tpu.pipeline_mode<synchronous>, transform_indices = @transform_8, window_bounds = array<i64: 256, 256>}, {pipeline_mode = #tpu.pipeline_mode<synchronous>, transform_indices = @transform_9, window_bounds = array<i64: 256, 640>}, {pipeline_mode = #tpu.pipeline_mode<synchronous>, transform_indices = @transform_10, window_bounds = array<i64: 1, 640>}, {pipeline_mode = #tpu.pipeline_mode<synchronous>, transform_indices = @transform_11, window_bounds = array<i64: 8, 128>}, {pipeline_mode = #tpu.pipeline_mode<synchronous>, transform_indices = @transform_12, window_bounds = array<i64: 128, 128>}, {pipeline_mode = #tpu.pipeline_mode<synchronous>, transform_indices = @transform_13, window_bounds = array<i64: 128, 128>}, {pipeline_mode = #tpu.pipeline_mode<synchronous>, transform_indices = @transform_14, window_bounds = array<i64: 1, 128>}, {pipeline_mode = #tpu.pipeline_mode<synchronous>, transform_indices = @transform_15, window_bounds = array<i64: 128, 128>}, {pipeline_mode = #tpu.pipeline_mode<synchronous>, transform_indices = @transform_16, window_bounds = array<i64: 128, 128>}, {pipeline_mode = #tpu.pipeline_mode<synchronous>, transform_indices = @transform_17, window_bounds = array<i64: 128, 128>}, {transform_indices = @transform_18, window_bounds = array<i64: 4, 64, 128>}]} {
    %c0 = arith.constant 0 : index
    %c0_0 = arith.constant 0 : index
    %0 = vector.load %arg4[%c0, %c0_0] : memref<64x128xf32, #tpu.memory_space<vmem>>, vector<64x128xf32>
    %c0_1 = arith.constant 0 : index
    %c0_2 = arith.constant 0 : index
    %1 = vector.load %arg5[%c0_1, %c0_2] : memref<128x256xf32, #tpu.memory_space<vmem>>, vector<128x256xf32>
    %cst = arith.constant dense<0.000000e+00> : vector<64x256xf32>
    %2 = tpu.matmul %0, %1, %cst {dimension_numbers = #tpu.dot_dimension_numbers<[1], [0], [0], [1], [0, 0, 1, 1], [], []>} : vector<64x128xf32>, vector<128x256xf32>, vector<64x256xf32> -> vector<64x256xf32>
    %c0_3 = arith.constant 0 : index
    %c0_4 = arith.constant 0 : index
    %3 = vector.load %arg6[%c0_3, %c0_4] : memref<1x256xf32, #tpu.memory_space<vmem>>, vector<1x256xf32>
    %4 = vector.broadcast %3 : vector<1x256xf32> to vector<64x256xf32>
    %5 = arith.addf %2, %4 : vector<64x256xf32>
    %c0_5 = arith.constant 0 : index
    %c0_6 = arith.constant 0 : index
    %6 = vector.load %arg9[%c0_5, %c0_6] : memref<256x256xf32, #tpu.memory_space<vmem>>, vector<256x256xf32>
    %cst_7 = arith.constant dense<0.000000e+00> : vector<64x256xf32>
    %7 = tpu.matmul %5, %6, %cst_7 {dimension_numbers = #tpu.dot_dimension_numbers<[1], [0], [0], [1], [0, 0, 1, 1], [], []>} : vector<64x256xf32>, vector<256x256xf32>, vector<64x256xf32> -> vector<64x256xf32>
    %8 = arith.mulf %5, %5 : vector<64x256xf32>
    %c0_8 = arith.constant 0 : index
    %c0_9 = arith.constant 0 : index
    %9 = vector.load %arg9[%c0_8, %c0_9] : memref<256x256xf32, #tpu.memory_space<vmem>>, vector<256x256xf32>
    %cst_10 = arith.constant dense<0.000000e+00> : vector<64x256xf32>
    %10 = tpu.matmul %8, %9, %cst_10 {dimension_numbers = #tpu.dot_dimension_numbers<[1], [0], [0], [1], [0, 0, 1, 1], [], []>} : vector<64x256xf32>, vector<256x256xf32>, vector<64x256xf32> -> vector<64x256xf32>
    %11 = arith.mulf %7, %7 : vector<64x256xf32>
    %12 = arith.subf %10, %11 : vector<64x256xf32>
    %cst_11 = arith.constant 9.99999974E-6 : f32
    %13 = vector.broadcast %cst_11 : f32 to vector<64x256xf32>
    %14 = arith.addf %12, %13 : vector<64x256xf32>
    %15 = math.rsqrt %14 : vector<64x256xf32>
    %16 = arith.subf %5, %7 : vector<64x256xf32>
    %17 = arith.mulf %16, %15 : vector<64x256xf32>
    %c0_12 = arith.constant 0 : index
    %c0_13 = arith.constant 0 : index
    %18 = vector.load %arg7[%c0_12, %c0_13] : memref<1x256xf32, #tpu.memory_space<vmem>>, vector<1x256xf32>
    %19 = vector.broadcast %18 : vector<1x256xf32> to vector<64x256xf32>
    %20 = arith.mulf %17, %19 : vector<64x256xf32>
    %c0_14 = arith.constant 0 : index
    %c0_15 = arith.constant 0 : index
    %21 = vector.load %arg8[%c0_14, %c0_15] : memref<1x256xf32, #tpu.memory_space<vmem>>, vector<1x256xf32>
    %22 = vector.broadcast %21 : vector<1x256xf32> to vector<64x256xf32>
    %23 = arith.addf %20, %22 : vector<64x256xf32>
    %24 = arith.negf %23 : vector<64x256xf32>
    %25 = math.exp %24 : vector<64x256xf32>
    %cst_16 = arith.constant 1.000000e+00 : f32
    %26 = vector.broadcast %cst_16 : f32 to vector<64x256xf32>
    %27 = arith.addf %26, %25 : vector<64x256xf32>
    %28 = arith.divf %26, %27 : vector<64x256xf32>
    %29 = arith.mulf %23, %28 : vector<64x256xf32>
    %c0_17 = arith.constant 0 : index
    %c0_18 = arith.constant 0 : index
    %30 = vector.load %arg10[%c0_17, %c0_18] : memref<256x640xf32, #tpu.memory_space<vmem>>, vector<256x640xf32>
    %cst_19 = arith.constant dense<0.000000e+00> : vector<64x640xf32>
    %31 = tpu.matmul %29, %30, %cst_19 {dimension_numbers = #tpu.dot_dimension_numbers<[1], [0], [0], [1], [0, 0, 1, 1], [], []>} : vector<64x256xf32>, vector<256x640xf32>, vector<64x640xf32> -> vector<64x640xf32>
    %c0_20 = arith.constant 0 : index
    %c0_21 = arith.constant 0 : index
    %32 = vector.load %arg11[%c0_20, %c0_21] : memref<1x640xf32, #tpu.memory_space<vmem>>, vector<1x640xf32>
    %33 = vector.broadcast %32 : vector<1x640xf32> to vector<64x640xf32>
    %34 = arith.addf %31, %33 : vector<64x640xf32>
    %35 = vector.extract_strided_slice %34 {offsets = [0, 0], sizes = [64, 128], strides = [1, 1]} : vector<64x640xf32> to vector<64x128xf32>
    %36 = vector.extract_strided_slice %34 {offsets = [0, 128], sizes = [64, 128], strides = [1, 1]} : vector<64x640xf32> to vector<64x128xf32>
    %37 = vector.extract_strided_slice %34 {offsets = [0, 256], sizes = [64, 128], strides = [1, 1]} : vector<64x640xf32> to vector<64x128xf32>
    %38 = vector.extract_strided_slice %34 {offsets = [0, 384], sizes = [64, 128], strides = [1, 1]} : vector<64x640xf32> to vector<64x128xf32>
    %39 = vector.extract_strided_slice %34 {offsets = [0, 512], sizes = [64, 128], strides = [1, 1]} : vector<64x640xf32> to vector<64x128xf32>
    %c0_22 = arith.constant 0 : index
    %c0_23 = arith.constant 0 : index
    %40 = vector.load %arg12[%c0_22, %c0_23] : memref<8x128xf32, #tpu.memory_space<vmem>>, vector<8x128xf32>
    %c0_24 = arith.constant 0 : index
    %c0_25 = arith.constant 0 : index
    %c0_26 = arith.constant 0 : index
    %41 = vector.load %arg3[%c0_24, %c0_25, %c0_26] : memref<4x64x8xf32, #tpu.memory_space<vmem>>, vector<1x64x8xf32>
    %42 = vector.shape_cast %41 : vector<1x64x8xf32> to vector<64x8xf32>
    %cst_27 = arith.constant dense<0.000000e+00> : vector<64x128xf32>
    %43 = tpu.matmul %42, %40, %cst_27 {dimension_numbers = #tpu.dot_dimension_numbers<[1], [0], [0], [1], [0, 0, 1, 1], [], []>} : vector<64x8xf32>, vector<8x128xf32>, vector<64x128xf32> -> vector<64x128xf32>
    %c1 = arith.constant 1 : index
    %c0_28 = arith.constant 0 : index
    %c0_29 = arith.constant 0 : index
    %44 = vector.load %arg3[%c1, %c0_28, %c0_29] : memref<4x64x8xf32, #tpu.memory_space<vmem>>, vector<1x64x8xf32>
    %45 = vector.shape_cast %44 : vector<1x64x8xf32> to vector<64x8xf32>
    %cst_30 = arith.constant dense<0.000000e+00> : vector<64x128xf32>
    %46 = tpu.matmul %45, %40, %cst_30 {dimension_numbers = #tpu.dot_dimension_numbers<[1], [0], [0], [1], [0, 0, 1, 1], [], []>} : vector<64x8xf32>, vector<8x128xf32>, vector<64x128xf32> -> vector<64x128xf32>
    %c2 = arith.constant 2 : index
    %c0_31 = arith.constant 0 : index
    %c0_32 = arith.constant 0 : index
    %47 = vector.load %arg3[%c2, %c0_31, %c0_32] : memref<4x64x8xf32, #tpu.memory_space<vmem>>, vector<1x64x8xf32>
    %48 = vector.shape_cast %47 : vector<1x64x8xf32> to vector<64x8xf32>
    %cst_33 = arith.constant dense<0.000000e+00> : vector<64x128xf32>
    %49 = tpu.matmul %48, %40, %cst_33 {dimension_numbers = #tpu.dot_dimension_numbers<[1], [0], [0], [1], [0, 0, 1, 1], [], []>} : vector<64x8xf32>, vector<8x128xf32>, vector<64x128xf32> -> vector<64x128xf32>
    %c3 = arith.constant 3 : index
    %c0_34 = arith.constant 0 : index
    %c0_35 = arith.constant 0 : index
    %50 = vector.load %arg3[%c3, %c0_34, %c0_35] : memref<4x64x8xf32, #tpu.memory_space<vmem>>, vector<1x64x8xf32>
    %51 = vector.shape_cast %50 : vector<1x64x8xf32> to vector<64x8xf32>
    %cst_36 = arith.constant dense<0.000000e+00> : vector<64x128xf32>
    %52 = tpu.matmul %51, %40, %cst_36 {dimension_numbers = #tpu.dot_dimension_numbers<[1], [0], [0], [1], [0, 0, 1, 1], [], []>} : vector<64x8xf32>, vector<8x128xf32>, vector<64x128xf32> -> vector<64x128xf32>
    %c0_37 = arith.constant 0 : index
    %c0_38 = arith.constant 0 : index
    %53 = vector.load %arg1[%c0_37, %c0_38] : memref<64x128xf32, #tpu.memory_space<vmem>>, vector<64x128xf32>
    %c0_39 = arith.constant 0 : index
    %c0_40 = arith.constant 0 : index
    %c0_41 = arith.constant 0 : index
    %54 = vector.load %arg2[%c0_39, %c0_40, %c0_41] : memref<3x64x128xf32, #tpu.memory_space<vmem>>, vector<1x64x128xf32>
    %55 = vector.shape_cast %54 : vector<1x64x128xf32> to vector<64x128xf32>
    %c1_42 = arith.constant 1 : index
    %c0_43 = arith.constant 0 : index
    %c0_44 = arith.constant 0 : index
    %56 = vector.load %arg2[%c1_42, %c0_43, %c0_44] : memref<3x64x128xf32, #tpu.memory_space<vmem>>, vector<1x64x128xf32>
    %57 = vector.shape_cast %56 : vector<1x64x128xf32> to vector<64x128xf32>
    %c2_45 = arith.constant 2 : index
    %c0_46 = arith.constant 0 : index
    %c0_47 = arith.constant 0 : index
    %58 = vector.load %arg2[%c2_45, %c0_46, %c0_47] : memref<3x64x128xf32, #tpu.memory_space<vmem>>, vector<1x64x128xf32>
    %59 = vector.shape_cast %58 : vector<1x64x128xf32> to vector<64x128xf32>
    %60 = arith.mulf %35, %53 : vector<64x128xf32>
    %61 = arith.mulf %60, %43 : vector<64x128xf32>
    %62 = arith.mulf %55, %46 : vector<64x128xf32>
    %63 = arith.mulf %57, %49 : vector<64x128xf32>
    %64 = arith.addf %62, %63 : vector<64x128xf32>
    %65 = arith.mulf %59, %52 : vector<64x128xf32>
    %66 = arith.addf %64, %65 : vector<64x128xf32>
    %cst_48 = arith.constant 0.577350259 : f32
    %67 = vector.broadcast %cst_48 : f32 to vector<64x128xf32>
    %68 = arith.mulf %66, %67 : vector<64x128xf32>
    %69 = arith.mulf %38, %68 : vector<64x128xf32>
    %70 = arith.mulf %36, %53 : vector<64x128xf32>
    %71 = arith.mulf %37, %43 : vector<64x128xf32>
    %72 = arith.mulf %57, %52 : vector<64x128xf32>
    %73 = arith.mulf %59, %49 : vector<64x128xf32>
    %74 = arith.subf %72, %73 : vector<64x128xf32>
    %75 = arith.mulf %59, %46 : vector<64x128xf32>
    %76 = arith.mulf %55, %52 : vector<64x128xf32>
    %77 = arith.subf %75, %76 : vector<64x128xf32>
    %78 = arith.mulf %55, %49 : vector<64x128xf32>
    %79 = arith.mulf %57, %46 : vector<64x128xf32>
    %80 = arith.subf %78, %79 : vector<64x128xf32>
    %c0_49 = arith.constant 0 : index
    %c0_50 = arith.constant 0 : index
    %81 = vector.load %arg13[%c0_49, %c0_50] : memref<128x128xf32, #tpu.memory_space<vmem>>, vector<128x128xf32>
    %cst_51 = arith.constant dense<0.000000e+00> : vector<64x128xf32>
    %82 = tpu.matmul %61, %81, %cst_51 {dimension_numbers = #tpu.dot_dimension_numbers<[1], [0], [0], [1], [0, 0, 1, 1], [], []>} : vector<64x128xf32>, vector<128x128xf32>, vector<64x128xf32> -> vector<64x128xf32>
    %c0_52 = arith.constant 0 : index
    %c0_53 = arith.constant 0 : index
    %83 = vector.load %arg14[%c0_52, %c0_53] : memref<128x128xf32, #tpu.memory_space<vmem>>, vector<128x128xf32>
    %cst_54 = arith.constant dense<0.000000e+00> : vector<64x128xf32>
    %84 = tpu.matmul %69, %83, %cst_54 {dimension_numbers = #tpu.dot_dimension_numbers<[1], [0], [0], [1], [0, 0, 1, 1], [], []>} : vector<64x128xf32>, vector<128x128xf32>, vector<64x128xf32> -> vector<64x128xf32>
    %85 = arith.addf %82, %84 : vector<64x128xf32>
    %c0_55 = arith.constant 0 : index
    %c0_56 = arith.constant 0 : index
    %86 = vector.load %arg15[%c0_55, %c0_56] : memref<1x128xf32, #tpu.memory_space<vmem>>, vector<1x128xf32>
    %87 = vector.broadcast %86 : vector<1x128xf32> to vector<64x128xf32>
    %88 = arith.addf %85, %87 : vector<64x128xf32>
    %c0_57 = arith.constant 0 : index
    %c0_58 = arith.constant 0 : index
    %c0_59 = arith.constant 0 : index
    %89 = vector.load %arg19[%c0_57, %c0_58, %c0_59] : memref<4x64x128xf32, #tpu.memory_space<vmem>>, vector<1x64x128xf32>
    %90 = vector.shape_cast %89 : vector<1x64x128xf32> to vector<64x128xf32>
    %91 = vector.shape_cast %88 : vector<64x128xf32> to vector<1x64x128xf32>
    tpu.vector_store %arg19[%c0_57, %c0_58, %c0_59], %91 {strides = array<i32>} : memref<4x64x128xf32, #tpu.memory_space<vmem>>, vector<1x64x128xf32>,
    %c0_60 = arith.constant 0 : index
    %c0_61 = arith.constant 0 : index
    %92 = vector.load %arg16[%c0_60, %c0_61] : memref<128x128xf32, #tpu.memory_space<vmem>>, vector<128x128xf32>
    %cst_62 = arith.constant dense<0.000000e+00> : vector<64x128xf32>
    %93 = tpu.matmul %70, %92, %cst_62 {dimension_numbers = #tpu.dot_dimension_numbers<[1], [0], [0], [1], [0, 0, 1, 1], [], []>} : vector<64x128xf32>, vector<128x128xf32>, vector<64x128xf32> -> vector<64x128xf32>
    %94 = arith.mulf %46, %93 : vector<64x128xf32>
    %95 = arith.mulf %71, %55 : vector<64x128xf32>
    %c0_63 = arith.constant 0 : index
    %c0_64 = arith.constant 0 : index
    %96 = vector.load %arg17[%c0_63, %c0_64] : memref<128x128xf32, #tpu.memory_space<vmem>>, vector<128x128xf32>
    %cst_65 = arith.constant dense<0.000000e+00> : vector<64x128xf32>
    %97 = tpu.matmul %95, %96, %cst_65 {dimension_numbers = #tpu.dot_dimension_numbers<[1], [0], [0], [1], [0, 0, 1, 1], [], []>} : vector<64x128xf32>, vector<128x128xf32>, vector<64x128xf32> -> vector<64x128xf32>
    %98 = arith.addf %94, %97 : vector<64x128xf32>
    %99 = arith.mulf %39, %74 : vector<64x128xf32>
    %c0_66 = arith.constant 0 : index
    %c0_67 = arith.constant 0 : index
    %100 = vector.load %arg18[%c0_66, %c0_67] : memref<128x128xf32, #tpu.memory_space<vmem>>, vector<128x128xf32>
    %cst_68 = arith.constant dense<0.000000e+00> : vector<64x128xf32>
    %101 = tpu.matmul %99, %100, %cst_68 {dimension_numbers = #tpu.dot_dimension_numbers<[1], [0], [0], [1], [0, 0, 1, 1], [], []>} : vector<64x128xf32>, vector<128x128xf32>, vector<64x128xf32> -> vector<64x128xf32>
    %cst_69 = arith.constant 0.707106769 : f32
    %102 = vector.broadcast %cst_69 : f32 to vector<64x128xf32>
    %103 = arith.mulf %102, %101 : vector<64x128xf32>
    %104 = arith.addf %98, %103 : vector<64x128xf32>
    %c1_70 = arith.constant 1 : index
    %c0_71 = arith.constant 0 : index
    %c0_72 = arith.constant 0 : index
    %105 = vector.load %arg19[%c1_70, %c0_71, %c0_72] : memref<4x64x128xf32, #tpu.memory_space<vmem>>, vector<1x64x128xf32>
    %106 = vector.shape_cast %105 : vector<1x64x128xf32> to vector<64x128xf32>
    %107 = vector.shape_cast %104 : vector<64x128xf32> to vector<1x64x128xf32>
    tpu.vector_store %arg19[%c1_70, %c0_71, %c0_72], %107 {strides = array<i32>} : memref<4x64x128xf32, #tpu.memory_space<vmem>>, vector<1x64x128xf32>,
    %108 = arith.mulf %49, %93 : vector<64x128xf32>
    %109 = arith.mulf %71, %57 : vector<64x128xf32>
    %c0_73 = arith.constant 0 : index
    %c0_74 = arith.constant 0 : index
    %110 = vector.load %arg17[%c0_73, %c0_74] : memref<128x128xf32, #tpu.memory_space<vmem>>, vector<128x128xf32>
    %cst_75 = arith.constant dense<0.000000e+00> : vector<64x128xf32>
    %111 = tpu.matmul %109, %110, %cst_75 {dimension_numbers = #tpu.dot_dimension_numbers<[1], [0], [0], [1], [0, 0, 1, 1], [], []>} : vector<64x128xf32>, vector<128x128xf32>, vector<64x128xf32> -> vector<64x128xf32>
    %112 = arith.addf %108, %111 : vector<64x128xf32>
    %113 = arith.mulf %39, %77 : vector<64x128xf32>
    %c0_76 = arith.constant 0 : index
    %c0_77 = arith.constant 0 : index
    %114 = vector.load %arg18[%c0_76, %c0_77] : memref<128x128xf32, #tpu.memory_space<vmem>>, vector<128x128xf32>
    %cst_78 = arith.constant dense<0.000000e+00> : vector<64x128xf32>
    %115 = tpu.matmul %113, %114, %cst_78 {dimension_numbers = #tpu.dot_dimension_numbers<[1], [0], [0], [1], [0, 0, 1, 1], [], []>} : vector<64x128xf32>, vector<128x128xf32>, vector<64x128xf32> -> vector<64x128xf32>
    %cst_79 = arith.constant 0.707106769 : f32
    %116 = vector.broadcast %cst_79 : f32 to vector<64x128xf32>
    %117 = arith.mulf %116, %115 : vector<64x128xf32>
    %118 = arith.addf %112, %117 : vector<64x128xf32>
    %c2_80 = arith.constant 2 : index
    %c0_81 = arith.constant 0 : index
    %c0_82 = arith.constant 0 : index
    %119 = vector.load %arg19[%c2_80, %c0_81, %c0_82] : memref<4x64x128xf32, #tpu.memory_space<vmem>>, vector<1x64x128xf32>
    %120 = vector.shape_cast %119 : vector<1x64x128xf32> to vector<64x128xf32>
    %121 = vector.shape_cast %118 : vector<64x128xf32> to vector<1x64x128xf32>
    tpu.vector_store %arg19[%c2_80, %c0_81, %c0_82], %121 {strides = array<i32>} : memref<4x64x128xf32, #tpu.memory_space<vmem>>, vector<1x64x128xf32>,
    %122 = arith.mulf %52, %93 : vector<64x128xf32>
    %123 = arith.mulf %71, %59 : vector<64x128xf32>
    %c0_83 = arith.constant 0 : index
    %c0_84 = arith.constant 0 : index
    %124 = vector.load %arg17[%c0_83, %c0_84] : memref<128x128xf32, #tpu.memory_space<vmem>>, vector<128x128xf32>
    %cst_85 = arith.constant dense<0.000000e+00> : vector<64x128xf32>
    %125 = tpu.matmul %123, %124, %cst_85 {dimension_numbers = #tpu.dot_dimension_numbers<[1], [0], [0], [1], [0, 0, 1, 1], [], []>} : vector<64x128xf32>, vector<128x128xf32>, vector<64x128xf32> -> vector<64x128xf32>
    %126 = arith.addf %122, %125 : vector<64x128xf32>
    %127 = arith.mulf %39, %80 : vector<64x128xf32>
    %c0_86 = arith.constant 0 : index
    %c0_87 = arith.constant 0 : index
    %128 = vector.load %arg18[%c0_86, %c0_87] : memref<128x128xf32, #tpu.memory_space<vmem>>, vector<128x128xf32>
    %cst_88 = arith.constant dense<0.000000e+00> : vector<64x128xf32>
    %129 = tpu.matmul %127, %128, %cst_88 {dimension_numbers = #tpu.dot_dimension_numbers<[1], [0], [0], [1], [0, 0, 1, 1], [], []>} : vector<64x128xf32>, vector<128x128xf32>, vector<64x128xf32> -> vector<64x128xf32>
    %cst_89 = arith.constant 0.707106769 : f32
    %130 = vector.broadcast %cst_89 : f32 to vector<64x128xf32>
    %131 = arith.mulf %130, %129 : vector<64x128xf32>
    %132 = arith.addf %126, %131 : vector<64x128xf32>
    %c3_90 = arith.constant 3 : index
    %c0_91 = arith.constant 0 : index
    %c0_92 = arith.constant 0 : index
    %133 = vector.load %arg19[%c3_90, %c0_91, %c0_92] : memref<4x64x128xf32, #tpu.memory_space<vmem>>, vector<1x64x128xf32>
    %134 = vector.shape_cast %133 : vector<1x64x128xf32> to vector<64x128xf32>
    %135 = vector.shape_cast %132 : vector<64x128xf32> to vector<1x64x128xf32>
    tpu.vector_store %arg19[%c3_90, %c0_91, %c0_92], %135 {strides = array<i32>} : memref<4x64x128xf32, #tpu.memory_space<vmem>>, vector<1x64x128xf32>,
    return
  }
  func.func @transform_0(%arg0: i32) -> (i32, i32) {
    %c0_i32 = arith.constant 0 : i32
    %c0_i32_0 = arith.constant 0 : i32
    return %arg0, %c0_i32 : i32, i32
  }
  func.func @transform_1(%arg0: i32) -> (i32, i32, i32) {
    %c0_i32 = arith.constant 0 : i32
    %c0_i32_0 = arith.constant 0 : i32
    %c0_i32_1 = arith.constant 0 : i32
    return %c0_i32, %arg0, %c0_i32_0 : i32, i32, i32
  }
  func.func @transform_2(%arg0: i32) -> (i32, i32, i32) {
    %c0_i32 = arith.constant 0 : i32
    %c0_i32_0 = arith.constant 0 : i32
    %c0_i32_1 = arith.constant 0 : i32
    return %c0_i32, %arg0, %c0_i32_0 : i32, i32, i32
  }
  func.func @transform_3(%arg0: i32) -> (i32, i32) {
    %c0_i32 = arith.constant 0 : i32
    %c0_i32_0 = arith.constant 0 : i32
    return %arg0, %c0_i32 : i32, i32
  }
  func.func @transform_4(%arg0: i32) -> (i32, i32) {
    %c0_i32 = arith.constant 0 : i32
    %c0_i32_0 = arith.constant 0 : i32
    %c0_i32_1 = arith.constant 0 : i32
    return %c0_i32, %c0_i32_0 : i32, i32
  }
  func.func @transform_5(%arg0: i32) -> (i32, i32) {
    %c0_i32 = arith.constant 0 : i32
    %c0_i32_0 = arith.constant 0 : i32
    %c0_i32_1 = arith.constant 0 : i32
    return %c0_i32, %c0_i32_0 : i32, i32
  }
  func.func @transform_6(%arg0: i32) -> (i32, i32) {
    %c0_i32 = arith.constant 0 : i32
    %c0_i32_0 = arith.constant 0 : i32
    %c0_i32_1 = arith.constant 0 : i32
    return %c0_i32, %c0_i32_0 : i32, i32
  }
  func.func @transform_7(%arg0: i32) -> (i32, i32) {
    %c0_i32 = arith.constant 0 : i32
    %c0_i32_0 = arith.constant 0 : i32
    %c0_i32_1 = arith.constant 0 : i32
    return %c0_i32, %c0_i32_0 : i32, i32
  }
  func.func @transform_8(%arg0: i32) -> (i32, i32) {
    %c0_i32 = arith.constant 0 : i32
    %c0_i32_0 = arith.constant 0 : i32
    %c0_i32_1 = arith.constant 0 : i32
    return %c0_i32, %c0_i32_0 : i32, i32
  }
  func.func @transform_9(%arg0: i32) -> (i32, i32) {
    %c0_i32 = arith.constant 0 : i32
    %c0_i32_0 = arith.constant 0 : i32
    %c0_i32_1 = arith.constant 0 : i32
    return %c0_i32, %c0_i32_0 : i32, i32
  }
  func.func @transform_10(%arg0: i32) -> (i32, i32) {
    %c0_i32 = arith.constant 0 : i32
    %c0_i32_0 = arith.constant 0 : i32
    %c0_i32_1 = arith.constant 0 : i32
    return %c0_i32, %c0_i32_0 : i32, i32
  }
  func.func @transform_11(%arg0: i32) -> (i32, i32) {
    %c0_i32 = arith.constant 0 : i32
    %c0_i32_0 = arith.constant 0 : i32
    %c0_i32_1 = arith.constant 0 : i32
    return %c0_i32, %c0_i32_0 : i32, i32
  }
  func.func @transform_12(%arg0: i32) -> (i32, i32) {
    %c0_i32 = arith.constant 0 : i32
    %c0_i32_0 = arith.constant 0 : i32
    %c0_i32_1 = arith.constant 0 : i32
    return %c0_i32, %c0_i32_0 : i32, i32
  }
  func.func @transform_13(%arg0: i32) -> (i32, i32) {
    %c0_i32 = arith.constant 0 : i32
    %c0_i32_0 = arith.constant 0 : i32
    %c0_i32_1 = arith.constant 0 : i32
    return %c0_i32, %c0_i32_0 : i32, i32
  }
  func.func @transform_14(%arg0: i32) -> (i32, i32) {
    %c0_i32 = arith.constant 0 : i32
    %c0_i32_0 = arith.constant 0 : i32
    %c0_i32_1 = arith.constant 0 : i32
    return %c0_i32, %c0_i32_0 : i32, i32
  }
  func.func @transform_15(%arg0: i32) -> (i32, i32) {
    %c0_i32 = arith.constant 0 : i32
    %c0_i32_0 = arith.constant 0 : i32
    %c0_i32_1 = arith.constant 0 : i32
    return %c0_i32, %c0_i32_0 : i32, i32
  }
  func.func @transform_16(%arg0: i32) -> (i32, i32) {
    %c0_i32 = arith.constant 0 : i32
    %c0_i32_0 = arith.constant 0 : i32
    %c0_i32_1 = arith.constant 0 : i32
    return %c0_i32, %c0_i32_0 : i32, i32
  }
  func.func @transform_17(%arg0: i32) -> (i32, i32) {
    %c0_i32 = arith.constant 0 : i32
    %c0_i32_0 = arith.constant 0 : i32
    %c0_i32_1 = arith.constant 0 : i32
    return %c0_i32, %c0_i32_0 : i32, i32
  }
  func.func @transform_18(%arg0: i32) -> (i32, i32, i32) {
    %c0_i32 = arith.constant 0 : i32
    %c0_i32_0 = arith.constant 0 : i32
    %c0_i32_1 = arith.constant 0 : i32
    return %c0_i32, %arg0, %c0_i32_0 : i32, i32, i32
  }
}

</mosaic_0001>

<bundles_post_ra>
// kernel: tpu_custom_call.1
= control target key start
LH: loop header
LB: loop body
LE: loop exit
PB: predicated region body
PF: predicated region fallthrough
CT: control target
= control target key end

     0   :  { %s8895_s0 = inlined_call_operand.vmem [shape: f32[256,128], index: 0, kind: input, shape index: {}]   ;;  %s8896_s1 = inlined_call_operand.vmem [shape: f32[3,256,128], index: 1, kind: input, shape index: {}]   ;;  %s8897_s2 = inlined_call_operand.vmem [shape: f32[4,256,8], index: 2, kind: input, shape index: {}]   ;;  %s8898_s3 = inlined_call_operand.hbm [shape: f32[256,128], index: 3, kind: input, shape index: {}]   ;;  %s8899_s4 = inlined_call_operand.hbm [shape: f32[128,256], index: 4, kind: input, shape index: {}]   ;;  %s8900_s5 = inlined_call_operand.vmem [shape: f32[1,256], index: 5, kind: input, shape index: {}]   ;;  %s8901_s6 = inlined_call_operand.vmem [shape: f32[1,256], index: 6, kind: input, shape index: {}]   ;;  %s8902_s7 = inlined_call_operand.vmem [shape: f32[1,256], index: 7, kind: input, shape index: {}]   ;;  %s8903_s8 = inlined_call_operand.hbm [shape: f32[256,256], index: 8, kind: input, shape index: {}]   ;;  %s8904_s9 = inlined_call_operand.hbm [shape: f32[256,640], index: 9, kind: input, shape index: {}]   ;;  %s8905_s10 = inlined_call_operand.vmem [shape: f32[1,640], index: 10, kind: input, shape index: {}]   ;;  %s8906_s11 = inlined_call_operand.vmem [shape: f32[8,128], index: 11, kind: input, shape index: {}]   ;;  %s8907_s12 = inlined_call_operand.hbm [shape: f32[128,128], index: 12, kind: input, shape index: {}]   ;;  %s8908_s13 = inlined_call_operand.hbm [shape: f32[128,128], index: 13, kind: input, shape index: {}]   ;;  %s8909_s14 = inlined_call_operand.vmem [shape: f32[1,128], index: 14, kind: input, shape index: {}]   ;;  %s8910_s15 = inlined_call_operand.hbm [shape: f32[128,128], index: 15, kind: input, shape index: {}]   ;;  %s8911_s16 = inlined_call_operand.hbm [shape: f32[128,128], index: 16, kind: input, shape index: {}]   ;;  %s8912_s17 = inlined_call_operand.hbm [shape: f32[128,128], index: 17, kind: input, shape index: {}]   ;;  %s8913_s18 = inlined_call_operand.hbm [shape: f32[4,256,128], index: 18, kind: output, shape index: {}]  }
   0x1   :  { %8993 = sst [smem:[#allocation106_spill]] %s8895_s0 }
   0x2   :  { %8994 = sst [smem:[#allocation107_spill]] %s8896_s1 }
   0x3   :  { %8995 = sst [smem:[#allocation108_spill]] %s8897_s2 }
   0x4   :  { %8996 = sst [smem:[#allocation109_spill]] %s8899_s4 }
   0x5   :  { %8997 = sst [smem:[#allocation110_spill]] %s8900_s5 }
   0x6   :  { %8998 = sst [smem:[#allocation111_spill]] %s8901_s6 }
   0x7   :  { %8999 = sst [smem:[#allocation112_spill]] %s8902_s7 }
   0x8   :  { %9000 = sst [smem:[#allocation113_spill]] %s8905_s10 }
   0x9   :  { %9001 = sst [smem:[#allocation114_spill]] %s8906_s11 }
   0xa   :  { %9002 = sst [smem:[#allocation115_spill]] %s8909_s14 }
   0xb   :  { %9003 = sst [smem:[#allocation116_spill]] %s8913_s18 }
   0xc   :  { %23 = vsyncpa [#allocation5], 0 }
   0xd   :  { %25 = vsyncpa [#allocation5 + $0x1], 0 }
   0xe   :  { %26 = vsyncpa [#allocation8], 0 }
   0xf   :  { %27 = vsyncpa [#allocation11], 0 }
  0x10   :  { %28 = vsyncpa [#allocation14], 0 }
  0x11   :  { %29 = vsyncpa [#allocation17], 0 }
  0x12   :  { %30 = vsyncpa [#allocation6], 0 }
  0x13   :  { %32 = vsyncpa [#allocation6 + $0x1], 0  ;;  %s6784_s27 = smov 0   ;;  %s6786_s28 = smov 0  }
  0x14   :  { %s6788_s29 = smov 0   ;;  %s6790_s30 = smov 0  }
  0x15 LB: > { %9004 = sst [smem:[#allocation28_spill]] %s6651_s27  ;;  %s6805_s0 = sadd.s32 4294967295, %s6663_s30   ;;  %s6663_s30 = sphi %s6790_s30, %s9238_s30   ;;  %s6659_s29 = sphi %s6788_s29, %s9242_s29   ;;  %s6655_s28 = sphi %s6786_s28, %s9241_s28   ;;  %s6651_s27 = sphi %s6784_s27, %s9240_s27  }
  0x16   : > { %9005 = sst [smem:[#allocation29_spill]] %s6805_s0  ;;  %s4585_s19 = sadd.s32 4294967294, %s6663_s30  }
  0x17   : > { %s6809_s1 = sadd.s32 1, %s6663_s30   ;;  %s71_s20 = sadd.s32 1, %s6659_s29 }
  0x18   : > { %9006 = sst [smem:[#allocation30_spill]] %s6809_s1  ;;  %s68_s21 = ssub.s32 %s6663_s30, %s6809_s1 }
  0x19   : > { %p78_p0 = scmp.ne.s32.totalorder %s6659_s29, %s6655_s28  ;;  %p69_p1 = scmp.eq.s32.totalorder %s68_s21, 0 }
  0x1a   : > { %p79_p2 = scmp.eq.s32.totalorder %s6663_s30, 0  ;;  %p136_p3 = scmp.ne.s32.totalorder %s6655_s28, %s6651_s27 }
  0x1b   : > { %p8920_p4 = scmp.eq.s32.totalorder %s6805_s0, 0  ;;  %p454_p7 = scmp.eq.s32.totalorder %s6805_s0, 3 }
  0x1c   : > { %s6821_s22 = scalar_select %p69_p1, %s6659_s29, %s71_s20  }
  0x1d   : > { %p6823_p5 = por %p79_p2, %p78_p0  ;;  %p6829_p6 = por %p8920_p4, %p136_p3 }
  0x1e   : > { %9007 = sst [smem:[#allocation31_spill]] %s6821_s22  ;;  %p460_p8 = scmp.eq.s32.totalorder %s4585_s19, 3 }
  0x1f   : > { %s9008_s2 = scalar_select %p6823_p5, 1, 0 }
  0x20   : > { %s9009_s23 = scalar_select %p6829_p6, 1, 0 }
  0x21   : > { %p4586_p9 = scmp.ge.s32.totalorder %s6663_s30, 1  ;;  %p467_p10 = scmp.lt.s32.totalorder %s6663_s30, 5 }
  0x22   : > { %9010 = sst [smem:[#allocation32_spill]] %s9009_s23  ;;  %p6836_p11 = por %p454_p7, %p78_p0 }
  0x23   : > { %p6840_p12 = por %p460_p8, %p136_p3  ;;  %p6844_p13 = pnand %p4586_p9, %p467_p10 }
  0x24   : > { %s9011_s24 = scalar_select %p6836_p11, 1, 0 }
  0x25   : > { %s9013_s25 = scalar_select %p6840_p12, 1, 0 }
  0x26   : > { %9012 = sst [smem:[#allocation33_spill]] %s9011_s24  ;;  %p6160_p1 = pneg %p6844_p13 }
  0x27   : > { %9014 = sst [smem:[#allocation34_spill]] %s9013_s25  ;;  %s6665_s20 = smov [#allocation7]  }
  0x28   : > { %s9015_s26 = scalar_select %p6844_p13, 1, 0 }
  0x29   : > { %s479_s21 = sshll.u32 %s6665_s20, 4  ;;  %p6852_p2 = pnand %p6160_p1, %p8920_p4  ;;  %s480_s21 = int_to_ptr.vmem [resolvable:$true] %s479_s21 }
  0x2a   : > { %s6666_s22 = smov [#allocation10]   ;;  %s9017_s4 = sld [smem:[#allocation109_spill]] }
  0x2b   : > { %s514_s1 = sshll.u32 %s6666_s22, 4  ;;  %p6866_p3 = pneg %p6852_p2  ;;  %s6856_s1 = int_to_ptr.vmem [resolvable:$true] %s514_s1 }
  0x30   : > { %s6357_s18 = scalar_lea.hbm %s9017_s4, 4096 }
  0x31   : > { %p6358_p0 = scmp.ne.s32.totalorder %s9017_s4, %s6357_s18  ;;  %p6364_p9 = scmp.lt.u32.totalorder %s6357_s18, %s9017_s4 }
  0x33   : > { %p6360_p7 = pnand %p6866_p3, %p6358_p0 }
  0x35   : > { %p6361_p8 = pneg %p6360_p7 }
  0x37   : > { %p6366_p10 = pnand %p6364_p9, %p6361_p8 }
  0x39   : > { %6369 = shalt.err (!%p6366_p10)
}
  0x3a   : > { %s6370_s27 = scalar_lea.vmem %s480_s21, 4096  ;;  %p6378_p11 = scmp.lt.s32.totalorder %s480_s21, %s480_s21 }
  0x3b   : > { %p6371_p1 = scmp.ne.s32.totalorder %s480_s21, %s6370_s27  ;;  %p6379_p6 = scmp.lt.s32.totalorder %s6370_s27, %s6370_s27 }
  0x3d   : > { %p6373_p4 = pnand %p6371_p1, %p6866_p3  ;;  %p6380_p13 = por %p6379_p6, %p6378_p11 }
  0x3f   : > { %p6374_p12 = pneg %p6373_p4 }
  0x41   : > { %p6381_p5 = pnand %p6380_p13, %p6374_p12 }
  0x43   : > { %6384 = shalt.err (!%p6381_p5)
}
  0x44   : > { %s8925_s14 = smov 256   ;;  %s8926_s24 = smov 16  }
  0x45   : > { %6163 = dma.hbm_to_vmem [thread:$0]  (!%p6852_p2), %s9017_s4, 4096, %s480_s21, [#allocation8], %s8925_s14, %s8925_s14, %s8926_s24  }
  0x46   : > { %s6385_s7 = scalar_lea.hbm %s8904_s9, 20480 }
  0x47   : > { %p6386_p4 = scmp.ne.s32.totalorder %s8904_s9, %s6385_s7  ;;  %p6392_p11 = scmp.lt.u32.totalorder %s6385_s7, %s8904_s9 }
  0x49   : > { %p6388_p5 = pnand %p6386_p4, %p6866_p3 }
  0x4b   : > { %p6389_p6 = pneg %p6388_p5 }
  0x4d   : > { %p6394_p12 = pnand %p6392_p11, %p6389_p6 }
  0x4f   : > { %6397 = shalt.err (!%p6394_p12)
}
  0x50   : > { %s6398_s21 = scalar_lea.vmem %s6856_s1, 20480  ;;  %p6406_p8 = scmp.lt.s32.totalorder %s6856_s1, %s6856_s1 }
  0x51   : > { %p6399_p13 = scmp.ne.s32.totalorder %s6856_s1, %s6398_s21  ;;  %p6407_p9 = scmp.lt.s32.totalorder %s6398_s21, %s6398_s21 }
  0x53   : > { %p6401_p0 = pnand %p6399_p13, %p6866_p3  ;;  %p6408_p10 = por %p6407_p9, %p6406_p8 }
  0x55   : > { %p6402_p7 = pneg %p6401_p0 }
  0x57   : > { %p6409_p1 = pnand %p6408_p10, %p6402_p7 }
  0x59   : > { %6412 = shalt.err (!%p6409_p1)
}
  0x5a   : > { %s6669_s6 = smov 640   ;;  %s6670_s5 = smov 40  }
  0x5b   : > { %6169 = dma.hbm_to_vmem [thread:$0]  (!%p6852_p2), %s8904_s9, 20480, %s6856_s1, [#allocation11], %s6669_s6, %s6669_s6, %s6670_s5  }
  0x5c   : > { %s6671_s10 = smov [#allocation13]   ;;  %s6672_s25 = smov [#allocation16]  }
  0x5d   : > { %s546_s18 = sshll.u32 %s6671_s10, 4  ;;  %s575_s22 = sshll.u32 %s6672_s25, 4  ;;  %s547_s18 = int_to_ptr.vmem [resolvable:$true] %s546_s18  ;;  %s576_s22 = int_to_ptr.vmem [resolvable:$true] %s575_s22 }
  0x5e   : > { %s6413_s14 = scalar_lea.hbm %s8908_s13, 2048 }
  0x5f   : > { %p6414_p4 = scmp.ne.s32.totalorder %s8908_s13, %s6413_s14  ;;  %p6420_p11 = scmp.lt.u32.totalorder %s6413_s14, %s8908_s13 }
  0x61   : > { %p6416_p5 = pnand %p6414_p4, %p6866_p3 }
  0x63   : > { %p6417_p6 = pneg %p6416_p5 }
  0x65   : > { %p6422_p12 = pnand %p6420_p11, %p6417_p6 }
  0x67   : > { %6425 = shalt.err (!%p6422_p12)
}
  0x68   : > { %s6426_s1 = scalar_lea.vmem %s547_s18, 2048  ;;  %p6434_p8 = scmp.lt.s32.totalorder %s547_s18, %s547_s18 }
  0x69   : > { %p6427_p13 = scmp.ne.s32.totalorder %s547_s18, %s6426_s1  ;;  %p6435_p9 = scmp.lt.s32.totalorder %s6426_s1, %s6426_s1 }
  0x6b   : > { %p6429_p0 = pnand %p6427_p13, %p6866_p3  ;;  %p6436_p10 = por %p6435_p9, %p6434_p8 }
  0x6d   : > { %p6430_p7 = pneg %p6429_p0 }
  0x6f   : > { %p6437_p1 = pnand %p6436_p10, %p6430_p7 }
  0x71   : > { %6440 = shalt.err (!%p6437_p1)
}
  0x72   : > { %s6673_s4 = smov 128   ;;  %s6674_s24 = smov 8  }
  0x73   : > { %6175 = dma.hbm_to_vmem [thread:$0]  (!%p6852_p2), %s8908_s13, 2048, %s547_s18, [#allocation14], %s6673_s4, %s6673_s4, %s6674_s24  }
  0x74   : > { %s6441_s5 = scalar_lea.hbm %s8911_s16, 2048 }
  0x75   : > { %p6442_p4 = scmp.ne.s32.totalorder %s8911_s16, %s6441_s5  ;;  %p6448_p11 = scmp.lt.u32.totalorder %s6441_s5, %s8911_s16 }
  0x77   : > { %p6444_p5 = pnand %p6442_p4, %p6866_p3 }
  0x79   : > { %p6445_p6 = pneg %p6444_p5 }
  0x7b   : > { %p6450_p12 = pnand %p6448_p11, %p6445_p6 }
  0x7d   : > { %6453 = shalt.err (!%p6450_p12)
}
  0x7e   : > { %s6454_s27 = scalar_lea.vmem %s576_s22, 2048  ;;  %p6462_p8 = scmp.lt.s32.totalorder %s576_s22, %s576_s22 }
  0x7f   : > { %p6455_p13 = scmp.ne.s32.totalorder %s576_s22, %s6454_s27  ;;  %p6463_p9 = scmp.lt.s32.totalorder %s6454_s27, %s6454_s27 }
  0x81   : > { %p6457_p0 = pnand %p6455_p13, %p6866_p3  ;;  %p6464_p10 = por %p6463_p9, %p6462_p8 }
  0x83   : > { %p6458_p7 = pneg %p6457_p0 }
  0x85   : > { %p6465_p1 = pnand %p6464_p10, %p6458_p7 }
  0x87   : > { %6468 = shalt.err (!%p6465_p1)
}
  0x88   : > { %6181 = dma.hbm_to_vmem [thread:$0]  (!%p6852_p2), %s8911_s16, 2048, %s576_s22, [#allocation17], %s6673_s4, %s6673_s4, %s6674_s24  }
  0x89   : > { %s6675_s1 = smov [#allocation9]   ;;  %s6676_s23 = smov [#allocation12]  }
  0x8a   : > { %s501_s0 = sshll.u32 %s6675_s1, 4  ;;  %s533_s14 = sshll.u32 %s6676_s23, 4  ;;  %s502_s0 = int_to_ptr.vmem [resolvable:$true] %s501_s0  ;;  %s534_s14 = int_to_ptr.vmem [resolvable:$true] %s533_s14 }
  0x8b   : > { %s6469_s7 = scalar_lea.hbm %s8903_s8, 8192 }
  0x8c   : > { %p6470_p4 = scmp.ne.s32.totalorder %s8903_s8, %s6469_s7  ;;  %p6476_p11 = scmp.lt.u32.totalorder %s6469_s7, %s8903_s8 }
  0x8e   : > { %p6472_p5 = pnand %p6470_p4, %p6866_p3 }
  0x90   : > { %p6473_p6 = pneg %p6472_p5 }
  0x92   : > { %p6478_p12 = pnand %p6476_p11, %p6473_p6 }
  0x94   : > { %6481 = shalt.err (!%p6478_p12)
}
  0x95   : > { %s6482_s22 = scalar_lea.vmem %s502_s0, 8192  ;;  %p6490_p8 = scmp.lt.s32.totalorder %s502_s0, %s502_s0 }
  0x96   : > { %p6483_p13 = scmp.ne.s32.totalorder %s502_s0, %s6482_s22  ;;  %p6491_p9 = scmp.lt.s32.totalorder %s6482_s22, %s6482_s22 }
  0x98   : > { %p6485_p0 = pnand %p6483_p13, %p6866_p3  ;;  %p6492_p10 = por %p6491_p9, %p6490_p8 }
  0x9a   : > { %p6486_p7 = pneg %p6485_p0 }
  0x9c   : > { %p6493_p1 = pnand %p6492_p10, %p6486_p7 }
  0x9e   : > { %6496 = shalt.err (!%p6493_p1)
}
  0x9f   : > { %s9019_s18 = smov 16   ;;  %s9020_s21 = smov 256  }
  0xa0   : > { %6166 = dma.hbm_to_vmem [thread:$0]  (!%p6852_p2), %s8903_s8, 8192, %s502_s0, [#allocation8], %s9020_s21, %s9020_s21, %s9019_s18  }
  0xa1   : > { %s6497_s7 = scalar_lea.hbm %s8907_s12, 2048 }
  0xa2   : > { %p6498_p4 = scmp.ne.s32.totalorder %s8907_s12, %s6497_s7  ;;  %p6504_p11 = scmp.lt.u32.totalorder %s6497_s7, %s8907_s12 }
  0xa4   : > { %p6500_p5 = pnand %p6498_p4, %p6866_p3 }
  0xa6   : > { %p6501_p6 = pneg %p6500_p5 }
  0xa8   : > { %p6506_p12 = pnand %p6504_p11, %p6501_p6 }
  0xaa   : > { %6509 = shalt.err (!%p6506_p12)
}
  0xab   : > { %s6510_s22 = scalar_lea.vmem %s534_s14, 2048  ;;  %p6518_p8 = scmp.lt.s32.totalorder %s534_s14, %s534_s14 }
  0xac   : > { %p6511_p13 = scmp.ne.s32.totalorder %s534_s14, %s6510_s22  ;;  %p6519_p9 = scmp.lt.s32.totalorder %s6510_s22, %s6510_s22 }
  0xae   : > { %p6513_p0 = pnand %p6511_p13, %p6866_p3  ;;  %p6520_p10 = por %p6519_p9, %p6518_p8 }
  0xb0   : > { %p6514_p7 = pneg %p6513_p0 }
  0xb2   : > { %p6521_p1 = pnand %p6520_p10, %p6514_p7 }
  0xb4   : > { %6524 = shalt.err (!%p6521_p1)
}
  0xb5   : > { %6172 = dma.hbm_to_vmem [thread:$0]  (!%p6852_p2), %s8907_s12, 2048, %s534_s14, [#allocation11], %s6673_s4, %s6673_s4, %s6674_s24  }
  0xb6   : > { %s6677_s21 = smov [#allocation15]   ;;  %s6678_s23 = smov [#allocation18]  }
  0xb7   : > { %s562_s1 = sshll.u32 %s6677_s21, 4  ;;  %s588_s6 = sshll.u32 %s6678_s23, 4  ;;  %s563_s1 = int_to_ptr.vmem [resolvable:$true] %s562_s1  ;;  %s589_s6 = int_to_ptr.vmem [resolvable:$true] %s588_s6 }
  0xb8   : > { %s6525_s11 = scalar_lea.hbm %s8910_s15, 2048 }
  0xb9   : > { %p6526_p4 = scmp.ne.s32.totalorder %s8910_s15, %s6525_s11  ;;  %p6532_p11 = scmp.lt.u32.totalorder %s6525_s11, %s8910_s15 }
  0xbb   : > { %p6528_p5 = pnand %p6526_p4, %p6866_p3 }
  0xbd   : > { %p6529_p6 = pneg %p6528_p5 }
  0xbf   : > { %p6534_p12 = pnand %p6532_p11, %p6529_p6 }
  0xc1   : > { %6537 = shalt.err (!%p6534_p12)
}
  0xc2   : > { %s6538_s14 = scalar_lea.vmem %s563_s1, 2048  ;;  %p6546_p8 = scmp.lt.s32.totalorder %s563_s1, %s563_s1 }
  0xc3   : > { %p6539_p13 = scmp.ne.s32.totalorder %s563_s1, %s6538_s14  ;;  %p6547_p9 = scmp.lt.s32.totalorder %s6538_s14, %s6538_s14 }
  0xc5   : > { %p6541_p0 = pnand %p6539_p13, %p6866_p3  ;;  %p6548_p10 = por %p6547_p9, %p6546_p8 }
  0xc7   : > { %p6542_p7 = pneg %p6541_p0 }
  0xc9   : > { %p6549_p1 = pnand %p6548_p10, %p6542_p7 }
  0xcb   : > { %6552 = shalt.err (!%p6549_p1)
}
  0xcc   : > { %6178 = dma.hbm_to_vmem [thread:$0]  (!%p6852_p2), %s8910_s15, 2048, %s563_s1, [#allocation14], %s6673_s4, %s6673_s4, %s6674_s24  }
  0xcd   : > { %s6553_s5 = scalar_lea.hbm %s8912_s17, 2048 }
  0xce   : > { %p6554_p4 = scmp.ne.s32.totalorder %s8912_s17, %s6553_s5  ;;  %p6560_p11 = scmp.lt.u32.totalorder %s6553_s5, %s8912_s17 }
  0xd0   : > { %p6556_p5 = pnand %p6554_p4, %p6866_p3 }
  0xd2   : > { %p6557_p6 = pneg %p6556_p5 }
  0xd4   : > { %p6562_p12 = pnand %p6560_p11, %p6557_p6 }
  0xd6   : > { %6565 = shalt.err (!%p6562_p12)
}
  0xd7   : > { %s6566_s27 = scalar_lea.vmem %s589_s6, 2048  ;;  %p6574_p8 = scmp.lt.s32.totalorder %s589_s6, %s589_s6 }
  0xd8   : > { %p6567_p13 = scmp.ne.s32.totalorder %s589_s6, %s6566_s27  ;;  %p6575_p9 = scmp.lt.s32.totalorder %s6566_s27, %s6566_s27 }
  0xda   : > { %p6569_p0 = pnand %p6567_p13, %p6866_p3  ;;  %p6576_p10 = por %p6575_p9, %p6574_p8 }
  0xdc   : > { %p6570_p7 = pneg %p6569_p0 }
  0xde   : > { %p6577_p1 = pnand %p6576_p10, %p6570_p7 }
  0xe0   : > { %6580 = shalt.err (!%p6577_p1)
}
  0xe1   : > { %6184 = dma.hbm_to_vmem [thread:$0]  (!%p6852_p2), %s8912_s17, 2048, %s589_s6, [#allocation17], %s6673_s4, %s6673_s4, %s6674_s24  }
  0xe2   : > { %p4595_p4 = scmp.ge.s32.totalorder %s6663_s30, 4 }
  0xe3   : > { %p9021_p3 = scmp.ne.s32.totalorder (!%p4595_p4), %s9008_s2, 0 }
  0xe4   : > { %598 = sbr.rel (%p4595_p4) target bundleno = 312 (0x138), region = 72 }
  0xeb   : > { %610 = sbr.rel (!%p9021_p3) target bundleno = 258 (0x102), region = 80  ;;  %s612_s20 = sand.u32 (%p9021_p3), 1, %s6659_s29  }
  0xec   : > { %s4736_s14 = sshll.u32 (%p9021_p3), %s6663_s30, 6  ;;  %s6116_s0 = smul.u32 (%p9021_p3), 192, %s612_s20 }
  0xed   : > { %s9022_s21 = sld [smem:[#allocation107_spill]] (%p9021_p3) }
  0xee   : > { %s7050_s4 = scalar_lea.vmem (%p9021_p3), [#allocation2], %s6116_s0 }
  0xf3   : > { %s7042_s23 = scalar_lea.vmem %s9022_s21, %s4736_s14 }
  0xf4   : > { %v691_v0 = vld [vmem:[%s7042_s23] sm:$0xff]  ;;  %v693_v1 = vld [vmem:[%s7042_s23 + $0x8] sm:$0xff]  ;;  %v695_v2 = vld [vmem:[%s7042_s23 + $0x10] sm:$0xff] }
  0xf5   : > { %v697_v3 = vld [vmem:[%s7042_s23 + $0x18] sm:$0xff]  ;;  %v699_v4 = vld [vmem:[%s7042_s23 + $0x20] sm:$0xff]  ;;  %v701_v5 = vld [vmem:[%s7042_s23 + $0x28] sm:$0xff]  ;;  %692 = vst [vmem:[%s7050_s4] sm:$0xff] %v691_v0 }
  0xf6   : > { %694 = vst [vmem:[%s7050_s4 + $0x8] sm:$0xff] %v693_v1  ;;  %696 = vst [vmem:[%s7050_s4 + $0x10] sm:$0xff] %v695_v2  ;;  %v703_v6 = vld [vmem:[%s7042_s23 + $0x30] sm:$0xff]  ;;  %v705_v7 = vld [vmem:[%s7042_s23 + $0x38] sm:$0xff] }
  0xf7   : > { %698 = vst [vmem:[%s7050_s4 + $0x18] sm:$0xff] %v697_v3  ;;  %700 = vst [vmem:[%s7050_s4 + $0x20] sm:$0xff] %v699_v4  ;;  %v707_v8 = vld [vmem:[%s7042_s23 + $0x100] sm:$0xff]  ;;  %v709_v9 = vld [vmem:[%s7042_s23 + $0x108] sm:$0xff] }
  0xf8   : > { %702 = vst [vmem:[%s7050_s4 + $0x28] sm:$0xff] %v701_v5  ;;  %704 = vst [vmem:[%s7050_s4 + $0x30] sm:$0xff] %v703_v6  ;;  %v711_v10 = vld [vmem:[%s7042_s23 + $0x110] sm:$0xff]  ;;  %v713_v11 = vld [vmem:[%s7042_s23 + $0x118] sm:$0xff] }
  0xf9   : > { %706 = vst [vmem:[%s7050_s4 + $0x38] sm:$0xff] %v705_v7  ;;  %708 = vst [vmem:[%s7050_s4 + $0x40] sm:$0xff] %v707_v8  ;;  %v715_v12 = vld [vmem:[%s7042_s23 + $0x120] sm:$0xff]  ;;  %v717_v13 = vld [vmem:[%s7042_s23 + $0x128] sm:$0xff] }
  0xfa   : > { %710 = vst [vmem:[%s7050_s4 + $0x48] sm:$0xff] %v709_v9  ;;  %712 = vst [vmem:[%s7050_s4 + $0x50] sm:$0xff] %v711_v10  ;;  %v719_v14 = vld [vmem:[%s7042_s23 + $0x130] sm:$0xff]  ;;  %v721_v15 = vld [vmem:[%s7042_s23 + $0x138] sm:$0xff] }
  0xfb   : > { %714 = vst [vmem:[%s7050_s4 + $0x58] sm:$0xff] %v713_v11  ;;  %716 = vst [vmem:[%s7050_s4 + $0x60] sm:$0xff] %v715_v12  ;;  %v723_v16 = vld [vmem:[%s7042_s23 + $0x200] sm:$0xff]  ;;  %v725_v17 = vld [vmem:[%s7042_s23 + $0x208] sm:$0xff] }
  0xfc   : > { %718 = vst [vmem:[%s7050_s4 + $0x68] sm:$0xff] %v717_v13  ;;  %720 = vst [vmem:[%s7050_s4 + $0x70] sm:$0xff] %v719_v14  ;;  %v727_v18 = vld [vmem:[%s7042_s23 + $0x210] sm:$0xff]  ;;  %v729_v19 = vld [vmem:[%s7042_s23 + $0x218] sm:$0xff] }
  0xfd   : > { %722 = vst [vmem:[%s7050_s4 + $0x78] sm:$0xff] %v721_v15  ;;  %724 = vst [vmem:[%s7050_s4 + $0x80] sm:$0xff] %v723_v16  ;;  %v731_v20 = vld [vmem:[%s7042_s23 + $0x220] sm:$0xff]  ;;  %v733_v21 = vld [vmem:[%s7042_s23 + $0x228] sm:$0xff] }
  0xfe   : > { %726 = vst [vmem:[%s7050_s4 + $0x88] sm:$0xff] %v725_v17  ;;  %728 = vst [vmem:[%s7050_s4 + $0x90] sm:$0xff] %v727_v18  ;;  %v735_v22 = vld [vmem:[%s7042_s23 + $0x230] sm:$0xff]  ;;  %v737_v23 = vld [vmem:[%s7042_s23 + $0x238] sm:$0xff] }
  0xff   : > { %730 = vst [vmem:[%s7050_s4 + $0x98] sm:$0xff] %v729_v19  ;;  %732 = vst [vmem:[%s7050_s4 + $0xa0] sm:$0xff] %v731_v20 }
 0x100   : > { %734 = vst [vmem:[%s7050_s4 + $0xa8] sm:$0xff] %v733_v21  ;;  %736 = vst [vmem:[%s7050_s4 + $0xb0] sm:$0xff] %v735_v22 }
 0x101   : > { %738 = vst [vmem:[%s7050_s4 + $0xb8] sm:$0xff] %v737_v23 }
 0x102 PF: > { %p9023_p2 = scmp.ne.s32.totalorder %s9008_s2, 0 }
 0x103   : > { %s746_s24 = sand.u32 (%p9023_p2), 1, %s6659_s29   ;;  %s4737_s6 = sshll.u32 (%p9023_p2), %s6663_s30, 6 }
 0x104   : > { %744 = sbr.rel (!%p9023_p2) target bundleno = 285 (0x11d), region = 118  ;;  %s4598_s5 = sshll.u32 (%p9023_p2), %s746_s24, 8 }
 0x105   : > { %s9024_s10 = sld [smem:[#allocation108_spill]] (%p9023_p2)  ;;  %s7106_s27 = scalar_lea.vmem (%p9023_p2), [#allocation3], %s4598_s5 }
 0x10b   : > { %s7101_s25 = scalar_lea.vmem %s9024_s10, %s4737_s6 }
 0x10c   : > { %v841_v24 = vld [vmem:[%s7101_s25] sm:$0xff]  ;;  %v843_v25 = vld [vmem:[%s7101_s25 + $0x8] sm:$0xff]  ;;  %v845_v26 = vld [vmem:[%s7101_s25 + $0x10] sm:$0xff] }
 0x10d   : > { %842 = vst [vmem:[%s7106_s27] sm:$0xff] %v841_v24  ;;  %844 = vst [vmem:[%s7106_s27 + $0x8] sm:$0xff] %v843_v25  ;;  %v847_v27 = vld [vmem:[%s7101_s25 + $0x18] sm:$0xff]  ;;  %v849_v28 = vld [vmem:[%s7101_s25 + $0x20] sm:$0xff] }
 0x10e   : > { %846 = vst [vmem:[%s7106_s27 + $0x10] sm:$0xff] %v845_v26  ;;  %v851_v29 = vld [vmem:[%s7101_s25 + $0x28] sm:$0xff]  ;;  %848 = vst [vmem:[%s7106_s27 + $0x18] sm:$0xff] %v847_v27  ;;  %v853_v30 = vld [vmem:[%s7101_s25 + $0x30] sm:$0xff] }
 0x10f   : > { %850 = vst [vmem:[%s7106_s27 + $0x20] sm:$0xff] %v849_v28  ;;  %852 = vst [vmem:[%s7106_s27 + $0x28] sm:$0xff] %v851_v29  ;;  %v855_v31 = vld [vmem:[%s7101_s25 + $0x38] sm:$0xff]  ;;  %v857_v32 = vld [vmem:[%s7101_s25 + $0x100] sm:$0xff] }
 0x110   : > { %854 = vst [vmem:[%s7106_s27 + $0x30] sm:$0xff] %v853_v30  ;;  %856 = vst [vmem:[%s7106_s27 + $0x38] sm:$0xff] %v855_v31  ;;  %v859_v33 = vld [vmem:[%s7101_s25 + $0x108] sm:$0xff]  ;;  %v861_v34 = vld [vmem:[%s7101_s25 + $0x110] sm:$0xff] }
 0x111   : > { %858 = vst [vmem:[%s7106_s27 + $0x40] sm:$0xff] %v857_v32  ;;  %v863_v35 = vld [vmem:[%s7101_s25 + $0x118] sm:$0xff]  ;;  %860 = vst [vmem:[%s7106_s27 + $0x48] sm:$0xff] %v859_v33  ;;  %v865_v36 = vld [vmem:[%s7101_s25 + $0x120] sm:$0xff] }
 0x112   : > { %862 = vst [vmem:[%s7106_s27 + $0x50] sm:$0xff] %v861_v34  ;;  %864 = vst [vmem:[%s7106_s27 + $0x58] sm:$0xff] %v863_v35  ;;  %v867_v37 = vld [vmem:[%s7101_s25 + $0x128] sm:$0xff]  ;;  %v869_v38 = vld [vmem:[%s7101_s25 + $0x130] sm:$0xff] }
 0x113   : > { %866 = vst [vmem:[%s7106_s27 + $0x60] sm:$0xff] %v865_v36  ;;  %868 = vst [vmem:[%s7106_s27 + $0x68] sm:$0xff] %v867_v37  ;;  %v871_v39 = vld [vmem:[%s7101_s25 + $0x138] sm:$0xff]  ;;  %v873_v40 = vld [vmem:[%s7101_s25 + $0x200] sm:$0xff] }
 0x114   : > { %870 = vst [vmem:[%s7106_s27 + $0x70] sm:$0xff] %v869_v38  ;;  %v875_v41 = vld [vmem:[%s7101_s25 + $0x208] sm:$0xff]  ;;  %872 = vst [vmem:[%s7106_s27 + $0x78] sm:$0xff] %v871_v39  ;;  %v877_v42 = vld [vmem:[%s7101_s25 + $0x210] sm:$0xff] }
 0x115   : > { %874 = vst [vmem:[%s7106_s27 + $0x80] sm:$0xff] %v873_v40  ;;  %876 = vst [vmem:[%s7106_s27 + $0x88] sm:$0xff] %v875_v41  ;;  %v879_v43 = vld [vmem:[%s7101_s25 + $0x218] sm:$0xff]  ;;  %v881_v44 = vld [vmem:[%s7101_s25 + $0x220] sm:$0xff] }
 0x116   : > { %878 = vst [vmem:[%s7106_s27 + $0x90] sm:$0xff] %v877_v42  ;;  %880 = vst [vmem:[%s7106_s27 + $0x98] sm:$0xff] %v879_v43  ;;  %v883_v45 = vld [vmem:[%s7101_s25 + $0x228] sm:$0xff]  ;;  %v885_v46 = vld [vmem:[%s7101_s25 + $0x230] sm:$0xff] }
 0x117   : > { %882 = vst [vmem:[%s7106_s27 + $0xa0] sm:$0xff] %v881_v44  ;;  %v887_v47 = vld [vmem:[%s7101_s25 + $0x238] sm:$0xff]  ;;  %884 = vst [vmem:[%s7106_s27 + $0xa8] sm:$0xff] %v883_v45  ;;  %v889_v48 = vld [vmem:[%s7101_s25 + $0x300] sm:$0xff] }
 0x118   : > { %886 = vst [vmem:[%s7106_s27 + $0xb0] sm:$0xff] %v885_v46  ;;  %888 = vst [vmem:[%s7106_s27 + $0xb8] sm:$0xff] %v887_v47  ;;  %v891_v49 = vld [vmem:[%s7101_s25 + $0x308] sm:$0xff]  ;;  %v893_v50 = vld [vmem:[%s7101_s25 + $0x310] sm:$0xff] }
 0x119   : > { %890 = vst [vmem:[%s7106_s27 + $0xc0] sm:$0xff] %v889_v48  ;;  %892 = vst [vmem:[%s7106_s27 + $0xc8] sm:$0xff] %v891_v49  ;;  %v895_v51 = vld [vmem:[%s7101_s25 + $0x318] sm:$0xff]  ;;  %v897_v52 = vld [vmem:[%s7101_s25 + $0x320] sm:$0xff] }
 0x11a   : > { %894 = vst [vmem:[%s7106_s27 + $0xd0] sm:$0xff] %v893_v50  ;;  %v899_v53 = vld [vmem:[%s7101_s25 + $0x328] sm:$0xff]  ;;  %896 = vst [vmem:[%s7106_s27 + $0xd8] sm:$0xff] %v895_v51  ;;  %v901_v54 = vld [vmem:[%s7101_s25 + $0x330] sm:$0xff] }
 0x11b   : > { %898 = vst [vmem:[%s7106_s27 + $0xe0] sm:$0xff] %v897_v52  ;;  %900 = vst [vmem:[%s7106_s27 + $0xe8] sm:$0xff] %v899_v53  ;;  %v903_v55 = vld [vmem:[%s7101_s25 + $0x338] sm:$0xff] }
 0x11c   : > { %902 = vst [vmem:[%s7106_s27 + $0xf0] sm:$0xff] %v901_v54  ;;  %904 = vst [vmem:[%s7106_s27 + $0xf8] sm:$0xff] %v903_v55 }
 0x11d PF: > { %s911_s1 = sand.u32 1, %s6659_s29   ;;  %s4738_s22 = sshll.u32 %s6663_s30, 10 }
 0x11e   : > { %s4601_s20 = sshll.u32 %s911_s1, 6  ;;  %s7174_s18 = scalar_lea.hbm %s8898_s3, %s4738_s22 }
 0x11f   : > { %s915_s19 = scalar_lea.vmem [#allocation4], %s4601_s20  ;;  %s7178_s23 = scalar_lea.sflag [#allocation5], %s911_s1 }
 0x120   : > { %s922_s21 = sshll.u32 %s915_s19, 4  ;;  %s6581_s4 = scalar_lea.hbm %s7174_s18, 1024  ;;  %s7176_s21 = int_to_ptr.vmem [resolvable:$true] %s922_s21 }
 0x121   : > { %p6582_p5 = scmp.ne.s32.totalorder %s7174_s18, %s6581_s4  ;;  %p9025_p6 = scmp.ne.s32.totalorder %s9008_s2, 0 }
 0x122   : > { %s6585_s5 = scalar_lea.hbm %s8898_s3, 4096  ;;  %p6586_p13 = scmp.lt.u32.totalorder %s7174_s18, %s8898_s3 }
 0x123   : > { %p6583_p11 = pnand %p6582_p5, %p9025_p6  ;;  %p6587_p0 = scmp.lt.u32.totalorder %s6585_s5, %s6581_s4 }
 0x124   : > { %p6589_p8 = scmp.lt.u32.totalorder %s6581_s4, %s7174_s18 }
 0x125   : > { %p6584_p12 = pneg %p6583_p11  ;;  %p6588_p7 = por %p6587_p0, %p6586_p13 }
 0x127   : > { %p6590_p9 = por %p6589_p8, %p6588_p7 }
 0x129   : > { %p6591_p10 = pnand %p6590_p9, %p6584_p12 }
 0x12b   : > { %6594 = shalt.err (!%p6591_p10)
}
 0x12c   : > { %s6595_s10 = scalar_lea.vmem %s7176_s21, 1024  ;;  %s6679_s25 = smov [#allocation4]  }
 0x12d   : > { %p6596_p1 = scmp.ne.s32.totalorder %s7176_s21, %s6595_s10  ;;  %s6599_s27 = sshll.u32 %s6679_s25, 4  ;;  %s6600_s27 = int_to_ptr.vmem [resolvable:$false] %s6599_s27 }
 0x12e   : > { %s6601_s1 = scalar_lea.vmem %s6600_s27, 2048  ;;  %p6602_p2 = scmp.lt.s32.totalorder %s7176_s21, %s6600_s27 }
 0x12f   : > { %p6597_p4 = pnand %p6596_p1, %p9025_p6  ;;  %p6603_p5 = scmp.lt.s32.totalorder %s6601_s1, %s6595_s10 }
 0x131   : > { %p6598_p3 = pneg %p6597_p4  ;;  %p6604_p11 = por %p6603_p5, %p6602_p2 }
 0x133   : > { %p6605_p13 = pnand %p6604_p11, %p6598_p3 }
 0x135   : > { %6608 = shalt.err (!%p6605_p13)
}
 0x136   : > { %s6680_s22 = smov 128   ;;  %s6681_s20 = smov 8  }
 0x137   : > { %6134 = dma.hbm_to_vmem [thread:$0]  (%p9025_p6), %s7174_s18, 1024, %s7176_s21, %s7178_s23, %s6680_s22, %s6680_s22, %s6681_s20  }
 0x138 PF: > { %p9026_p12 = scmp.ne.s32.totalorder %s9015_s26, 0 }
 0x13a   : > { %934 = sbr.rel (%p9026_p12) target bundleno = 1566 (0x61e), region = 160 }
 0x141   : > { %s9027_s14 = sld [smem:[#allocation32_spill]]  ;;  %s7205_s0 = sand.u32 1, %s6655_s28  }
 0x142   : > { %s6117_s19 = smul.u32 192, %s7205_s0  ;;  %s4605_s4 = sshll.u32 %s7205_s0, 8 }
 0x143   : > { %s4606_s24 = sshll.u32 %s7205_s0, 6  ;;  %s7214_s2 = scalar_lea.vmem [#allocation3], %s4605_s4 }
 0x144   : > { %s7210_s6 = scalar_lea.vmem [#allocation2], %s6117_s19  ;;  %s951_s18 = scalar_lea.sflag [#allocation5], %s7205_s0 }
 0x145   : > { %s7217_s26 = scalar_lea.vmem [#allocation4], %s4606_s24 }
 0x147   : > { %p9028_p6 = scmp.ne.s32.totalorder %s9027_s14, 0 }
 0x149   : > { %6626 = dma.done.wait (%p9028_p6), %s951_s18, 1024  }
 0x14a   : > { %6628 = vsyncadd (%p9028_p6), %s951_s18, 4294966272  ;;  %s9029_s21 = sld [smem:[#allocation29_spill]] }
 0x150   : > { %p9030_p0 = scmp.eq.s32.totalorder %s9029_s21, 0 }
 0x152   : > { %6630 = dma.done.wait (%p9030_p0), [#allocation8], 12288   ;;  %p9031_p7 = pmov %p9030_p0 }
 0x153   : > { %p9032_p8 = pmov %p9030_p0 }
 0x154   : > { %6632 = vsyncadd (%p9031_p7), [#allocation8], 4294955008 }
 0x155   : > { %6634 = dma.done.wait (%p9032_p8), [#allocation11], 22528   ;;  %p9033_p9 = pmov %p9030_p0 }
 0x156   : > { %p9034_p10 = pmov %p9030_p0 }
 0x157   : > { %6636 = vsyncadd (%p9033_p9), [#allocation11], 4294944768 }
 0x158   : > { %6638 = dma.done.wait (%p9034_p10), [#allocation14], 4096   ;;  %p9035_p1 = pmov %p9030_p0 }
 0x159   : > { %p9036_p4 = pmov %p9030_p0 }
 0x15a   : > { %6640 = vsyncadd (%p9035_p1), [#allocation14], 4294963200 }
 0x15b   : > { %6642 = dma.done.wait (%p9036_p4), [#allocation17], 4096   ;;  %p9037_p3 = pmov %p9030_p0 }
 0x15c   : > { %v6682_v56 = vmov 0.0   ;;  %v1071_v57 = vld [vmem:[#allocation7 + $0x8] sm:$0xff]  ;;  %v1073_v58 = vld [vmem:[#allocation7 + $0x18] sm:$0xff]  ;;  %v1070_v59 = vld [vmem:[#allocation7] sm:$0xff]  ;;  %s9038_s7 = sld [smem:[#allocation110_spill]]  ;;  %s9039_s25 = sld [smem:[#allocation114_spill]] }
 0x15d   : > { %6644 = vsyncadd (%p9037_p3), [#allocation17], 4294963200  ;;  %1178 = vmatprep.mubr.f32.mxu0 %v6682_v56  ;;  %v5500_v60 = vpack.c.bf16 %v1073_v58, %v1071_v57  ;;  %v1072_v61 = vld [vmem:[#allocation7 + $0x10] sm:$0xff]  ;;  %v1075_v62 = vld [vmem:[#allocation7 + $0x28] sm:$0xff]  ;;  %s9040_s22 = sld [smem:[#allocation111_spill]]  ;;  %s9041_s19 = sld [smem:[#allocation112_spill]] }
 0x15e   : > { %v1077_v63 = vld [vmem:[#allocation7 + $0x38] sm:$0xff]  ;;  %v5502_v0 = vpack.c.bf16 %v1072_v61, %v1070_v59  ;;  %v1074_v2 = vld [vmem:[#allocation7 + $0x20] sm:$0xff]  ;;  %v1076_v3 = vld [vmem:[#allocation7 + $0x30] sm:$0xff]  ;;  %vm2324_vm0 = vcmask 64512   ;;  %s4616_s24 = sshll.u32 %s9029_s21, 3  ;;  %s9043_s23 = sld [smem:[#allocation113_spill]] }
 0x15f   : > { %v5504_v1 = vpack.c.bf16 %v1077_v63, %v1075_v62  ;;  %v1079_v4 = vld [vmem:[#allocation7 + $0x48] sm:$0xff]  ;;  %5501 = vmatprep.subr.bf16.mxu0 %v5500_v60  ;;  %v1081_v5 = vld [vmem:[#allocation7 + $0x58] sm:$0xff]  ;;  %v5506_v6 = vpack.c.bf16 %v1076_v3, %v1074_v2  ;;  %v1078_v8 = vld [vmem:[#allocation7 + $0x40] sm:$0xff]  ;;  %p1053_p2 = scmp.lt.s32.totalorder %s4616_s24, 31  ;;  %s9044_s11 = sld [smem:[#allocation106_spill]] }
 0x160   : > { %5503 = vmatpush1.bf16.msra.mxu0 %v5502_v0  ;;  %v5508_v7 = vpack.c.bf16 %v1081_v5, %v1079_v4  ;;  %v1080_v9 = vld [vmem:[#allocation7 + $0x50] sm:$0xff]  ;;  %v1083_v10 = vld [vmem:[#allocation7 + $0x68] sm:$0xff]  ;;  %v1085_v11 = vld [vmem:[#allocation7 + $0x78] sm:$0xff]  ;;  %s9231_s27 = sld [smem:[#allocation115_spill]]  ;;  %s8788_s1 = scalar_lea.vmem [#allocation19], %s4605_s4 }
 0x161   : > { %5505 = vmatprep.subr.bf16.mxu0 %v5504_v1  ;;  %v5510_v12 = vpack.c.bf16 %v1080_v9, %v1078_v8  ;;  %v5512_v13 = vpack.c.bf16 %v1085_v11, %v1083_v10  ;;  %v1082_v14 = vld [vmem:[#allocation7 + $0x60] sm:$0xff]  ;;  %v1084_v15 = vld [vmem:[#allocation7 + $0x70] sm:$0xff]  ;;  %v1087_v16 = vld [vmem:[#allocation7 + $0x88] sm:$0xff]  ;;  %s9244_s24 = smov (!%p1053_p2, %s4616_s24), 31  ;;  %s4346_s4 = scalar_lea.sflag [#allocation6], %s7205_s0 }
 0x162   : > { %v1089_v17 = vld [vmem:[#allocation7 + $0x98] sm:$0xff]  ;;  %v5514_v18 = vpack.c.bf16 %v1084_v15, %v1082_v14  ;;  %v1086_v19 = vld [vmem:[#allocation7 + $0x80] sm:$0xff]  ;;  %v1088_v20 = vld [vmem:[#allocation7 + $0x90] sm:$0xff] }
 0x163   : > { %v1091_v21 = vld [vmem:[#allocation7 + $0xa8] sm:$0xff]  ;;  %v5516_v22 = vpack.c.bf16 %v1089_v17, %v1087_v16  ;;  %v1093_v23 = vld [vmem:[#allocation7 + $0xb8] sm:$0xff]  ;;  %v1227_v27 = vld [vmem:[#allocation9] sm:$0xff]  ;;  %v5518_v34 = vpack.c.bf16 %v1088_v20, %v1086_v19 }
 0x164   : > { %5507 = vmatpush1.bf16.msra.mxu0 %v5506_v6  ;;  %v1228_v24 = vld [vmem:[#allocation9 + $0x8] sm:$0xff]  ;;  %v1230_v25 = vld [vmem:[#allocation9 + $0x18] sm:$0xff]  ;;  %v1229_v28 = vld [vmem:[#allocation9 + $0x10] sm:$0xff]  ;;  %v5520_v38 = vpack.c.bf16 %v1093_v23, %v1091_v21 }
 0x165   : > { %5509 = vmatprep.subr.bf16.mxu0 %v5508_v7  ;;  %v7240_v26 = vpack.c.bf16 %v1230_v25, %v1228_v24  ;;  %v1232_v29 = vld [vmem:[#allocation9 + $0x28] sm:$0xff]  ;;  %v7242_v30 = vpack.c.bf16 %v1229_v28, %v1227_v27  ;;  %v1234_v31 = vld [vmem:[#allocation9 + $0x38] sm:$0xff]  ;;  %v1231_v32 = vld [vmem:[#allocation9 + $0x20] sm:$0xff] }
 0x166   : > { %v1233_v33 = vld [vmem:[#allocation9 + $0x30] sm:$0xff]  ;;  %v7245_v35 = vpack.c.bf16 %v1234_v31, %v1232_v29  ;;  %v1236_v36 = vld [vmem:[#allocation9 + $0x48] sm:$0xff]  ;;  %v1238_v37 = vld [vmem:[#allocation9 + $0x58] sm:$0xff] }
 0x167   : > { %5533 = vmatprep.subr.bf16.mxu1 %v7240_v26  ;;  %v1090_v39 = vld [vmem:[#allocation7 + $0xa0] sm:$0xff]  ;;  %v1092_v40 = vld [vmem:[#allocation7 + $0xb0] sm:$0xff]  ;;  %v1095_v41 = vld [vmem:[#allocation7 + $0xc8] sm:$0xff]  ;;  %v7248_v42 = vpack.c.bf16 %v1233_v33, %v1231_v32  ;;  %v7251_v44 = vpack.c.bf16 %v1238_v37, %v1236_v36 }
 0x168   : > { %5511 = vmatpush1.bf16.msra.mxu0 %v5510_v12  ;;  %5535 = vmatpush1.bf16.msra.mxu1 %v7242_v30  ;;  %v1097_v43 = vld [vmem:[#allocation7 + $0xd8] sm:$0xff]  ;;  %v1235_v45 = vld [vmem:[#allocation9 + $0x40] sm:$0xff]  ;;  %v1237_v46 = vld [vmem:[#allocation9 + $0x50] sm:$0xff]  ;;  %v5522_v49 = vpack.c.bf16 %v1092_v40, %v1090_v39 }
 0x169   : > { %5513 = vmatprep.subr.bf16.mxu0 %v5512_v13  ;;  %5537 = vmatprep.subr.bf16.mxu1 %v7245_v35  ;;  %v1240_v47 = vld [vmem:[#allocation9 + $0x68] sm:$0xff]  ;;  %v1242_v48 = vld [vmem:[#allocation9 + $0x78] sm:$0xff]  ;;  %v5524_v50 = vpack.c.bf16 %v1097_v43, %v1095_v41  ;;  %v1094_v51 = vld [vmem:[#allocation7 + $0xc0] sm:$0xff]  ;;  %v7254_v54 = vpack.c.bf16 %v1237_v46, %v1235_v45 }
 0x16a   : > { %v1096_v52 = vld [vmem:[#allocation7 + $0xd0] sm:$0xff]  ;;  %v1099_v53 = vld [vmem:[#allocation7 + $0xe8] sm:$0xff]  ;;  %v1101_v55 = vld [vmem:[#allocation7 + $0xf8] sm:$0xff]  ;;  %v7257_v57 = vpack.c.bf16 %v1242_v48, %v1240_v47 }
 0x16b   : > { %v1239_v58 = vld [vmem:[#allocation9 + $0x60] sm:$0xff]  ;;  %v1241_v59 = vld [vmem:[#allocation9 + $0x70] sm:$0xff]  ;;  %v1244_v60 = vld [vmem:[#allocation9 + $0x88] sm:$0xff]  ;;  %v5526_v62 = vpack.c.bf16 %v1096_v52, %v1094_v51  ;;  %v5528_v63 = vpack.c.bf16 %v1101_v55, %v1099_v53 }
 0x16c   : > { %5515 = vmatpush1.bf16.msra.mxu0 %v5514_v18  ;;  %5539 = vmatpush1.bf16.msra.mxu1 %v7248_v42  ;;  %v1246_v61 = vld [vmem:[#allocation9 + $0x98] sm:$0xff]  ;;  %v1098_v0 = vld [vmem:[#allocation7 + $0xe0] sm:$0xff]  ;;  %v1100_v1 = vld [vmem:[#allocation7 + $0xf0] sm:$0xff]  ;;  %v7260_v2 = vpack.c.bf16 %v1241_v59, %v1239_v58 }
 0x16d   : > { %5517 = vmatprep.subr.bf16.mxu0 %v5516_v22  ;;  %5541 = vmatprep.subr.bf16.mxu1 %v7251_v44  ;;  %v7263_v3 = vpack.c.bf16 %v1246_v61, %v1244_v60  ;;  %v1243_v4 = vld [vmem:[#allocation9 + $0x80] sm:$0xff]  ;;  %v1245_v5 = vld [vmem:[#allocation9 + $0x90] sm:$0xff]  ;;  %v1248_v6 = vld [vmem:[#allocation9 + $0xa8] sm:$0xff]  ;;  %v5530_v8 = vpack.c.bf16 %v1100_v1, %v1098_v0 }
 0x16e   : > { %v1250_v7 = vld [vmem:[#allocation9 + $0xb8] sm:$0xff]  ;;  %v7266_v9 = vpack.c.bf16 %v1245_v5, %v1243_v4  ;;  %v1247_v11 = vld [vmem:[#allocation9 + $0xa0] sm:$0xff]  ;;  %v1249_v12 = vld [vmem:[#allocation9 + $0xb0] sm:$0xff] }
 0x16f   : > { %v7269_v10 = vpack.c.bf16 %v1250_v7, %v1248_v6  ;;  %v1252_v13 = vld [vmem:[#allocation9 + $0xc8] sm:$0xff]  ;;  %v1254_v14 = vld [vmem:[#allocation9 + $0xd8] sm:$0xff]  ;;  %v1062_v15 = vld [vmem:[%s7217_s26] sm:$0xff]  ;;  %v7274_v16 = vpack.c.bf16 %v1249_v12, %v1247_v11 }
 0x170   : > { %5519 = vmatpush1.bf16.msra.mxu0 %v5518_v34  ;;  %5543 = vmatpush1.bf16.msra.mxu1 %v7254_v54  ;;  %v7277_v17 = vpack.c.bf16 %v1254_v14, %v1252_v13  ;;  %v1251_v18 = vld [vmem:[#allocation9 + $0xc0] sm:$0xff]  ;;  %v1253_v19 = vld [vmem:[#allocation9 + $0xd0] sm:$0xff]  ;;  %v1256_v20 = vld [vmem:[#allocation9 + $0xe8] sm:$0xff] }
 0x171   : > { %5521 = vmatprep.subr.bf16.mxu0 %v5520_v38  ;;  %5545 = vmatprep.subr.bf16.mxu1 %v7257_v57  ;;  %v1258_v21 = vld [vmem:[#allocation9 + $0xf8] sm:$0xff]  ;;  %v1063_v22 = vld [vmem:[%s7217_s26 + $0x8] sm:$0xff]  ;;  %v7284_v23 = vpack.c.bf16 %v1253_v19, %v1251_v18  ;;  %v1255_v25 = vld [vmem:[#allocation9 + $0xe0] sm:$0xff] }
 0x172   : > { %v7287_v24 = vpack.c.bf16 %v1258_v21, %v1256_v20  ;;  %v1260_v27 = vld [vmem:[#allocation9 + $0x108] sm:$0xff]  ;;  %v1262_v28 = vld [vmem:[#allocation9 + $0x118] sm:$0xff]  ;;  %v1064_v29 = vld [vmem:[%s7217_s26 + $0x10] sm:$0xff] }
 0x173   : > { %v7297_v31 = vpack.c.bf16 %v1262_v28, %v1260_v27  ;;  %v1259_v32 = vld [vmem:[#allocation9 + $0x100] sm:$0xff]  ;;  %v1261_v33 = vld [vmem:[#allocation9 + $0x110] sm:$0xff]  ;;  %v1264_v34 = vld [vmem:[#allocation9 + $0x128] sm:$0xff] }
 0x174   : > { %5523 = vmatpush1.bf16.msra.mxu0 %v5522_v49  ;;  %5547 = vmatpush1.bf16.msra.mxu1 %v7260_v2  ;;  %v1065_v36 = vld [vmem:[%s7217_s26 + $0x18] sm:$0xff]  ;;  %v7304_v37 = vpack.c.bf16 %v1261_v33, %v1259_v32  ;;  %v1263_v39 = vld [vmem:[#allocation9 + $0x120] sm:$0xff]  ;;  %v1265_v40 = vld [vmem:[#allocation9 + $0x130] sm:$0xff] }
 0x175   : > { %5525 = vmatprep.subr.bf16.mxu0 %v5524_v50  ;;  %5549 = vmatprep.subr.bf16.mxu1 %v7263_v3  ;;  %v1268_v41 = vld [vmem:[#allocation9 + $0x148] sm:$0xff]  ;;  %v1066_v43 = vld [vmem:[%s7217_s26 + $0x20] sm:$0xff]  ;;  %v1269_v47 = vld [vmem:[#allocation9 + $0x150] sm:$0xff] }
 0x176   : > { %v1267_v46 = vld [vmem:[#allocation9 + $0x140] sm:$0xff]  ;;  %v1272_v48 = vld [vmem:[#allocation9 + $0x168] sm:$0xff]  ;;  %v1274_v49 = vld [vmem:[#allocation9 + $0x178] sm:$0xff] }
 0x177   : > { %v1067_v50 = vld [vmem:[%s7217_s26 + $0x28] sm:$0xff]  ;;  %v5574_v51 = vpack.c.bf16 %v1269_v47, %v1267_v46  ;;  %v5576_v52 = vpack.c.bf16 %v1274_v49, %v1272_v48  ;;  %v1271_v53 = vld [vmem:[#allocation9 + $0x160] sm:$0xff]  ;;  %v1068_v58 = vld [vmem:[%s7217_s26 + $0x30] sm:$0xff] }
 0x178   : > { %5527 = vmatpush1.bf16.msra.mxu0 %v5526_v62  ;;  %5551 = vmatpush1.bf16.msra.mxu1 %v7266_v9  ;;  %v1276_v55 = vld [vmem:[#allocation9 + $0x188] sm:$0xff]  ;;  %v1275_v61 = vld [vmem:[#allocation9 + $0x180] sm:$0xff]  ;;  %v1277_v62 = vld [vmem:[#allocation9 + $0x190] sm:$0xff] }
 0x179   : > { %5529 = vmatprep.subr.bf16.mxu0 %v5528_v63  ;;  %5553 = vmatprep.subr.bf16.mxu1 %v7269_v10  ;;  %v1280_v63 = vld [vmem:[#allocation9 + $0x1a8] sm:$0xff]  ;;  %v1282_v0 = vld [vmem:[#allocation9 + $0x1b8] sm:$0xff]  ;;  %v1279_v4 = vld [vmem:[#allocation9 + $0x1a0] sm:$0xff] }
 0x17a   : > { %v1069_v1 = vld [vmem:[%s7217_s26 + $0x38] sm:$0xff]  ;;  %v1281_v5 = vld [vmem:[#allocation9 + $0x1b0] sm:$0xff]  ;;  %v1284_v6 = vld [vmem:[#allocation9 + $0x1c8] sm:$0xff] }
 0x17b   : > { %v1286_v7 = vld [vmem:[#allocation9 + $0x1d8] sm:$0xff]  ;;  %v1288_v12 = vld [vmem:[#allocation9 + $0x1e8] sm:$0xff]  ;;  %v1803_v19 = vld [vmem:[#allocation10 + $0x30] sm:$0xff] }
 0x17c   : > { %5531 = vmatpush1.bf16.msra.mxu0 %v5530_v8  ;;  %5555 = vmatpush1.bf16.msra.mxu1 %v7274_v16  ;;  %v5588_v8 = vpack.c.bf16 %v1286_v7, %v1284_v6  ;;  %v1290_v13 = vld [vmem:[#allocation9 + $0x1f8] sm:$0xff]  ;;  %v1798_v18 = vld [vmem:[#allocation10 + $0x8] sm:$0xff]  ;;  %v1102_v27 = vld [vmem:[%s9038_s7] sm:$0x3] }
 0x17d   : > { %5597 = vmatprep.subr.bf16.mxu0 %v7240_v26  ;;  %5557 = vmatprep.subr.bf16.mxu1 %v7277_v17  ;;  %v1257_v26 = vld [vmem:[#allocation9 + $0xf0] sm:$0xff]  ;;  %v5592_v14 = vpack.c.bf16 %v1290_v13, %v1288_v12  ;;  %v5660_v20 = vpack.c.bf16 %v1803_v19, %v1798_v18  ;;  %v1800_v21 = vld [vmem:[#allocation10 + $0x18] sm:$0xff]  ;;  %v1802_v32 = vld [vmem:[#allocation10 + $0x28] sm:$0xff] }
 0x17e   : > { %v1812_v46 = vld [vmem:[#allocation10 + $0x78] sm:$0xff] }
 0x17f   : > { %1179 = vmatmul.mubr.f32.vlgmr.msra.gmra.mrb[0].mxu0 %v1062_v15  ;;  %v1287_v15 = vld [vmem:[#allocation9 + $0x1e0] sm:$0xff] }
 0x180   : > { %1184 = vmatprep.mubr.f32.mxu0 %v6682_v56  ;;  %5599 = vmatpush1.bf16.msra.mxu0 %v7242_v30  ;;  %v7294_v30 = vpack.c.bf16 %v1257_v26, %v1255_v25 }
 0x181   : > { %5601 = vmatprep.subr.bf16.mxu0 %v7245_v35  ;;  %5559 = vmatpush1.bf16.msra.mxu1 %v7284_v23  ;;  %v1266_v35 = vld [vmem:[#allocation9 + $0x138] sm:$0xff] }
 0x182   : > { %5561 = vmatprep.subr.bf16.mxu1 %v7287_v24  ;;  %v7307_v38 = vpack.c.bf16 %v1266_v35, %v1264_v34  ;;  %v1808_v34 = vld [vmem:[#allocation10 + $0x58] sm:$0xff]  ;;  %v1813_v35 = vld [vmem:[#allocation10 + $0x80] sm:$0xff] }
 0x183   : > { %1185 = vmatmul.mubr.f32.gmra.mrb[2].mxu0 %v1063_v22  ;;  %v1805_v22 = vld [vmem:[#allocation10 + $0x40] sm:$0xff] }
 0x184   : > { %1190 = vmatprep.mubr.f32.mxu0 %v6682_v56  ;;  %5603 = vmatpush1.bf16.msra.mxu0 %v7248_v42  ;;  %v1270_v42 = vld [vmem:[#allocation9 + $0x158] sm:$0xff] }
 0x185   : > { %5605 = vmatprep.subr.bf16.mxu0 %v7251_v44  ;;  %5563 = vmatpush1.bf16.msra.mxu1 %v7294_v30  ;;  %v5570_v44 = vpack.c.bf16 %v1265_v40, %v1263_v39  ;;  %v5572_v45 = vpack.c.bf16 %v1270_v42, %v1268_v41  ;;  %v1804_v39 = vld [vmem:[#allocation10 + $0x38] sm:$0xff]  ;;  %v1810_v42 = vld [vmem:[#allocation10 + $0x68] sm:$0xff] }
 0x186   : > { %5565 = vmatprep.subr.bf16.mxu1 %v7297_v31 }
 0x187   : > { %1191 = vmatmul.mubr.f32.gmra.mrb[4].mxu0 %v1064_v29 }
 0x188   : > { %1196 = vmatprep.mubr.f32.mxu0 %v6682_v56  ;;  %5607 = vmatpush1.bf16.msra.mxu0 %v7254_v54  ;;  %v1273_v54 = vld [vmem:[#allocation9 + $0x170] sm:$0xff] }
 0x189   : > { %5609 = vmatprep.subr.bf16.mxu0 %v7257_v57  ;;  %5567 = vmatpush1.bf16.msra.mxu1 %v7304_v37  ;;  %v1278_v57 = vld [vmem:[#allocation9 + $0x198] sm:$0xff]  ;;  %v5578_v59 = vpack.c.bf16 %v1273_v54, %v1271_v53 }
 0x18a   : > { %5569 = vmatprep.subr.bf16.mxu1 %v7307_v38  ;;  %v5580_v60 = vpack.c.bf16 %v1278_v57, %v1276_v55  ;;  %v1809_v57 = vld [vmem:[#allocation10 + $0x60] sm:$0xff] }
 0x18b   : > { %1197 = vmatmul.mubr.f32.gmra.mrb[6].mxu0 %v1065_v36 }
 0x18c   : > { %1202 = vmatprep.mubr.f32.mxu0 %v6682_v56  ;;  %5611 = vmatpush1.bf16.msra.mxu0 %v7260_v2  ;;  %v5582_v2 = vpack.c.bf16 %v1277_v62, %v1275_v61  ;;  %v1820_v61 = vld [vmem:[#allocation10 + $0xb8] sm:$0xff]  ;;  %v1825_v62 = vld [vmem:[#allocation10 + $0xe0] sm:$0xff] }
 0x18d   : > { %5613 = vmatprep.subr.bf16.mxu0 %v7263_v3  ;;  %5571 = vmatpush1.bf16.msra.mxu1 %v5570_v44  ;;  %v5584_v3 = vpack.c.bf16 %v1282_v0, %v1280_v63  ;;  %v1817_v0 = vld [vmem:[#allocation10 + $0xa0] sm:$0xff] }
 0x18e   : > { %5573 = vmatprep.subr.bf16.mxu1 %v5572_v45 }
 0x18f   : > { %1203 = vmatmul.mubr.f32.gmra.mrb[8].mxu0 %v1066_v43  ;;  %v1815_v43 = vld [vmem:[#allocation10 + $0x90] sm:$0xff] }
 0x190   : > { %1208 = vmatprep.mubr.f32.mxu0 %v6682_v56  ;;  %5615 = vmatpush1.bf16.msra.mxu0 %v7266_v9  ;;  %v1283_v9 = vld [vmem:[#allocation9 + $0x1c0] sm:$0xff]  ;;  %v5728_v55 = vpack.c.bf16 %v1815_v43, %v1810_v42 }
 0x191   : > { %5617 = vmatprep.subr.bf16.mxu0 %v7269_v10  ;;  %5575 = vmatpush1.bf16.msra.mxu1 %v5574_v51  ;;  %v1285_v10 = vld [vmem:[#allocation9 + $0x1d0] sm:$0xff] }
 0x192   : > { %5577 = vmatprep.subr.bf16.mxu1 %v5576_v52  ;;  %v5590_v11 = vpack.c.bf16 %v1285_v10, %v1283_v9  ;;  %v1824_v9 = vld [vmem:[#allocation10 + $0xd8] sm:$0xff] }
 0x193   : > { %1209 = vmatmul.mubr.f32.gmra.mrb[10].mxu0 %v1067_v50  ;;  %v1818_v50 = vld [vmem:[#allocation10 + $0xa8] sm:$0xff] }
 0x194   : > { %1214 = vmatprep.mubr.f32.mxu0 %v6682_v56  ;;  %5619 = vmatpush1.bf16.msra.mxu0 %v7274_v16  ;;  %v1289_v16 = vld [vmem:[#allocation9 + $0x1f0] sm:$0xff] }
 0x195   : > { %5621 = vmatprep.subr.bf16.mxu0 %v7277_v17  ;;  %5579 = vmatpush1.bf16.msra.mxu1 %v5578_v59  ;;  %v5594_v17 = vpack.c.bf16 %v1289_v16, %v1287_v15 }
 0x196   : > { %5581 = vmatprep.subr.bf16.mxu1 %v5580_v60 }
 0x197   : > { %1215 = vmatmul.mubr.f32.gmra.mrb[12].mxu0 %v1068_v58  ;;  %v1814_v58 = vld [vmem:[#allocation10 + $0x88] sm:$0xff] }
 0x198   : > { %1220 = vmatprep.mubr.f32.mxu0 %v6682_v56  ;;  %5623 = vmatpush1.bf16.msra.mxu0 %v7284_v23  ;;  %v5586_v56 = vpack.c.bf16 %v1281_v5, %v1279_v4  ;;  %v5724_v23 = vpack.c.bf16 %v1805_v22, %v1800_v21  ;;  %v5730_v4 = vpack.c.bf16 %v1814_v58, %v1809_v57  ;;  %v1832_v57 = vld [vmem:[#allocation10 + $0x118] sm:$0xff]  ;;  %v1835_v58 = vld [vmem:[#allocation10 + $0x130] sm:$0xff] }
 0x199   : > { %5625 = vmatprep.subr.bf16.mxu0 %v7287_v24  ;;  %5583 = vmatpush1.bf16.msra.mxu1 %v5582_v2  ;;  %v1104_v24 = vlaneseq }
 0x19a   : > { %5585 = vmatprep.subr.bf16.mxu1 %v5584_v3 }
 0x19b   : > { %1221 = vmatmul.mubr.f32.gmra.mrb[14].mxu0 %v1069_v1  ;;  %v7331_v25 = vshrl.u32 %v1104_v24, 7  ;;  %v1822_v1 = vld [vmem:[#allocation10 + $0xc8] sm:$0xff] }
 0x19c   : > { %5627 = vmatpush1.bf16.msra.mxu0 %v7294_v30 }
 0x19d   : > { %5629 = vmatprep.subr.bf16.mxu0 %v7297_v31  ;;  %5587 = vmatpush1.bf16.msra.mxu1 %v5586_v56  ;;  %v7334_v26 = vsub.s32 0, %v7331_v25  ;;  %v7340_v28 = vsub.s32 1, %v7331_v25  ;;  %v1797_v31 = vld [vmem:[#allocation10] sm:$0xff] }
 0x19e   : > { %5589 = vmatprep.subr.bf16.mxu1 %v5588_v8  ;;  %v5662_v41 = vpack.c.bf16 %v1802_v32, %v1797_v31 }
 0x19f   : > { %v7343_v29 = vrot.slane %v1102_v27, %v7334_v26  ;;  %v7346_v30 = vrot.slane %v1102_v27, %v7340_v28 }
 0x1a0   : > { %5631 = vmatpush1.bf16.msra.mxu0 %v7304_v37 }
 0x1a1   : > { %5633 = vmatprep.subr.bf16.mxu0 %v7307_v38  ;;  %5591 = vmatpush1.bf16.msra.mxu1 %v5590_v11  ;;  %v1799_v38 = vld [vmem:[#allocation10 + $0x10] sm:$0xff] }
 0x1a2   : > { %5593 = vmatprep.subr.bf16.mxu1 %v5592_v14  ;;  %v5726_v49 = vpack.c.bf16 %v1804_v39, %v1799_v38 }
 0x1a4   : > { %5635 = vmatpush1.bf16.msra.mxu0 %v5570_v44  ;;  %v5664_v44 = vpack.c.bf16 %v1813_v35, %v1808_v34 }
 0x1a5   : > { %5637 = vmatprep.subr.bf16.mxu0 %v5572_v45  ;;  %5595 = vmatpush1.bf16.msra.mxu1 %v5594_v17  ;;  %v1807_v45 = vld [vmem:[#allocation10 + $0x50] sm:$0xff] }
 0x1a6   : > { %5661 = vmatprep.subr.bf16.mxu1 %v5660_v20 }
 0x1a8   : > { %5639 = vmatpush1.bf16.msra.mxu0 %v5574_v51  ;;  %v1823_v51 = vld [vmem:[#allocation10 + $0xd0] sm:$0xff] }
 0x1a9   : > { %5641 = vmatprep.subr.bf16.mxu0 %v5576_v52  ;;  %v5668_v63 = vpack.c.bf16 %v1823_v51, %v1818_v50  ;;  %v1828_v51 = vld [vmem:[#allocation10 + $0xf8] sm:$0xff] }
 0x1ac   : > { %5643 = vmatpush1.bf16.msra.mxu0 %v5578_v59 }
 0x1ad   : > { %5645 = vmatprep.subr.bf16.mxu0 %v5580_v60  ;;  %v5666_v60 = vpack.c.bf16 %v1812_v46, %v1807_v45 }
 0x1b0   : > { %5647 = vmatpush1.bf16.msra.mxu0 %v5582_v2 }
 0x1b1   : > { %5649 = vmatprep.subr.bf16.mxu0 %v5584_v3 }
 0x1b4   : > { %5651 = vmatpush1.bf16.msra.mxu0 %v5586_v56  ;;  %v5732_v56 = vpack.c.bf16 %v1825_v62, %v1820_v61  ;;  %v1829_v62 = vld [vmem:[#allocation10 + $0x100] sm:$0xff] }
 0x1b5   : > { %5653 = vmatprep.subr.bf16.mxu0 %v5588_v8  ;;  %v1819_v8 = vld [vmem:[#allocation10 + $0xb0] sm:$0xff] }
 0x1b8   : > { %5655 = vmatpush1.bf16.msra.mxu0 %v5590_v11  ;;  %v5670_v11 = vpack.c.bf16 %v1822_v1, %v1817_v0  ;;  %v1838_v1 = vld [vmem:[#allocation10 + $0x148] sm:$0xff] }
 0x1b9   : > { %5657 = vmatprep.subr.bf16.mxu0 %v5592_v14  ;;  %v5734_v14 = vpack.c.bf16 %v1824_v9, %v1819_v8 }
 0x1bc   : > { %5659 = vmatpush1.bf16.msra.mxu0 %v5594_v17 }
 0x1bd   : > { %5725 = vmatprep.subr.bf16.mxu0 %v5724_v23 }
 0x252   : > { %v1180_v33 = vpop.f32.mrb[0].mxu0 }
 0x253   : > { %v7349_v36 = vadd.f32 %v1180_v33, %v7343_v29  ;;  %v1182_v37 = vpop.f32.mrb[1].mxu0 }
 0x254   : > { %v7352_v40 = vadd.f32 %v1182_v37, %v7346_v30 }
 0x255   : > { %v1404_v52 = vmul.f32 %v7349_v36, %v7349_v36 }
 0x256   : > { %v1186_v47 = vpop.f32.mrb[2].mxu0  ;;  %1355 = vmatprep.mubr.f32.mxu1 %v7352_v40  ;;  %v1405_v48 = vmul.f32 %v7352_v40, %v7352_v40 }
 0x257   : > { %v7360_v53 = vadd.f32 %v1186_v47, %v7343_v29  ;;  %v1188_v54 = vpop.f32.mrb[3].mxu0  ;;  %1356 = vmatmul.mubr.f32.vlgmr.msra.gmra.mrb[0].mxu1 %v7349_v36 }
 0x258   : > { %v7364_v59 = vadd.f32 %v1188_v54, %v7346_v30  ;;  %1484 = vmatprep.mubr.f32.mxu0 %v1405_v48  ;;  %5663 = vmatpush1.bf16.msra.mxu1 %v5662_v41  ;;  %v1830_v54 = vld [vmem:[#allocation10 + $0x108] sm:$0xff] }
 0x259   : > { %1485 = vmatmul.mubr.f32.vlgmr.msra.gmra.mrb[16].mxu0 %v1404_v52  ;;  %5665 = vmatprep.subr.bf16.mxu1 %v5664_v44  ;;  %v1406_v7 = vmul.f32 %v7360_v53, %v7360_v53  ;;  %v1833_v52 = vld [vmem:[#allocation10 + $0x120] sm:$0xff]  ;;  %v5736_v61 = vpack.c.bf16 %v1835_v58, %v1830_v54 }
 0x25a   : > { %v1192_v2 = vpop.f32.mrb[4].mxu0  ;;  %1361 = vmatprep.mubr.f32.mxu1 %v7364_v59  ;;  %v1407_v3 = vmul.f32 %v7364_v59, %v7364_v59  ;;  %5727 = vmatpush1.bf16.msra.mxu0 %v5726_v49 }
 0x25b   : > { %v7370_v5 = vadd.f32 %v1192_v2, %v7343_v29  ;;  %v1194_v6 = vpop.f32.mrb[5].mxu0  ;;  %1362 = vmatmul.mubr.f32.gmra.mrb[2].mxu1 %v7360_v53  ;;  %5729 = vmatprep.subr.bf16.mxu0 %v5728_v55  ;;  %v5672_v55 = vpack.c.bf16 %v1833_v52, %v1828_v51  ;;  %v1843_v2 = vld [vmem:[#allocation10 + $0x170] sm:$0xff]  ;;  %v1864_v52 = vld [vmem:[#allocation10 + $0x218] sm:$0xff] }
 0x25c   : > { %v7376_v10 = vadd.f32 %v1194_v6, %v7346_v30  ;;  %1490 = vmatprep.mubr.f32.mxu0 %v1407_v3  ;;  %5667 = vmatpush1.bf16.msra.mxu1 %v5666_v60  ;;  %v1840_v3 = vld [vmem:[#allocation10 + $0x158] sm:$0xff]  ;;  %v1837_v6 = vld [vmem:[#allocation10 + $0x140] sm:$0xff]  ;;  %v1859_v51 = vld [vmem:[#allocation10 + $0x1f0] sm:$0xff] }
 0x25d   : > { %1491 = vmatmul.mubr.f32.gmra.mrb[18].mxu0 %v1406_v7  ;;  %5669 = vmatprep.subr.bf16.mxu1 %v5668_v63  ;;  %v1408_v17 = vmul.f32 %v7370_v5, %v7370_v5  ;;  %v1834_v63 = vld [vmem:[#allocation10 + $0x128] sm:$0xff]  ;;  %v5750_v54 = vpack.c.bf16 %v1864_v52, %v1859_v51  ;;  %v1905_v51 = vld [vmem:[#allocation10 + $0x360] sm:$0xff] }
 0x25e   : > { %v1198_v12 = vpop.f32.mrb[6].mxu0  ;;  %1367 = vmatprep.mubr.f32.mxu1 %v7376_v10  ;;  %v1409_v13 = vmul.f32 %v7376_v10, %v7376_v10  ;;  %5731 = vmatpush1.bf16.msra.mxu0 %v5730_v4  ;;  %v5738_v0 = vpack.c.bf16 %v1834_v63, %v1829_v62  ;;  %v5676_v4 = vpack.c.bf16 %v1843_v2, %v1838_v1  ;;  %v1842_v7 = vld [vmem:[#allocation10 + $0x168] sm:$0xff]  ;;  %v1875_v62 = vld [vmem:[#allocation10 + $0x270] sm:$0xff]  ;;  %v1869_v1 = vld [vmem:[#allocation10 + $0x240] sm:$0xff] }
 0x25f   : > { %v7382_v15 = vadd.f32 %v1198_v12, %v7343_v29  ;;  %v1200_v16 = vpop.f32.mrb[7].mxu0  ;;  %1368 = vmatmul.mubr.f32.gmra.mrb[4].mxu1 %v7370_v5  ;;  %5733 = vmatprep.subr.bf16.mxu0 %v5732_v56  ;;  %v1845_v56 = vld [vmem:[#allocation10 + $0x180] sm:$0xff]  ;;  %v5678_v8 = vpack.c.bf16 %v1842_v7, %v1837_v6  ;;  %v1844_v12 = vld [vmem:[#allocation10 + $0x178] sm:$0xff]  ;;  %v1874_v2 = vld [vmem:[#allocation10 + $0x268] sm:$0xff] }
 0x260   : > { %v7388_v18 = vadd.f32 %v1200_v16, %v7346_v30  ;;  %1496 = vmatprep.mubr.f32.mxu0 %v1409_v13  ;;  %5671 = vmatpush1.bf16.msra.mxu1 %v5670_v11  ;;  %v5740_v9 = vpack.c.bf16 %v1845_v56, %v1840_v3  ;;  %v1839_v11 = vld [vmem:[#allocation10 + $0x150] sm:$0xff]  ;;  %v1853_v16 = vld [vmem:[#allocation10 + $0x1c0] sm:$0xff]  ;;  %v5754_v3 = vpack.c.bf16 %v1874_v2, %v1869_v1  ;;  %v1880_v7 = vld [vmem:[#allocation10 + $0x298] sm:$0xff] }
 0x261   : > { %1497 = vmatmul.mubr.f32.gmra.mrb[20].mxu0 %v1408_v17  ;;  %v1410_v23 = vmul.f32 %v7382_v15, %v7382_v15  ;;  %5673 = vmatprep.subr.bf16.mxu1 %v5672_v55  ;;  %v5742_v13 = vpack.c.bf16 %v1844_v12, %v1839_v11  ;;  %v1850_v17 = vld [vmem:[#allocation10 + $0x1a8] sm:$0xff]  ;;  %v1868_v55 = vld [vmem:[#allocation10 + $0x238] sm:$0xff]  ;;  %v1883_v6 = vld [vmem:[#allocation10 + $0x2b0] sm:$0xff] }
 0x262   : > { %v1204_v19 = vpop.f32.mrb[8].mxu0  ;;  %1373 = vmatprep.mubr.f32.mxu1 %v7388_v18  ;;  %v1411_v20 = vmul.f32 %v7388_v18, %v7388_v18  ;;  %5735 = vmatpush1.bf16.msra.mxu0 %v5734_v14  ;;  %v1848_v14 = vld [vmem:[#allocation10 + $0x198] sm:$0xff]  ;;  %v1885_v11 = vld [vmem:[#allocation10 + $0x2c0] sm:$0xff]  ;;  %v1915_v1 = vld [vmem:[#allocation10 + $0x3b0] sm:$0xff] }
 0x263   : > { %v7394_v21 = vadd.f32 %v1204_v19, %v7343_v29  ;;  %v1206_v22 = vpop.f32.mrb[9].mxu0  ;;  %1374 = vmatmul.mubr.f32.gmra.mrb[6].mxu1 %v7382_v15  ;;  %5737 = vmatprep.subr.bf16.mxu0 %v5736_v61  ;;  %v5680_v19 = vpack.c.bf16 %v1853_v16, %v1848_v14  ;;  %v1872_v61 = vld [vmem:[#allocation10 + $0x258] sm:$0xff]  ;;  %v1879_v14 = vld [vmem:[#allocation10 + $0x290] sm:$0xff] }
 0x264   : > { %v7400_v24 = vadd.f32 %v1206_v22, %v7346_v30  ;;  %1502 = vmatprep.mubr.f32.mxu0 %v1411_v20  ;;  %v1847_v20 = vld [vmem:[#allocation10 + $0x190] sm:$0xff]  ;;  %v1852_v22 = vld [vmem:[#allocation10 + $0x1b8] sm:$0xff] }
 0x265   : > { %1503 = vmatmul.mubr.f32.gmra.mrb[22].mxu0 %v1410_v23  ;;  %v1412_v34 = vmul.f32 %v7394_v21, %v7394_v21  ;;  %v1855_v23 = vld [vmem:[#allocation10 + $0x1d0] sm:$0xff]  ;;  %v1884_v16 = vld [vmem:[#allocation10 + $0x2b8] sm:$0xff] }
 0x266   : > { %v1210_v27 = vpop.f32.mrb[10].mxu0  ;;  %1379 = vmatprep.mubr.f32.mxu1 %v7400_v24  ;;  %v1413_v31 = vmul.f32 %v7400_v24, %v7400_v24  ;;  %5739 = vmatpush1.bf16.msra.mxu0 %v5738_v0 }
 0x267   : > { %v7406_v32 = vadd.f32 %v1210_v27, %v7343_v29  ;;  %v1212_v33 = vpop.f32.mrb[11].mxu0  ;;  %1380 = vmatmul.mubr.f32.gmra.mrb[8].mxu1 %v7394_v21  ;;  %5741 = vmatprep.subr.bf16.mxu0 %v5740_v9  ;;  %v5682_v27 = vpack.c.bf16 %v1852_v22, %v1847_v20  ;;  %v1882_v9 = vld [vmem:[#allocation10 + $0x2a8] sm:$0xff]  ;;  %v1893_v20 = vld [vmem:[#allocation10 + $0x300] sm:$0xff] }
 0x268   : > { %v7412_v35 = vadd.f32 %v1212_v33, %v7346_v30  ;;  %1508 = vmatprep.mubr.f32.mxu0 %v1413_v31  ;;  %v5744_v31 = vpack.c.bf16 %v1855_v23, %v1850_v17  ;;  %v1849_v33 = vld [vmem:[#allocation10 + $0x1a0] sm:$0xff]  ;;  %v5758_v17 = vpack.c.bf16 %v1884_v16, %v1879_v14  ;;  %v1890_v22 = vld [vmem:[#allocation10 + $0x2e8] sm:$0xff] }
 0x269   : > { %1509 = vmatmul.mubr.f32.gmra.mrb[24].mxu0 %v1412_v34  ;;  %v1414_v42 = vmul.f32 %v7406_v32, %v7406_v32  ;;  %v1854_v34 = vld [vmem:[#allocation10 + $0x1c8] sm:$0xff]  ;;  %v1925_v14 = vld [vmem:[#allocation10 + $0x400] sm:$0xff] }
 0x26a   : > { %v1216_v37 = vpop.f32.mrb[12].mxu0  ;;  %1385 = vmatprep.mubr.f32.mxu1 %v7412_v35  ;;  %v1415_v38 = vmul.f32 %v7412_v35, %v7412_v35  ;;  %5743 = vmatpush1.bf16.msra.mxu0 %v5742_v13  ;;  %v5756_v13 = vpack.c.bf16 %v1885_v11, %v1880_v7 }
 0x26b   : > { %v7418_v39 = vadd.f32 %v1216_v37, %v7343_v29  ;;  %v1218_v41 = vpop.f32.mrb[13].mxu0  ;;  %1386 = vmatmul.mubr.f32.gmra.mrb[10].mxu1 %v7406_v32  ;;  %v5746_v37 = vpack.c.bf16 %v1854_v34, %v1849_v33  ;;  %5745 = vmatprep.subr.bf16.mxu0 %v5744_v31  ;;  %v1892_v31 = vld [vmem:[#allocation10 + $0x2f8] sm:$0xff]  ;;  %v1895_v33 = vld [vmem:[#allocation10 + $0x310] sm:$0xff] }
 0x26c   : > { %v7424_v43 = vadd.f32 %v1218_v41, %v7346_v30  ;;  %1514 = vmatprep.mubr.f32.mxu0 %v1415_v38  ;;  %v1858_v38 = vld [vmem:[#allocation10 + $0x1e8] sm:$0xff]  ;;  %v1863_v41 = vld [vmem:[#allocation10 + $0x210] sm:$0xff] }
 0x26d   : > { %1515 = vmatmul.mubr.f32.gmra.mrb[26].mxu0 %v1414_v42  ;;  %v1416_v48 = vmul.f32 %v7418_v39, %v7418_v39  ;;  %v1860_v42 = vld [vmem:[#allocation10 + $0x1f8] sm:$0xff] }
 0x26e   : > { %v1222_v44 = vpop.f32.mrb[14].mxu0  ;;  %1391 = vmatprep.mubr.f32.mxu1 %v7424_v43  ;;  %v1417_v45 = vmul.f32 %v7424_v43, %v7424_v43  ;;  %5747 = vmatpush1.bf16.msra.mxu0 %v5746_v37  ;;  %v5760_v37 = vpack.c.bf16 %v1895_v33, %v1890_v22  ;;  %v1928_v22 = vld [vmem:[#allocation10 + $0x418] sm:$0xff] }
 0x26f   : > { %v7430_v46 = vadd.f32 %v1222_v44, %v7343_v29  ;;  %v1224_v47 = vpop.f32.mrb[15].mxu0  ;;  %1392 = vmatmul.mubr.f32.gmra.mrb[12].mxu1 %v7418_v39  ;;  %v5684_v44 = vpack.c.bf16 %v1863_v41, %v1858_v38  ;;  %v1889_v38 = vld [vmem:[#allocation10 + $0x2e0] sm:$0xff]  ;;  %v1894_v41 = vld [vmem:[#allocation10 + $0x308] sm:$0xff]  ;;  %v1932_v33 = vld [vmem:[#allocation10 + $0x438] sm:$0xff] }
 0x270   : > { %v7436_v49 = vadd.f32 %v1224_v47, %v7346_v30  ;;  %1520 = vmatprep.mubr.f32.mxu0 %v1417_v45  ;;  %v1827_v30 = vld [vmem:[#allocation10 + $0xf0] sm:$0xff]  ;;  %v1857_v45 = vld [vmem:[#allocation10 + $0x1e0] sm:$0xff]  ;;  %v1862_v47 = vld [vmem:[#allocation10 + $0x208] sm:$0xff] }
 0x271   : > { %1521 = vmatmul.mubr.f32.gmra.mrb[28].mxu0 %v1416_v48  ;;  %v1418_v29 = vmul.f32 %v7430_v46, %v7430_v46  ;;  %v5674_v60 = vpack.c.bf16 %v1832_v57, %v1827_v30  ;;  %v1865_v48 = vld [vmem:[#allocation10 + $0x220] sm:$0xff]  ;;  %v1870_v57 = vld [vmem:[#allocation10 + $0x248] sm:$0xff] }
 0x272   : > { %1397 = vmatprep.mubr.f32.mxu1 %v7436_v49  ;;  %v1419_v50 = vmul.f32 %v7436_v49, %v7436_v49  ;;  %v1873_v30 = vld [vmem:[#allocation10 + $0x260] sm:$0xff]  ;;  %v5752_v0 = vpack.c.bf16 %v1875_v62, %v1870_v57 }
 0x273   : > { %1398 = vmatmul.mubr.f32.gmra.mrb[14].mxu1 %v7430_v46  ;;  %v5688_v58 = vpack.c.bf16 %v1873_v30, %v1868_v55  ;;  %v1899_v55 = vld [vmem:[#allocation10 + $0x330] sm:$0xff]  ;;  %v1904_v30 = vld [vmem:[#allocation10 + $0x358] sm:$0xff] }
 0x274   : > { %1526 = vmatprep.mubr.f32.mxu0 %v1419_v50  ;;  %5675 = vmatpush1.bf16.msra.mxu1 %v5674_v60  ;;  %v5686_v50 = vpack.c.bf16 %v1862_v47, %v1857_v45  ;;  %v1867_v60 = vld [vmem:[#allocation10 + $0x230] sm:$0xff]  ;;  %v1900_v47 = vld [vmem:[#allocation10 + $0x338] sm:$0xff]  ;;  %v5766_v57 = vpack.c.bf16 %v1904_v30, %v1899_v55  ;;  %v1945_v55 = vld [vmem:[#allocation10 + $0x4a0] sm:$0xff] }
 0x275   : > { %1527 = vmatmul.mubr.f32.gmra.mrb[30].mxu0 %v1418_v29  ;;  %5677 = vmatprep.subr.bf16.mxu1 %v5676_v4  ;;  %v5748_v29 = vpack.c.bf16 %v1865_v48, %v1860_v42  ;;  %v5690_v63 = vpack.c.bf16 %v1872_v61, %v1867_v60  ;;  %v1878_v4 = vld [vmem:[#allocation10 + $0x288] sm:$0xff]  ;;  %v5762_v42 = vpack.c.bf16 %v1894_v41, %v1889_v38  ;;  %v1903_v45 = vld [vmem:[#allocation10 + $0x350] sm:$0xff]  ;;  %v1913_v60 = vld [vmem:[#allocation10 + $0x3a0] sm:$0xff] }
 0x276   : > { %v5692_v56 = vpack.c.bf16 %v1883_v6, %v1878_v4  ;;  %v1910_v61 = vld [vmem:[#allocation10 + $0x388] sm:$0xff]  ;;  %v1909_v4 = vld [vmem:[#allocation10 + $0x380] sm:$0xff]  ;;  %v1935_v41 = vld [vmem:[#allocation10 + $0x450] sm:$0xff] }
 0x277   : > { %5749 = vmatprep.subr.bf16.mxu0 %v5748_v29  ;;  %v1902_v29 = vld [vmem:[#allocation10 + $0x348] sm:$0xff]  ;;  %v1939_v30 = vld [vmem:[#allocation10 + $0x470] sm:$0xff] }
 0x278   : > { %5679 = vmatpush1.bf16.msra.mxu1 %v5678_v8  ;;  %5751 = vmatpush1.bf16.msra.mxu0 %v5750_v54  ;;  %v1877_v8 = vld [vmem:[#allocation10 + $0x280] sm:$0xff]  ;;  %v5764_v54 = vpack.c.bf16 %v1905_v51, %v1900_v47  ;;  %v1914_v6 = vld [vmem:[#allocation10 + $0x3a8] sm:$0xff] }
 0x279   : > { %5681 = vmatprep.subr.bf16.mxu1 %v5680_v19  ;;  %5753 = vmatprep.subr.bf16.mxu0 %v5752_v0  ;;  %v5694_v12 = vpack.c.bf16 %v1882_v9, %v1877_v8  ;;  %v1888_v19 = vld [vmem:[#allocation10 + $0x2d8] sm:$0xff]  ;;  %v5770_v7 = vpack.c.bf16 %v1914_v6, %v1909_v4  ;;  %v1923_v8 = vld [vmem:[#allocation10 + $0x3f0] sm:$0xff]  ;;  %v1930_v38 = vld [vmem:[#allocation10 + $0x428] sm:$0xff] }
 0x27a   : > { %v5696_v23 = vpack.c.bf16 %v1893_v20, %v1888_v19  ;;  %v1912_v0 = vld [vmem:[#allocation10 + $0x398] sm:$0xff]  ;;  %v1919_v19 = vld [vmem:[#allocation10 + $0x3d0] sm:$0xff]  ;;  %v1938_v47 = vld [vmem:[#allocation10 + $0x468] sm:$0xff] }
 0x27b   : > { %v1920_v9 = vld [vmem:[#allocation10 + $0x3d8] sm:$0xff]  ;;  %v1937_v51 = vld [vmem:[#allocation10 + $0x460] sm:$0xff]  ;;  %v1955_v4 = vld [vmem:[#allocation10 + $0x4f0] sm:$0xff] }
 0x27c   : > { %5683 = vmatpush1.bf16.msra.mxu1 %v5682_v27  ;;  %5755 = vmatpush1.bf16.msra.mxu0 %v5754_v3  ;;  %v1887_v27 = vld [vmem:[#allocation10 + $0x2d0] sm:$0xff]  ;;  %v5768_v3 = vpack.c.bf16 %v1915_v1, %v1910_v61  ;;  %v1924_v20 = vld [vmem:[#allocation10 + $0x3f8] sm:$0xff] }
 0x27d   : > { %5685 = vmatprep.subr.bf16.mxu1 %v5684_v44  ;;  %5757 = vmatprep.subr.bf16.mxu0 %v5756_v13  ;;  %v5698_v34 = vpack.c.bf16 %v1892_v31, %v1887_v27  ;;  %v1898_v44 = vld [vmem:[#allocation10 + $0x328] sm:$0xff]  ;;  %v1933_v27 = vld [vmem:[#allocation10 + $0x440] sm:$0xff]  ;;  %v1927_v31 = vld [vmem:[#allocation10 + $0x410] sm:$0xff] }
 0x27e   : > { %v5700_v48 = vpack.c.bf16 %v1903_v45, %v1898_v44  ;;  %v1922_v13 = vld [vmem:[#allocation10 + $0x3e8] sm:$0xff]  ;;  %v5776_v44 = vpack.c.bf16 %v1935_v41, %v1930_v38  ;;  %v1948_v61 = vld [vmem:[#allocation10 + $0x4b8] sm:$0xff] }
 0x27f   : > { %v1934_v45 = vld [vmem:[#allocation10 + $0x448] sm:$0xff] }
 0x280   : > { %5687 = vmatpush1.bf16.msra.mxu1 %v5686_v50  ;;  %5759 = vmatpush1.bf16.msra.mxu0 %v5758_v17  ;;  %v1897_v50 = vld [vmem:[#allocation10 + $0x320] sm:$0xff]  ;;  %v5772_v17 = vpack.c.bf16 %v1925_v14, %v1920_v9 }
 0x281   : > { %5689 = vmatprep.subr.bf16.mxu1 %v5688_v58  ;;  %5761 = vmatprep.subr.bf16.mxu0 %v5760_v37  ;;  %v5702_v52 = vpack.c.bf16 %v1902_v29, %v1897_v50  ;;  %v1908_v58 = vld [vmem:[#allocation10 + $0x378] sm:$0xff]  ;;  %v5714_v37 = vpack.c.bf16 %v1932_v33, %v1927_v31  ;;  %v7447_v14 = vld [vmem:[%s9039_s25] sm:$0xff] }
 0x282   : > { %v5704_v62 = vpack.c.bf16 %v1913_v60, %v1908_v58 }
 0x284   : > { %5691 = vmatpush1.bf16.msra.mxu1 %v5690_v63  ;;  %5763 = vmatpush1.bf16.msra.mxu0 %v5762_v42  ;;  %v1907_v63 = vld [vmem:[#allocation10 + $0x370] sm:$0xff]  ;;  %v1929_v42 = vld [vmem:[#allocation10 + $0x420] sm:$0xff] }
 0x285   : > { %5693 = vmatprep.subr.bf16.mxu1 %v5692_v56  ;;  %5765 = vmatprep.subr.bf16.mxu0 %v5764_v54  ;;  %v5706_v2 = vpack.c.bf16 %v1912_v0, %v1907_v63  ;;  %v1918_v56 = vld [vmem:[#allocation10 + $0x3c8] sm:$0xff]  ;;  %v5778_v50 = vpack.c.bf16 %v1934_v45, %v1929_v42  ;;  %v1940_v54 = vld [vmem:[#allocation10 + $0x478] sm:$0xff]  ;;  %v1947_v63 = vld [vmem:[#allocation10 + $0x4b0] sm:$0xff] }
 0x286   : > { %v5708_v11 = vpack.c.bf16 %v1923_v8, %v1918_v56  ;;  %v5780_v60 = vpack.c.bf16 %v1945_v55, %v1940_v54  ;;  %v1954_v56 = vld [vmem:[#allocation10 + $0x4e8] sm:$0xff]  ;;  %v1629_v54 = vld [vmem:[%s9040_s22] sm:$0x3] }
 0x288   : > { %5695 = vmatpush1.bf16.msra.mxu1 %v5694_v12  ;;  %5767 = vmatpush1.bf16.msra.mxu0 %v5766_v57  ;;  %v1917_v12 = vld [vmem:[#allocation10 + $0x3c0] sm:$0xff]  ;;  %v1944_v57 = vld [vmem:[#allocation10 + $0x498] sm:$0xff] }
 0x289   : > { %5697 = vmatprep.subr.bf16.mxu1 %v5696_v23  ;;  %5769 = vmatprep.subr.bf16.mxu0 %v5768_v3  ;;  %v5710_v16 = vpack.c.bf16 %v1922_v13, %v1917_v12  ;;  %v5774_v23 = vpack.c.bf16 %v1924_v20, %v1919_v19  ;;  %v5782_v0 = vpack.c.bf16 %v1944_v57, %v1939_v30  ;;  %v1950_v3 = vld [vmem:[#allocation10 + $0x4c8] sm:$0xff] }
 0x28a   : > { %v5784_v6 = vpack.c.bf16 %v1955_v4, %v1950_v3  ;;  %v1886_v12 = vld [vmem:[#allocation10 + $0x2c8] sm:$0xff] }
 0x28c   : > { %5699 = vmatpush1.bf16.msra.mxu1 %v5698_v34  ;;  %5771 = vmatpush1.bf16.msra.mxu0 %v5770_v7  ;;  %v5712_v34 = vpack.c.bf16 %v1933_v27, %v1928_v22  ;;  %v1949_v7 = vld [vmem:[#allocation10 + $0x4c0] sm:$0xff] }
 0x28d   : > { %5701 = vmatprep.subr.bf16.mxu1 %v5700_v48  ;;  %5773 = vmatprep.subr.bf16.mxu0 %v5772_v17  ;;  %v1943_v48 = vld [vmem:[#allocation10 + $0x490] sm:$0xff]  ;;  %v5786_v9 = vpack.c.bf16 %v1954_v56, %v1949_v7  ;;  %v7488_v56 = vrot.slane %v1629_v54, %v7340_v28 }
 0x28e   : > { %v5716_v29 = vpack.c.bf16 %v1943_v48, %v1938_v47 }
 0x290   : > { %5703 = vmatpush1.bf16.msra.mxu1 %v5702_v52  ;;  %5775 = vmatpush1.bf16.msra.mxu0 %v5774_v23  ;;  %v1942_v52 = vld [vmem:[#allocation10 + $0x488] sm:$0xff] }
 0x291   : > { %5705 = vmatprep.subr.bf16.mxu1 %v5704_v62  ;;  %5777 = vmatprep.subr.bf16.mxu0 %v5776_v44  ;;  %v5718_v58 = vpack.c.bf16 %v1942_v52, %v1937_v51  ;;  %v1953_v62 = vld [vmem:[#allocation10 + $0x4e0] sm:$0xff] }
 0x292   : > { %v5720_v1 = vpack.c.bf16 %v1953_v62, %v1948_v61  ;;  %v1657_v61 = vld [vmem:[%s9041_s19] sm:$0x3] }
 0x294   : > { %5707 = vmatpush1.bf16.msra.mxu1 %v5706_v2  ;;  %5779 = vmatpush1.bf16.msra.mxu0 %v5778_v50  ;;  %v1952_v2 = vld [vmem:[#allocation10 + $0x4d8] sm:$0xff] }
 0x295   : > { %5709 = vmatprep.subr.bf16.mxu1 %v5708_v11  ;;  %5781 = vmatprep.subr.bf16.mxu0 %v5780_v60  ;;  %v5722_v8 = vpack.c.bf16 %v1952_v2, %v1947_v63  ;;  %v1881_v11 = vld [vmem:[#allocation10 + $0x2a0] sm:$0xff] }
 0x296   : > { %v5788_v13 = vpack.c.bf16 %v1886_v12, %v1881_v11 }
 0x298   : > { %5711 = vmatpush1.bf16.msra.mxu1 %v5710_v16  ;;  %5783 = vmatpush1.bf16.msra.mxu0 %v5782_v0  ;;  %v7479_v0 = vrot.slane %v1629_v54, %v7334_v26 }
 0x299   : > { %5713 = vmatprep.subr.bf16.mxu1 %v5712_v34  ;;  %5785 = vmatprep.subr.bf16.mxu0 %v5784_v6 }
 0x29c   : > { %5715 = vmatpush1.bf16.msra.mxu1 %v5714_v37  ;;  %5787 = vmatpush1.bf16.msra.mxu0 %v5786_v9 }
 0x29d   : > { %5717 = vmatprep.subr.bf16.mxu1 %v5716_v29  ;;  %5076 = vmatprep.subr.mxu0 %v7447_v14 }
 0x2a0   : > { %5719 = vmatpush1.bf16.msra.mxu1 %v5718_v58 }
 0x2a1   : > { %5721 = vmatprep.subr.bf16.mxu1 %v5720_v1 }
 0x2a4   : > { %5723 = vmatpush1.bf16.msra.mxu1 %v5722_v8  ;;  %v7491_v8 = vrot.slane %v1657_v61, %v7334_v26 }
 0x2a5   : > { %5789 = vmatprep.subr.bf16.mxu1 %v5788_v13  ;;  %v7495_v13 = vrot.slane %v1657_v61, %v7340_v28 }
 0x32a   : > { %v1357_v16 = vpop.f32.mrb[0].mxu1 }
 0x32b   : > { %v1533_v17 = vmul.f32 %v1357_v16, %v1357_v16  ;;  %v7450_v19 = vpop.f32.mrb[1].mxu1  ;;  %v1597_v9 = vsub.f32 %v7349_v36, %v1357_v16 }
 0x32c   : > { %v1534_v20 = vmul.f32 %v7450_v19, %v7450_v19  ;;  %v1486_v22 = vpop.f32.mrb[16].mxu0 }
 0x32d   : > { %v1549_v23 = vsub.f32 %v1486_v22, %v1533_v17  ;;  %v1488_v27 = vpop.f32.mrb[17].mxu0  ;;  %v1598_v17 = vsub.f32 %v7352_v40, %v7450_v19 }
 0x32e   : > { %v1550_v31 = vsub.f32 %v1488_v27, %v1534_v20  ;;  %v7454_v33 = vpop.f32.mrb[2].mxu1 }
 0x32f   : > { %v1565_v34 = vadd.f32 1e-05, %v1549_v23  ;;  %v1535_v37 = vmul.f32 %v7454_v33, %v7454_v33  ;;  %v7458_v38 = vpop.f32.mrb[3].mxu1  ;;  %v1599_v20 = vsub.f32 %v7360_v53, %v7454_v33 }
 0x330   : > { %v1566_v41 = vadd.f32 1e-05, %v1550_v31  ;;  %v1536_v42 = vmul.f32 %v7458_v38, %v7458_v38  ;;  %v1492_v44 = vpop.f32.mrb[18].mxu0  ;;  %v1600_v36 = vsub.f32 %v7364_v59, %v7458_v38 }
 0x331   : > { %6261 = vrsqrt.f32 %v1565_v34  ;;  %v1551_v45 = vsub.f32 %v1492_v44, %v1535_v37  ;;  %v1494_v47 = vpop.f32.mrb[19].mxu0 }
 0x332   : > { %6263 = vrsqrt.f32 %v1566_v41  ;;  %v1552_v48 = vsub.f32 %v1494_v47, %v1536_v42  ;;  %v7462_v50 = vpop.f32.mrb[4].mxu1 }
 0x333   : > { %v1567_v29 = vadd.f32 1e-05, %v1551_v45  ;;  %v1537_v51 = vmul.f32 %v7462_v50, %v7462_v50  ;;  %v7466_v52 = vpop.f32.mrb[5].mxu1  ;;  %v1601_v16 = vsub.f32 %v7370_v5, %v7462_v50 }
 0x334   : > { %v1568_v55 = vadd.f32 1e-05, %v1552_v48  ;;  %v1538_v30 = vmul.f32 %v7466_v52, %v7466_v52  ;;  %v1498_v57 = vpop.f32.mrb[20].mxu0  ;;  %v1602_v53 = vsub.f32 %v7376_v10, %v7466_v52 }
 0x335   : > { %6265 = vrsqrt.f32 %v1567_v29  ;;  %v1553_v58 = vsub.f32 %v1498_v57, %v1537_v51  ;;  %v1500_v60 = vpop.f32.mrb[21].mxu0 }
 0x336   : > { %6267 = vrsqrt.f32 %v1568_v55  ;;  %v1554_v62 = vsub.f32 %v1500_v60, %v1538_v30  ;;  %v7476_v63 = vpop.f32.mrb[6].mxu1 }
 0x337   : > { %v1569_v1 = vadd.f32 1e-05, %v1553_v58  ;;  %v1539_v2 = vmul.f32 %v7476_v63, %v7476_v63  ;;  %v7483_v3 = vpop.f32.mrb[7].mxu1  ;;  %v1603_v59 = vsub.f32 %v7382_v15, %v7476_v63 }
 0x338   : > { %v1570_v4 = vadd.f32 1e-05, %v1554_v62  ;;  %v1540_v6 = vmul.f32 %v7483_v3, %v7483_v3  ;;  %v1504_v7 = vpop.f32.mrb[22].mxu0  ;;  %v1604_v38 = vsub.f32 %v7388_v18, %v7483_v3 }
 0x339   : > { %6269 = vrsqrt.f32 %v1569_v1  ;;  %v1555_v11 = vsub.f32 %v1504_v7, %v1539_v2  ;;  %v1506_v12 = vpop.f32.mrb[23].mxu0 }
 0x33a   : > { %6271 = vrsqrt.f32 %v1570_v4  ;;  %v1556_v22 = vsub.f32 %v1506_v12, %v1540_v6  ;;  %v7501_v23 = vpop.f32.mrb[8].mxu1 }
 0x33b   : > { %v6262_v27 = vpop.eup %6261  ;;  %v1571_v31 = vadd.f32 1e-05, %v1555_v11  ;;  %v1541_v34 = vmul.f32 %v7501_v23, %v7501_v23  ;;  %v7509_v37 = vpop.f32.mrb[9].mxu1  ;;  %v1605_v10 = vsub.f32 %v7394_v21, %v7501_v23 }
 0x33c   : > { %v6264_v40 = vpop.eup %6263  ;;  %v1613_v19 = vmul.f32 %v6262_v27, %v1597_v9  ;;  %v1572_v33 = vadd.f32 1e-05, %v1556_v22  ;;  %v1542_v41 = vmul.f32 %v7509_v37, %v7509_v37  ;;  %v1510_v42 = vpop.f32.mrb[24].mxu0  ;;  %v1606_v60 = vsub.f32 %v7400_v24, %v7509_v37 }
 0x33d   : > { %v1557_v44 = vsub.f32 %v1510_v42, %v1541_v34  ;;  %v1512_v45 = vpop.f32.mrb[25].mxu0  ;;  %v1614_v47 = vmul.f32 %v6264_v40, %v1598_v17 }
 0x33e   : > { %v1641_v48 = vmul.f32 %v7479_v0, %v1613_v19  ;;  %6273 = vrsqrt.f32 %v1572_v33  ;;  %v1558_v29 = vsub.f32 %v1512_v45, %v1542_v41  ;;  %v7522_v51 = vpop.f32.mrb[10].mxu1 }
 0x33f   : > { %v6266_v52 = vpop.eup %6265  ;;  %6275 = vrsqrt.f32 %v1571_v31  ;;  %v1573_v54 = vadd.f32 1e-05, %v1557_v44  ;;  %v1543_v55 = vmul.f32 %v7522_v51, %v7522_v51  ;;  %v7526_v30 = vpop.f32.mrb[11].mxu1  ;;  %v1642_v57 = vmul.f32 %v7488_v56, %v1614_v47 }
 0x340   : > { %v6268_v58 = vpop.eup %6267  ;;  %v1574_v61 = vadd.f32 1e-05, %v1558_v29  ;;  %v1544_v62 = vmul.f32 %v7526_v30, %v7526_v30  ;;  %v1516_v1 = vpop.f32.mrb[26].mxu0  ;;  %v7534_v2 = vadd.f32 %v7491_v8, %v1641_v48  ;;  %v1615_v22 = vmul.f32 %v6266_v52, %v1599_v20 }
 0x341   : > { %6277 = vrsqrt.f32 %v1573_v54  ;;  %v1559_v4 = vsub.f32 %v1516_v1, %v1543_v55  ;;  %v1518_v6 = vpop.f32.mrb[27].mxu0  ;;  %v7537_v7 = vadd.f32 %v7495_v13, %v1642_v57  ;;  %v1616_v9 = vmul.f32 %v6268_v58, %v1600_v36 }
 0x342   : > { %6279 = vrsqrt.f32 %v1574_v61  ;;  %v1560_v11 = vsub.f32 %v1518_v6, %v1544_v62  ;;  %v7539_v12 = vpop.f32.mrb[12].mxu1  ;;  %v4618_v17 = vmul.f32 -1.442695, %v7534_v2  ;;  %v1607_v31 = vsub.f32 %v7406_v32, %v7522_v51 }
 0x343   : > { %v6270_v27 = vpop.eup %6269  ;;  %v1575_v34 = vadd.f32 1e-05, %v1559_v4  ;;  %v1545_v40 = vmul.f32 %v7539_v12, %v7539_v12  ;;  %v7546_v19 = vpop.f32.mrb[13].mxu1  ;;  %v4619_v33 = vmul.f32 -1.442695, %v7537_v7  ;;  %v1608_v41 = vsub.f32 %v7412_v35, %v7526_v30 }
 0x344   : > { %v6272_v36 = vpop.eup %6271  ;;  %v1576_v42 = vadd.f32 1e-05, %v1560_v11  ;;  %v1546_v20 = vmul.f32 %v7546_v19, %v7546_v19  ;;  %v1522_v44 = vpop.f32.mrb[28].mxu0  ;;  %6281 = vpow2.f32 %v4618_v17  ;;  %v1644_v48 = vmul.f32 %v7488_v56, %v1616_v9 }
 0x345   : > { %6283 = vrsqrt.f32 %v1575_v34  ;;  %v1561_v45 = vsub.f32 %v1522_v44, %v1545_v40  ;;  %v1524_v47 = vpop.f32.mrb[29].mxu0  ;;  %v1643_v29 = vmul.f32 %v7479_v0, %v1615_v22  ;;  %v1618_v55 = vmul.f32 %v6272_v36, %v1602_v53 }
 0x346   : > { %6285 = vrsqrt.f32 %v1576_v42  ;;  %v1562_v52 = vsub.f32 %v1524_v47, %v1546_v20  ;;  %v7555_v54 = vpop.f32.mrb[14].mxu1  ;;  %v1617_v57 = vmul.f32 %v6270_v27, %v1601_v16  ;;  %v1609_v58 = vsub.f32 %v7418_v39, %v7539_v12 }
 0x347   : > { %v1577_v61 = vadd.f32 1e-05, %v1561_v45  ;;  %v1547_v62 = vmul.f32 %v7555_v54, %v7555_v54  ;;  %v7564_v1 = vpop.f32.mrb[15].mxu1  ;;  %6287 = vpow2.f32 %v4619_v33  ;;  %v1610_v6 = vsub.f32 %v7424_v43, %v7546_v19 }
 0x348   : > { %v6274_v4 = vpop.eup %6273  ;;  %v1578_v9 = vadd.f32 1e-05, %v1562_v52  ;;  %v1548_v53 = vmul.f32 %v7564_v1, %v7564_v1  ;;  %v1528_v5 = vpop.f32.mrb[30].mxu0  ;;  %v7571_v50 = vadd.f32 %v7495_v13, %v1644_v48  ;;  %v7574_v22 = vadd.f32 %v7491_v8, %v1643_v29 }
 0x349   : > { %v6276_v16 = vpop.eup %6275  ;;  %6289 = vrsqrt.f32 %v1577_v61  ;;  %v1563_v11 = vsub.f32 %v1528_v5, %v1547_v62  ;;  %v1530_v17 = vpop.f32.mrb[31].mxu0  ;;  %v1646_v27 = vmul.f32 %v7488_v56, %v1618_v55  ;;  %v1645_v33 = vmul.f32 %v7479_v0, %v1617_v57 }
 0x34a   : > { %6291 = vrsqrt.f32 %v1578_v9  ;;  %v1564_v34 = vsub.f32 %v1530_v17, %v1548_v53  ;;  %v4621_v40 = vmul.f32 -1.442695, %v7571_v50  ;;  %v4620_v20 = vmul.f32 -1.442695, %v7574_v22 }
 0x34b   : > { %v6278_v36 = vpop.eup %6277  ;;  %v1579_v42 = vadd.f32 1e-05, %v1563_v11  ;;  %v7581_v44 = vadd.f32 %v7495_v13, %v1646_v27  ;;  %v1620_v45 = vmul.f32 %v6274_v4, %v1604_v38  ;;  %v7587_v29 = vadd.f32 %v7491_v8, %v1645_v33 }
 0x34c   : > { %v6280_v47 = vpop.eup %6279  ;;  %v1580_v48 = vadd.f32 1e-05, %v1564_v34  ;;  %6293 = vpow2.f32 %v4621_v40  ;;  %v1619_v52 = vmul.f32 %v6276_v16, %v1603_v59  ;;  %v1621_v15 = vmul.f32 %v6278_v36, %v1605_v10 }
 0x34d   : > { %6295 = vrsqrt.f32 %v1579_v42  ;;  %v4623_v55 = vmul.f32 -1.442695, %v7581_v44  ;;  %v1648_v57 = vmul.f32 %v7488_v56, %v1620_v45  ;;  %v1622_v18 = vmul.f32 %v6280_v47, %v1606_v60 }
 0x34e   : > { %v6282_v3 = vpop.eup %6281  ;;  %6297 = vrsqrt.f32 %v1580_v48  ;;  %v4622_v38 = vmul.f32 -1.442695, %v7587_v29  ;;  %v1647_v61 = vmul.f32 %v7479_v0, %v1619_v52  ;;  %v1649_v60 = vmul.f32 %v7479_v0, %v1621_v15 }
 0x34f   : > { %v6284_v63 = vpop.eup %6283  ;;  %v1733_v59 = vadd.f32 1.0, %v6282_v3  ;;  %6299 = vpow2.f32 %v4620_v20  ;;  %v7603_v62 = vadd.f32 %v7495_v13, %v1648_v57  ;;  %v1650_v4 = vmul.f32 %v7488_v56, %v1622_v18 }
 0x350   : > { %v6286_v24 = vpop.eup %6285  ;;  %6301 = vpow2.f32 %v4623_v55  ;;  %v7607_v37 = vadd.f32 %v7491_v8, %v1647_v61  ;;  %v1623_v21 = vmul.f32 %v6284_v63, %v1607_v31  ;;  %v7622_v11 = vadd.f32 %v7491_v8, %v1649_v60  ;;  %v1806_v61 = vld [vmem:[#allocation10 + $0x48] sm:$0xff] }
 0x351   : > { %v6288_v23 = vpop.eup %6287  ;;  %6303 = vrcp.f32 %v1733_v59  ;;  %v4625_v10 = vmul.f32 -1.442695, %v7603_v62  ;;  %v7615_v9 = vadd.f32 %v7495_v13, %v1650_v4  ;;  %v1624_v53 = vmul.f32 %v6286_v24, %v1608_v41  ;;  %v1891_v59 = vld [vmem:[#allocation10 + $0x2f0] sm:$0xff]  ;;  %v1896_v4 = vld [vmem:[#allocation10 + $0x318] sm:$0xff] }
 0x352   : > { %v1734_v5 = vadd.f32 1.0, %v6288_v23  ;;  %6305 = vpow2.f32 %v4622_v38  ;;  %v4624_v16 = vmul.f32 -1.442695, %v7607_v37  ;;  %v1651_v17 = vmul.f32 %v7479_v0, %v1623_v21  ;;  %v1801_v38 = vld [vmem:[#allocation10 + $0x20] sm:$0xff] }
 0x353   : > { %v6290_v32 = vpop.eup %6289  ;;  %6307 = vpow2.f32 %v4625_v10  ;;  %v4627_v51 = vmul.f32 -1.442695, %v7615_v9  ;;  %v1652_v31 = vmul.f32 %v7488_v56, %v1624_v53  ;;  %v4626_v35 = vmul.f32 -1.442695, %v7622_v11 }
 0x354   : > { %v6292_v27 = vpop.eup %6291  ;;  %6309 = vrcp.f32 %v1734_v5  ;;  %v1625_v30 = vmul.f32 %v6290_v32, %v1609_v58  ;;  %v7635_v34 = vadd.f32 %v7491_v8, %v1651_v17  ;;  %v1611_v36 = vsub.f32 %v7430_v46, %v7555_v54 }
 0x355   : > { %6311 = vpow2.f32 %v4624_v16  ;;  %v7632_v41 = vadd.f32 %v7495_v13, %v1652_v31  ;;  %v1626_v40 = vmul.f32 %v6292_v27, %v1610_v6  ;;  %v1612_v42 = vsub.f32 %v7436_v49, %v7564_v1  ;;  %v1811_v31 = vld [vmem:[#allocation10 + $0x70] sm:$0xff] }
 0x356   : > { %v6294_v33 = vpop.eup %6293  ;;  %6313 = vpow2.f32 %v4627_v51  ;;  %v1653_v39 = vmul.f32 %v7479_v0, %v1625_v30  ;;  %v4628_v45 = vmul.f32 -1.442695, %v7635_v34  ;;  %v5790_v5 = vpack.c.bf16 %v1806_v61, %v1801_v38  ;;  %v1921_v61 = vld [vmem:[#allocation10 + $0x3e0] sm:$0xff] }
 0x357   : > { %v6296_v12 = vpop.eup %6295  ;;  %v1736_v58 = vadd.f32 1.0, %v6294_v33  ;;  %6315 = vpow2.f32 %v4626_v35  ;;  %v4629_v20 = vmul.f32 -1.442695, %v7632_v41  ;;  %v1654_v43 = vmul.f32 %v7488_v56, %v1626_v40  ;;  %v1906_v35 = vld [vmem:[#allocation10 + $0x368] sm:$0xff] }
 0x358   : > { %v6298_v47 = vpop.eup %6297  ;;  %v1627_v19 = vmul.f32 %v6296_v12, %v1611_v36  ;;  %v7649_v46 = vadd.f32 %v7491_v8, %v1653_v39  ;;  %v5792_v51 = vpack.c.bf16 %v1896_v4, %v1891_v59 }
 0x359   : > { %v6300_v6 = vpop.eup %6299  ;;  %6317 = vrcp.f32 %v1736_v58  ;;  %v1628_v49 = vmul.f32 %v6298_v47, %v1612_v42  ;;  %v7652_v48 = vadd.f32 %v7495_v13, %v1654_v43  ;;  %v1821_v58 = vld [vmem:[#allocation10 + $0xc0] sm:$0xff]  ;;  %v1911_v47 = vld [vmem:[#allocation10 + $0x390] sm:$0xff]  ;;  %v1916_v43 = vld [vmem:[#allocation10 + $0x3b8] sm:$0xff] }
 0x35a   : > { %v6302_v54 = vpop.eup %6301  ;;  %v1735_v1 = vadd.f32 1.0, %v6300_v6  ;;  %6319 = vpow2.f32 %v4629_v20  ;;  %v1655_v18 = vmul.f32 %v7479_v0, %v1627_v19  ;;  %v4630_v60 = vmul.f32 -1.442695, %v7649_v46  ;;  %v1826_v20 = vld [vmem:[#allocation10 + $0xe8] sm:$0xff] }
 0x35b   : > { %v6304_v52 = vpop.eup %6303  ;;  %v1738_v55 = vadd.f32 1.0, %v6302_v54  ;;  %6321 = vpow2.f32 %v4628_v45  ;;  %v1656_v57 = vmul.f32 %v7488_v56, %v1628_v49  ;;  %v4631_v15 = vmul.f32 -1.442695, %v7652_v48 }
 0x35c   : > { %v6306_v3 = vpop.eup %6305  ;;  %6323 = vrcp.f32 %v1735_v1  ;;  %v7662_v0 = vadd.f32 %v7491_v8, %v1655_v18  ;;  %v7668_v32 = vmul.f32 %v6304_v52, %v7534_v2  ;;  %v1901_v8 = vld [vmem:[#allocation10 + $0x340] sm:$0xff]  ;;  %v5798_v1 = vpack.c.bf16 %v1826_v20, %v1821_v58  ;;  %v1831_v18 = vld [vmem:[#allocation10 + $0x110] sm:$0xff] }
 0x35d   : > { %v6308_v63 = vpop.eup %6307  ;;  %6325 = vrcp.f32 %v1738_v55  ;;  %v1737_v24 = vadd.f32 1.0, %v6306_v3  ;;  %v7659_v21 = vadd.f32 %v7495_v13, %v1656_v57  ;;  %v1816_v13 = vld [vmem:[#allocation10 + $0x98] sm:$0xff]  ;;  %v5796_v12 = vpack.c.bf16 %v1906_v35, %v1901_v8 }
 0x35e   : > { %v6310_v23 = vpop.eup %6309  ;;  %v1740_v56 = vadd.f32 1.0, %v6308_v63  ;;  %6327 = vpow2.f32 %v4631_v15  ;;  %v4632_v40 = vmul.f32 -1.442695, %v7662_v0  ;;  %v5794_v36 = vpack.c.bf16 %v1816_v13, %v1811_v31  ;;  %v1836_v3 = vld [vmem:[#allocation10 + $0x138] sm:$0xff]  ;;  %v1926_v15 = vld [vmem:[#allocation10 + $0x408] sm:$0xff] }
 0x35f   : > { %v6312_v10 = vpop.eup %6311  ;;  %v7665_v53 = vmul.f32 %v6310_v23, %v7537_v7  ;;  %6329 = vrcp.f32 %v1737_v24  ;;  %v4633_v30 = vmul.f32 -1.442695, %v7659_v21  ;;  %v5800_v57 = vpack.c.bf16 %v1916_v43, %v1911_v47  ;;  %v1866_v47 = vld [vmem:[#allocation10 + $0x228] sm:$0xff] }
 0x360   : > { %v6314_v16 = vpop.eup %6313  ;;  %6331 = vrcp.f32 %v1740_v56  ;;  %v1739_v17 = vadd.f32 1.0, %v6312_v10  ;;  %v5802_v24 = vpack.c.bf16 %v1836_v3, %v1831_v18  ;;  %v5804_v23 = vpack.c.bf16 %v1926_v15, %v1921_v61  ;;  %v1841_v56 = vld [vmem:[#allocation10 + $0x160] sm:$0xff]  ;;  %v1846_v10 = vld [vmem:[#allocation10 + $0x188] sm:$0xff] }
 0x361   : > { %v6316_v27 = vpop.eup %6315  ;;  %2048 = vmatprep.mubr.f32.mxu1 %v7665_v53  ;;  %2161 = vmatprep.mubr.f32.mxu0 %v7665_v53  ;;  %v1742_v7 = vadd.f32 1.0, %v6314_v16  ;;  %6333 = vpow2.f32 %v4630_v60  ;;  %v4658_v15 = vld [vmem:[%s7214_s2 + $0x80] sm:$0xff] }
 0x362   : > { %2049 = vmatmul.mubr.f32.vlgmr.msra.gmra.mrb[16].mxu1 %v7668_v32  ;;  %2162 = vmatmul.mubr.f32.vlgmr.msra.gmra.mrb[32].mxu0 %v7668_v32  ;;  %6335 = vrcp.f32 %v1739_v17  ;;  %v1741_v2 = vadd.f32 1.0, %v6316_v27  ;;  %v5806_v27 = vpack.c.bf16 %v1846_v10, %v1841_v56  ;;  %v3327_v56 = vld [vmem:[#allocation15] sm:$0xff]  ;;  %v3328_v10 = vld [vmem:[#allocation15 + $0x8] sm:$0xff] }
 0x363   : > { %v6318_v33 = vpop.eup %6317  ;;  %5791 = vmatpush3.bf16.msra.mxu1 %v5790_v5  ;;  %6337 = vrcp.f32 %v1742_v7  ;;  %5077 = vmatpush3.msra.mxu0 %v7447_v14  ;;  %v1851_v7 = vld [vmem:[#allocation10 + $0x1b0] sm:$0xff] }
 0x364   : > { %v6320_v42 = vpop.eup %6319  ;;  %v7678_v39 = vmul.f32 %v6318_v33, %v7571_v50  ;;  %5793 = vmatprep.subr.bf16.mxu1 %v5792_v51  ;;  %6339 = vrcp.f32 %v1741_v2  ;;  %v1931_v51 = vld [vmem:[#allocation10 + $0x430] sm:$0xff]  ;;  %v1946_v33 = vld [vmem:[#allocation10 + $0x4a8] sm:$0xff] }
 0x365   : > { %v6322_v45 = vpop.eup %6321  ;;  %v1744_v19 = vadd.f32 1.0, %v6320_v42  ;;  %6341 = vpow2.f32 %v4633_v30  ;;  %v1856_v30 = vld [vmem:[#allocation10 + $0x1d8] sm:$0xff] }
 0x366   : > { %v6324_v6 = vpop.eup %6323  ;;  %2054 = vmatprep.mubr.f32.mxu1 %v7678_v39  ;;  %2167 = vmatprep.mubr.f32.mxu0 %v7678_v39  ;;  %v1743_v49 = vadd.f32 1.0, %v6322_v45  ;;  %6343 = vpow2.f32 %v4632_v40  ;;  %v1861_v45 = vld [vmem:[#allocation10 + $0x200] sm:$0xff] }
 0x367   : > { %v6326_v54 = vpop.eup %6325  ;;  %v7683_v50 = vmul.f32 %v6324_v6, %v7574_v22  ;;  %5795 = vmatpush3.bf16.msra.mxu1 %v5794_v36  ;;  %6345 = vrcp.f32 %v1744_v19  ;;  %v1951_v19 = vld [vmem:[#allocation10 + $0x4d0] sm:$0xff] }
 0x368   : > { %v6328_v52 = vpop.eup %6327  ;;  %v7686_v55 = vmul.f32 %v6326_v54, %v7581_v44  ;;  %5797 = vmatprep.subr.bf16.mxu1 %v5796_v12  ;;  %6347 = vrcp.f32 %v1743_v49  ;;  %v5810_v12 = vpack.c.bf16 %v1856_v30, %v1851_v7  ;;  %v5814_v49 = vpack.c.bf16 %v1866_v47, %v1861_v45  ;;  %v4676_v7 = vld [vmem:[%s7214_s2 + $0xd0] sm:$0xff]  ;;  %v3335_v45 = vld [vmem:[#allocation15 + $0x40] sm:$0xff]  ;;  %v3336_v47 = vld [vmem:[#allocation15 + $0x48] sm:$0xff] }
 0x369   : > { %v6330_v38 = vpop.eup %6329  ;;  %2055 = vmatmul.mubr.f32.gmra.mrb[18].mxu1 %v7683_v50  ;;  %2168 = vmatmul.mubr.f32.gmra.mrb[34].mxu0 %v7683_v50  ;;  %v1746_v22 = vadd.f32 1.0, %v6328_v52  ;;  %v1871_v52 = vld [vmem:[#allocation10 + $0x250] sm:$0xff] }
 0x36a   : > { %v6332_v63 = vpop.eup %6331  ;;  %2060 = vmatprep.mubr.f32.mxu1 %v7686_v55  ;;  %2173 = vmatprep.mubr.f32.mxu0 %v7686_v55  ;;  %v7693_v59 = vmul.f32 %v6330_v38, %v7587_v29  ;;  %v1936_v29 = vld [vmem:[#allocation10 + $0x458] sm:$0xff] }
 0x36b   : > { %v6334_v44 = vpop.eup %6333  ;;  %5799 = vmatpush3.bf16.msra.mxu1 %v5798_v1  ;;  %v7696_v4 = vmul.f32 %v6332_v63, %v7603_v62  ;;  %6349 = vrcp.f32 %v1746_v22  ;;  %v5808_v35 = vpack.c.bf16 %v1936_v29, %v1931_v51  ;;  %v4664_v22 = vld [vmem:[%s7214_s2 + $0xb0] sm:$0xff]  ;;  %v5884_v51 = vpack.c.bf16 %v3328_v10, %v3327_v56  ;;  %v4645_v29 = vld [vmem:[%s7214_s2 + $0x58] sm:$0xff]  ;;  %v3091_v56 = vld [vmem:[#allocation13 + $0x68] sm:$0xff] }
 0x36c   : > { %v6336_v60 = vpop.eup %6335  ;;  %5801 = vmatprep.subr.bf16.mxu1 %v5800_v57  ;;  %v1745_v5 = vadd.f32 1.0, %v6334_v44  ;;  %v1876_v57 = vld [vmem:[#allocation10 + $0x278] sm:$0xff]  ;;  %v2318_v63 = vld [vmem:[%s7214_s2 + $0x10] sm:$0xff] }
 0x36d   : > { %v6338_v16 = vpop.eup %6337  ;;  %2061 = vmatmul.mubr.f32.gmra.mrb[20].mxu1 %v7693_v59  ;;  %2174 = vmatmul.mubr.f32.gmra.mrb[36].mxu0 %v7693_v59  ;;  %v7706_v17 = vmul.f32 %v6336_v60, %v7607_v37  ;;  %v2319_v44 = vld [vmem:[%s7214_s2 + $0x18] sm:$0xff] }
 0x36e   : > { %v6340_v31 = vpop.eup %6339  ;;  %2066 = vmatprep.mubr.f32.mxu1 %v7696_v4  ;;  %2179 = vmatprep.mubr.f32.mxu0 %v7696_v4  ;;  %v7703_v62 = vmul.f32 %v6338_v16, %v7615_v9  ;;  %6351 = vrcp.f32 %v1745_v5  ;;  %v1941_v9 = vld [vmem:[#allocation10 + $0x480] sm:$0xff]  ;;  %v2323_v60 = vld [vmem:[%s7214_s2 + $0x38] sm:$0xff]  ;;  %v4643_v5 = vld [vmem:[%s7214_s2 + $0x48] sm:$0xff] }
 0x36f   : > { %v6342_v13 = vpop.eup %6341  ;;  %5803 = vmatpush3.bf16.msra.mxu1 %v5802_v24  ;;  %v7716_v42 = vmul.f32 %v6340_v31, %v7622_v11  ;;  %v5812_v20 = vpack.c.bf16 %v1946_v33, %v1941_v9  ;;  %v2322_v24 = vld [vmem:[%s7214_s2 + $0x30] sm:$0xff]  ;;  %v4646_v31 = vld [vmem:[%s7214_s2 + $0x60] sm:$0xff]  ;;  %v4677_v9 = vld [vmem:[%s7214_s2 + $0xd8] sm:$0xff] }
 0x370   : > { %v6344_v8 = vpop.eup %6343  ;;  %5805 = vmatprep.subr.bf16.mxu1 %v5804_v23  ;;  %v1748_v2 = vadd.f32 1.0, %v6342_v13  ;;  %v4642_v23 = vld [vmem:[%s7214_s2 + $0x40] sm:$0xff]  ;;  %v4644_v16 = vld [vmem:[%s7214_s2 + $0x50] sm:$0xff] }
 0x371   : > { %v6346_v40 = vpop.eup %6345  ;;  %2067 = vmatmul.mubr.f32.gmra.mrb[22].mxu1 %v7706_v17  ;;  %2180 = vmatmul.mubr.f32.gmra.mrb[38].mxu0 %v7706_v17  ;;  %v1747_v36 = vadd.f32 1.0, %v6344_v8  ;;  %v4648_v13 = vld [vmem:[%s7214_s2 + $0x70] sm:$0xff]  ;;  %v3330_v8 = vld [vmem:[#allocation15 + $0x18] sm:$0xff]  ;;  %v4678_v33 = vld [vmem:[%s7214_s2 + $0xe0] sm:$0xff] }
 0x372   : > { %2072 = vmatprep.mubr.f32.mxu1 %v7703_v62  ;;  %2185 = vmatprep.mubr.f32.mxu0 %v7703_v62  ;;  %v7713_v37 = vmul.f32 %v6346_v40, %v7632_v41  ;;  %6353 = vrcp.f32 %v1748_v2  ;;  %v6348_v58 = vpop.eup %6347  ;;  %v1956_v41 = vld [vmem:[#allocation10 + $0x4f8] sm:$0xff]  ;;  %v3331_v2 = vld [vmem:[#allocation15 + $0x20] sm:$0xff]  ;;  %v3332_v40 = vld [vmem:[#allocation15 + $0x28] sm:$0xff] }
 0x373   : > { %5807 = vmatpush3.bf16.msra.mxu1 %v5806_v27  ;;  %6355 = vrcp.f32 %v1747_v36  ;;  %v1791_v6 = vmul.f32 %v6348_v58, %v7635_v34  ;;  %v5816_v1 = vpack.c.bf16 %v1956_v41, %v1951_v19  ;;  %v3329_v27 = vld [vmem:[#allocation15 + $0x10] sm:$0xff]  ;;  %v5892_v36 = vpack.c.bf16 %v3332_v40, %v3331_v2 }
 0x374   : > { %5809 = vmatprep.subr.bf16.mxu1 %v5808_v35  ;;  %v4675_v35 = vld [vmem:[%s7214_s2 + $0xc8] sm:$0xff]  ;;  %v5888_v30 = vpack.c.bf16 %v3330_v8, %v3329_v27  ;;  %v4680_v58 = vld [vmem:[%s7214_s2 + $0xf0] sm:$0xff]  ;;  %v5900_v19 = vpack.c.bf16 %v3336_v47, %v3335_v45 }
 0x375   : > { %v6350_v43 = vpop.eup %6349  ;;  %2073 = vmatmul.mubr.f32.gmra.mrb[24].mxu1 %v7716_v42  ;;  %2186 = vmatmul.mubr.f32.gmra.mrb[40].mxu0 %v7716_v42  ;;  %v3337_v41 = vld [vmem:[#allocation15 + $0x50] sm:$0xff] }
 0x376   : > { %2078 = vmatprep.mubr.f32.mxu1 %v7713_v37  ;;  %2191 = vmatprep.mubr.f32.mxu0 %v7713_v37  ;;  %v1794_v11 = vmul.f32 %v6350_v43, %v7652_v48  ;;  %v5818_v48 = vpack.c.bf16 %v1876_v57, %v1871_v52  ;;  %v4681_v43 = vld [vmem:[%s7214_s2 + $0xf8] sm:$0xff]  ;;  %v3341_v52 = vld [vmem:[#allocation15 + $0x70] sm:$0xff] }
 0x377   : > { %5811 = vmatpush3.bf16.msra.mxu1 %v5810_v12  ;;  %v4679_v12 = vld [vmem:[%s7214_s2 + $0xe8] sm:$0xff]  ;;  %v3342_v57 = vld [vmem:[#allocation15 + $0x78] sm:$0xff] }
 0x378   : > { %v6352_v54 = vpop.eup %6351  ;;  %5813 = vmatprep.subr.bf16.mxu1 %v5812_v20 }
 0x379   : > { %2079 = vmatmul.mubr.f32.gmra.mrb[26].mxu1 %v1791_v6  ;;  %2192 = vmatmul.mubr.f32.gmra.mrb[42].mxu0 %v1791_v6  ;;  %v1793_v18 = vmul.f32 %v6352_v54, %v7649_v46  ;;  %v4659_v46 = vld [vmem:[%s7214_s2 + $0x88] sm:$0xff] }
 0x37a   : > { %2084 = vmatprep.mubr.f32.mxu1 %v1794_v11  ;;  %2197 = vmatprep.mubr.f32.mxu0 %v1794_v11  ;;  %v3340_v54 = vld [vmem:[#allocation15 + $0x68] sm:$0xff] }
 0x37b   : > { %5815 = vmatpush3.bf16.msra.mxu1 %v5814_v49  ;;  %v3339_v49 = vld [vmem:[#allocation15 + $0x60] sm:$0xff] }
 0x37c   : > { %v6354_v3 = vpop.eup %6353  ;;  %5817 = vmatprep.subr.bf16.mxu1 %v5816_v1  ;;  %v5908_v1 = vpack.c.bf16 %v3340_v54, %v3339_v49 }
 0x37d   : > { %v6356_v34 = vpop.eup %6355  ;;  %2085 = vmatmul.mubr.f32.gmra.mrb[28].mxu1 %v1793_v18  ;;  %2198 = vmatmul.mubr.f32.gmra.mrb[44].mxu0 %v1793_v18  ;;  %v1796_v38 = vmul.f32 %v6354_v3, %v7659_v21  ;;  %v4660_v21 = vld [vmem:[%s7214_s2 + $0x90] sm:$0xff]  ;;  %v3464_v3 = vld [vmem:[#allocation16] sm:$0xff] }
 0x37e   : > { %v1795_v61 = vmul.f32 %v6356_v34, %v7662_v0  ;;  %v4661_v0 = vld [vmem:[%s7214_s2 + $0x98] sm:$0xff] }
 0x37f   : > { %2090 = vmatprep.mubr.f32.mxu1 %v1796_v38  ;;  %2203 = vmatprep.mubr.f32.mxu0 %v1796_v38 }
 0x380   : > { %5819 = vmatpush3.bf16.msra.mxu1 %v5818_v48  ;;  %v3465_v48 = vld [vmem:[#allocation16 + $0x8] sm:$0xff] }
 0x381   : > { %2091 = vmatmul.mubr.f32.gmra.mrb[30].mxu1 %v1795_v61  ;;  %2204 = vmatmul.mubr.f32.gmra.mrb[46].mxu0 %v1795_v61  ;;  %v7808_v34 = vpack.c.bf16 %v3465_v48, %v3464_v3 }
 0x382   : > { %2274 = vmatprep.mubr.f32.mxu1 %v7665_v53  ;;  %5048 = vmatprep.subr.mxu1 %v7447_v14  ;;  %v4662_v53 = vld [vmem:[%s7214_s2 + $0xa0] sm:$0xff] }
 0x383   : > { %5078 = vmatprep.mubr.msk.f32.mxu0 %vm2324_vm0, %v4658_v15 }
 0x385   : > { %2275 = vmatmul.mubr.f32.vlgmr.msra.gmra.mrb[32].mxu1 %v7668_v32  ;;  %5079 = vmatmul.mubr.msk.f32.vlgmr.msra.gmra.mrb[48].mxu0 %vm2324_vm0, %v4659_v46  ;;  %v4663_v32 = vld [vmem:[%s7214_s2 + $0xa8] sm:$0xff]  ;;  %v3080_v46 = vld [vmem:[#allocation13 + $0x10] sm:$0xff] }
 0x386   : > { %5049 = vmatpush3.msra.mxu1 %v7447_v14  ;;  %2279 = vmatprep.mubr.f32.mxu1 %v7678_v39  ;;  %v4665_v39 = vld [vmem:[%s7214_s2 + $0xb8] sm:$0xff] }
 0x387   : > { %5062 = vmatprep.subr.mxu1 %v7447_v14  ;;  %5081 = vmatprep.mubr.msk.f32.mxu0 %vm2324_vm0, %v4660_v21  ;;  %v3081_v21 = vld [vmem:[#allocation13 + $0x18] sm:$0xff] }
 0x389   : > { %2280 = vmatmul.mubr.f32.gmra.mrb[34].mxu1 %v7683_v50  ;;  %5082 = vmatmul.mubr.msk.f32.gmra.mrb[50].mxu0 %vm2324_vm0, %v4661_v0  ;;  %v2316_v50 = vld [vmem:[%s7214_s2] sm:$0xff]  ;;  %v5824_v0 = vpack.c.bf16 %v3081_v21, %v3080_v46 }
 0x38a   : > { %2284 = vmatprep.mubr.f32.mxu1 %v7686_v55  ;;  %5084 = vmatprep.mubr.msk.f32.mxu0 %vm2324_vm0, %v4662_v53  ;;  %v2317_v55 = vld [vmem:[%s7214_s2 + $0x8] sm:$0xff]  ;;  %v3082_v53 = vld [vmem:[#allocation13 + $0x20] sm:$0xff] }
 0x38d   : > { %2285 = vmatmul.mubr.f32.gmra.mrb[36].mxu1 %v7693_v59  ;;  %5085 = vmatmul.mubr.msk.f32.gmra.mrb[52].mxu0 %vm2324_vm0, %v4663_v32  ;;  %v2320_v59 = vld [vmem:[%s7214_s2 + $0x20] sm:$0xff]  ;;  %v3083_v32 = vld [vmem:[#allocation13 + $0x28] sm:$0xff] }
 0x38e   : > { %2289 = vmatprep.mubr.f32.mxu1 %v7696_v4  ;;  %5087 = vmatprep.mubr.msk.f32.mxu0 %vm2324_vm0, %v4664_v22  ;;  %v2321_v4 = vld [vmem:[%s7214_s2 + $0x28] sm:$0xff]  ;;  %v5828_v22 = vpack.c.bf16 %v3083_v32, %v3082_v53  ;;  %v3470_v32 = vld [vmem:[#allocation16 + $0x30] sm:$0xff] }
 0x391   : > { %2290 = vmatmul.mubr.f32.gmra.mrb[38].mxu1 %v7706_v17  ;;  %5088 = vmatmul.mubr.msk.f32.gmra.mrb[54].mxu0 %vm2324_vm0, %v4665_v39  ;;  %v4674_v17 = vld [vmem:[%s7214_s2 + $0xc0] sm:$0xff]  ;;  %v3084_v39 = vld [vmem:[#allocation13 + $0x30] sm:$0xff] }
 0x392   : > { %2294 = vmatprep.mubr.f32.mxu1 %v7703_v62  ;;  %v4647_v62 = vld [vmem:[%s7214_s2 + $0x68] sm:$0xff] }
 0x395   : > { %2295 = vmatmul.mubr.f32.gmra.mrb[40].mxu1 %v7716_v42  ;;  %v3334_v42 = vld [vmem:[#allocation15 + $0x38] sm:$0xff] }
 0x396   : > { %2299 = vmatprep.mubr.f32.mxu1 %v7713_v37  ;;  %v3333_v37 = vld [vmem:[#allocation15 + $0x30] sm:$0xff] }
 0x397   : > { %v5896_v20 = vpack.c.bf16 %v3334_v42, %v3333_v37 }
 0x399   : > { %2300 = vmatmul.mubr.f32.gmra.mrb[42].mxu1 %v1791_v6 }
 0x39a   : > { %2304 = vmatprep.mubr.f32.mxu1 %v1794_v11  ;;  %v3338_v11 = vld [vmem:[#allocation15 + $0x58] sm:$0xff] }
 0x39b   : > { %v5904_v6 = vpack.c.bf16 %v3338_v11, %v3337_v41 }
 0x39d   : > { %2305 = vmatmul.mubr.f32.gmra.mrb[44].mxu1 %v1793_v18  ;;  %v5912_v18 = vpack.c.bf16 %v3342_v57, %v3341_v52  ;;  %v3468_v52 = vld [vmem:[#allocation16 + $0x20] sm:$0xff]  ;;  %v3469_v57 = vld [vmem:[#allocation16 + $0x28] sm:$0xff] }
 0x39e   : > { %2309 = vmatprep.mubr.f32.mxu1 %v1796_v38  ;;  %v3078_v38 = vld [vmem:[#allocation13] sm:$0xff]  ;;  %v7867_v46 = vpack.c.bf16 %v3469_v57, %v3468_v52  ;;  %v3477_v52 = vld [vmem:[#allocation16 + $0x68] sm:$0xff] }
 0x3a0   : > { %9046 = vst [vmem:[#allocation37_spill] sm:$0xff] %v7867_v46 }
 0x3a1   : > { %2310 = vmatmul.mubr.f32.gmra.mrb[46].mxu1 %v1795_v61  ;;  %v3079_v61 = vld [vmem:[#allocation13 + $0x8] sm:$0xff] }
 0x3a2   : > { %5050 = vmatprep.mubr.msk.f32.mxu1 %vm2324_vm0, %v2316_v50  ;;  %v5820_v15 = vpack.c.bf16 %v3079_v61, %v3078_v38  ;;  %v3085_v50 = vld [vmem:[#allocation13 + $0x38] sm:$0xff] }
 0x3a4   : > { %5821 = vmatprep.subr.bf16.mxu0 %v5820_v15 }
 0x3a5   : > { %5051 = vmatmul.mubr.msk.f32.vlgmr.msra.gmra.mrb[48].mxu1 %vm2324_vm0, %v2317_v55  ;;  %5823 = vmatpush3.bf16.msra.mxu0 %v5820_v15  ;;  %v5832_v55 = vpack.c.bf16 %v3085_v50, %v3084_v39 }
 0x3a6   : > { %5063 = vmatpush3.msra.mxu1 %v7447_v14  ;;  %5053 = vmatprep.mubr.msk.f32.mxu1 %vm2324_vm0, %v2318_v63  ;;  %v3086_v63 = vld [vmem:[#allocation13 + $0x40] sm:$0xff] }
 0x3a7   : > { %5090 = vmatprep.subr.mxu1 %v7447_v14  ;;  %5825 = vmatprep.subr.bf16.mxu0 %v5824_v0 }
 0x3a9   : > { %5054 = vmatmul.mubr.msk.f32.gmra.mrb[50].mxu1 %vm2324_vm0, %v2319_v44  ;;  %5827 = vmatpush3.bf16.msra.mxu0 %v5824_v0  ;;  %v3087_v44 = vld [vmem:[#allocation13 + $0x48] sm:$0xff] }
 0x3aa   : > { %5056 = vmatprep.mubr.msk.f32.mxu1 %vm2324_vm0, %v2320_v59  ;;  %5829 = vmatprep.subr.bf16.mxu0 %v5828_v22  ;;  %v5836_v59 = vpack.c.bf16 %v3087_v44, %v3086_v63 }
 0x3ad   : > { %5057 = vmatmul.mubr.msk.f32.gmra.mrb[52].mxu1 %vm2324_vm0, %v2321_v4  ;;  %5831 = vmatpush3.bf16.msra.mxu0 %v5828_v22  ;;  %v3088_v4 = vld [vmem:[#allocation13 + $0x50] sm:$0xff]  ;;  %v3471_v22 = vld [vmem:[#allocation16 + $0x38] sm:$0xff] }
 0x3ae   : > { %5059 = vmatprep.mubr.msk.f32.mxu1 %vm2324_vm0, %v2322_v24  ;;  %5833 = vmatprep.subr.bf16.mxu0 %v5832_v55  ;;  %v3089_v24 = vld [vmem:[#allocation13 + $0x58] sm:$0xff] }
 0x3b1   : > { %5060 = vmatmul.mubr.msk.f32.gmra.mrb[54].mxu1 %vm2324_vm0, %v2323_v60  ;;  %5835 = vmatpush3.bf16.msra.mxu0 %v5832_v55  ;;  %v5840_v60 = vpack.c.bf16 %v3089_v24, %v3088_v4  ;;  %v7880_v4 = vpack.c.bf16 %v3471_v22, %v3470_v32 }
 0x3b2   : > { %5064 = vmatprep.mubr.msk.f32.mxu1 %vm2324_vm0, %v4642_v23  ;;  %5837 = vmatprep.subr.bf16.mxu0 %v5836_v59  ;;  %v3090_v23 = vld [vmem:[#allocation13 + $0x60] sm:$0xff] }
 0x3b3   : > { %v5844_v10 = vpack.c.bf16 %v3091_v56, %v3090_v23  ;;  %9047 = vst [vmem:[#allocation38_spill] sm:$0xff] %v7880_v4  ;;  %v3472_v56 = vld [vmem:[#allocation16 + $0x40] sm:$0xff] }
 0x3b5   : > { %5065 = vmatmul.mubr.msk.f32.vlgmr.msra.gmra.mrb[56].mxu1 %vm2324_vm0, %v4643_v5  ;;  %5839 = vmatpush3.bf16.msra.mxu0 %v5836_v59  ;;  %v3092_v5 = vld [vmem:[#allocation13 + $0x70] sm:$0xff] }
 0x3b6   : > { %5091 = vmatpush3.msra.mxu1 %v7447_v14  ;;  %5067 = vmatprep.mubr.msk.f32.mxu1 %vm2324_vm0, %v4644_v16  ;;  %v4649_v14 = vld [vmem:[%s7214_s2 + $0x78] sm:$0xff]  ;;  %s4617_s2 = sshll.u32 %s9244_s24, 3 }
 0x3b7   : > { %5885 = vmatprep.subr.bf16.mxu1 %v5884_v51  ;;  %5841 = vmatprep.subr.bf16.mxu0 %v5840_v60  ;;  %v3093_v16 = vld [vmem:[#allocation13 + $0x78] sm:$0xff]  ;;  %s7823_s10 = scalar_lea.vmem %s9044_s11, %s4617_s2 }
 0x3b8   : > { %v2868_v8 = vld [vmem:[%s7823_s10] sm:$0xff]  ;;  %v2870_v41 = vld [vmem:[%s7823_s10 + $0x10] sm:$0xff]  ;;  %v2871_v61 = vld [vmem:[%s7823_s10 + $0x18] sm:$0xff] }
 0x3b9   : > { %5068 = vmatmul.mubr.msk.f32.gmra.mrb[58].mxu1 %vm2324_vm0, %v4645_v29  ;;  %5843 = vmatpush3.bf16.msra.mxu0 %v5840_v60  ;;  %v3062_v29 = vld [vmem:[#allocation12] sm:$0xff] }
 0x3ba   : > { %5070 = vmatprep.mubr.msk.f32.mxu1 %vm2324_vm0, %v4646_v31  ;;  %5845 = vmatprep.subr.bf16.mxu0 %v5844_v10  ;;  %v3063_v31 = vld [vmem:[#allocation12 + $0x8] sm:$0xff]  ;;  %v2872_v44 = vld [vmem:[%s7823_s10 + $0x20] sm:$0xff] }
 0x3bd   : > { %5071 = vmatmul.mubr.msk.f32.gmra.mrb[60].mxu1 %vm2324_vm0, %v4647_v62  ;;  %5847 = vmatpush3.bf16.msra.mxu0 %v5844_v10  ;;  %v7811_v62 = vpack.c.bf16 %v3063_v31, %v3062_v29  ;;  %v3473_v10 = vld [vmem:[#allocation16 + $0x48] sm:$0xff] }
 0x3be   : > { %5073 = vmatprep.mubr.msk.f32.mxu1 %vm2324_vm0, %v4648_v13  ;;  %v7818_v13 = vld [vmem:[%s9043_s23] sm:$0x1f]  ;;  %v2873_v31 = vld [vmem:[%s7823_s10 + $0x28] sm:$0xff] }
 0x3bf   : > { %9042 = vst [vmem:[#allocation35_spill] sm:$0xff] %v7811_v62 }
 0x3c1   : > { %5074 = vmatmul.mubr.msk.f32.gmra.mrb[62].mxu1 %vm2324_vm0, %v4649_v14  ;;  %v7827_v14 = vrot.slane %v7818_v13, %v7334_v26 }
 0x3c2   : > { %5092 = vmatprep.mubr.msk.f32.mxu1 %vm2324_vm0, %v4674_v17  ;;  %v7831_v17 = vrot.slane %v7818_v13, %v7340_v28 }
 0x3c5   : > { %5093 = vmatmul.mubr.msk.f32.vlgmr.msra.gmra.mrb[64].mxu1 %vm2324_vm0, %v4675_v35 }
 0x3c6   : > { %5095 = vmatprep.mubr.msk.f32.mxu1 %vm2324_vm0, %v4676_v7  ;;  %5887 = vmatpush3.bf16.msra.mxu1 %v5884_v51  ;;  %v5848_v51 = vpack.c.bf16 %v3093_v16, %v3092_v5 }
 0x3c7   : > { %5889 = vmatprep.subr.bf16.mxu1 %v5888_v30 }
 0x3c8   : > { %5849 = vmatprep.subr.bf16.mxu0 %v5848_v51 }
 0x3c9   : > { %5096 = vmatmul.mubr.msk.f32.gmra.mrb[66].mxu1 %vm2324_vm0, %v4677_v9  ;;  %5851 = vmatpush3.bf16.msra.mxu0 %v5848_v51 }
 0x3ca   : > { %5098 = vmatprep.mubr.msk.f32.mxu1 %vm2324_vm0, %v4678_v33  ;;  %5891 = vmatpush3.bf16.msra.mxu1 %v5888_v30 }
 0x3cb   : > { %5893 = vmatprep.subr.bf16.mxu1 %v5892_v36  ;;  %5853 = vmatprep.subr.bf16.mxu0 %v7811_v62 }
 0x3cd   : > { %5099 = vmatmul.mubr.msk.f32.gmra.mrb[68].mxu1 %vm2324_vm0, %v4679_v12 }
 0x3ce   : > { %5101 = vmatprep.mubr.msk.f32.mxu1 %vm2324_vm0, %v4680_v58  ;;  %5895 = vmatpush3.bf16.msra.mxu1 %v5892_v36  ;;  %v2869_v36 = vld [vmem:[%s7823_s10 + $0x8] sm:$0xff]  ;;  %v3466_v58 = vld [vmem:[#allocation16 + $0x10] sm:$0xff] }
 0x3cf   : > { %5897 = vmatprep.subr.bf16.mxu1 %v5896_v20 }
 0x3d1   : > { %5102 = vmatmul.mubr.msk.f32.gmra.mrb[70].mxu1 %vm2324_vm0, %v4681_v43 }
 0x3d2   : > { %5899 = vmatpush3.bf16.msra.mxu1 %v5896_v20  ;;  %v3467_v20 = vld [vmem:[#allocation16 + $0x18] sm:$0xff] }
 0x3d3   : > { %5901 = vmatprep.subr.bf16.mxu1 %v5900_v19 }
 0x3d6   : > { %5903 = vmatpush3.bf16.msra.mxu1 %v5900_v19 }
 0x3d7   : > { %5905 = vmatprep.subr.bf16.mxu1 %v5904_v6 }
 0x3da   : > { %5907 = vmatpush3.bf16.msra.mxu1 %v5904_v6  ;;  %v7854_v6 = vpack.c.bf16 %v3467_v20, %v3466_v58  ;;  %v2874_v20 = vld [vmem:[%s7823_s10 + $0x30] sm:$0xff] }
 0x3db   : > { %5909 = vmatprep.subr.bf16.mxu1 %v5908_v1 }
 0x3dc   : > { %9045 = vst [vmem:[#allocation36_spill] sm:$0xff] %v7854_v6 }
 0x3de   : > { %5911 = vmatpush3.bf16.msra.mxu1 %v5908_v1 }
 0x3df   : > { %5913 = vmatprep.subr.bf16.mxu1 %v5912_v18 }
 0x3e2   : > { %5915 = vmatpush3.bf16.msra.mxu1 %v5912_v18 }
 0x3e3   : > { %5917 = vmatprep.subr.bf16.mxu1 %v7808_v34 }
 0x435   : > { %v2050_v27 = vpop.f32.mrb[16].mxu1  ;;  %v7834_v35 = vpop.f32.mrb[32].mxu0 }
 0x436   : > { %v2051_v7 = vadd.f32 %v2050_v27, %v7827_v14  ;;  %v2052_v30 = vpop.f32.mrb[17].mxu1  ;;  %v7837_v2 = vpop.f32.mrb[33].mxu0 }
 0x437   : > { %v2053_v40 = vadd.f32 %v2052_v30, %v7831_v17 }
 0x438   : > { %v7840_v9 = vmul.f32 %v2868_v8, %v2051_v7 }
 0x439   : > { %v2974_v26 = vmul.f32 %v2868_v8, %v2053_v40  ;;  %v7893_v8 = vpack.c.bf16 %v3473_v10, %v3472_v56  ;;  %v7930_v10 = vld [vmem:[%s7210_s6 + $0x8] sm:$0xff] }
 0x43b   : > { %5224 = vmatprep.mubr.f32.mxu1 %v2974_v26  ;;  %9048 = vst [vmem:[#allocation39_spill] sm:$0xff] %v7893_v8  ;;  %v3474_v26 = vld [vmem:[#allocation16 + $0x50] sm:$0xff] }
 0x43c   : > { %v2056_v33 = vpop.f32.mrb[18].mxu1  ;;  %v7843_v28 = vpop.f32.mrb[34].mxu0 }
 0x43d   : > { %v2057_v37 = vadd.f32 %v2056_v33, %v7827_v14  ;;  %v2058_v42 = vpop.f32.mrb[19].mxu1  ;;  %v7846_v12 = vpop.f32.mrb[35].mxu0  ;;  %v3475_v33 = vld [vmem:[#allocation16 + $0x58] sm:$0xff] }
 0x43e   : > { %v2059_v45 = vadd.f32 %v2058_v42, %v7831_v17 }
 0x43f   : > { %v7849_v47 = vmul.f32 %v2869_v36, %v2057_v37 }
 0x440   : > { %v2975_v43 = vmul.f32 %v2869_v36, %v2059_v45  ;;  %v2062_v19 = vpop.f32.mrb[20].mxu1  ;;  %v7852_v11 = vpop.f32.mrb[36].mxu0 }
 0x441   : > { %v2063_v49 = vadd.f32 %v2062_v19, %v7827_v14  ;;  %v2064_v54 = vpop.f32.mrb[21].mxu1  ;;  %v7857_v1 = vpop.f32.mrb[37].mxu0 }
 0x442   : > { %v2065_v18 = vadd.f32 %v2064_v54, %v7831_v17  ;;  %5225 = vmatmul.mubr.f32.vlgmr.msra.gmra.mrb[72].mxu1 %v2975_v43  ;;  %v7906_v43 = vpack.c.bf16 %v3475_v33, %v3474_v26  ;;  %v3476_v54 = vld [vmem:[#allocation16 + $0x60] sm:$0xff] }
 0x443   : > { %v7860_v3 = vmul.f32 %v2870_v41, %v2063_v49  ;;  %5919 = vmatpush3.bf16.msra.mxu1 %v7808_v34 }
 0x444   : > { %v2976_v48 = vmul.f32 %v2870_v41, %v2065_v18  ;;  %v2068_v38 = vpop.f32.mrb[22].mxu1  ;;  %v7864_v15 = vpop.f32.mrb[38].mxu0  ;;  %5921 = vmatprep.subr.bf16.mxu1 %v7854_v6  ;;  %9049 = vst [vmem:[#allocation40_spill] sm:$0xff] %v7906_v43 }
 0x445   : > { %v2069_v21 = vadd.f32 %v2068_v38, %v7827_v14  ;;  %v2070_v0 = vpop.f32.mrb[23].mxu1  ;;  %v7870_v53 = vpop.f32.mrb[39].mxu0 }
 0x446   : > { %v2071_v39 = vadd.f32 %v2070_v0, %v7831_v17  ;;  %5227 = vmatprep.mubr.f32.mxu1 %v2976_v48  ;;  %v7919_v0 = vpack.c.bf16 %v3477_v52, %v3476_v54 }
 0x447   : > { %v7873_v50 = vmul.f32 %v2871_v61, %v2069_v21  ;;  %5923 = vmatpush3.bf16.msra.mxu1 %v7854_v6 }
 0x448   : > { %v2977_v55 = vmul.f32 %v2871_v61, %v2071_v39  ;;  %v2074_v63 = vpop.f32.mrb[24].mxu1  ;;  %v7877_v59 = vpop.f32.mrb[40].mxu0  ;;  %5925 = vmatprep.subr.bf16.mxu1 %v7867_v46  ;;  %v2875_v61 = vld [vmem:[%s7823_s10 + $0x38] sm:$0xff]  ;;  %9050 = vst [vmem:[#allocation41_spill] sm:$0xff] %v7919_v0 }
 0x449   : > { %v2075_v24 = vadd.f32 %v2074_v63, %v7827_v14  ;;  %v2076_v60 = vpop.f32.mrb[25].mxu1  ;;  %v7883_v23 = vpop.f32.mrb[41].mxu0  ;;  %v3479_v63 = vld [vmem:[#allocation16 + $0x78] sm:$0xff] }
 0x44a   : > { %v2077_v5 = vadd.f32 %v2076_v60, %v7831_v17  ;;  %5228 = vmatmul.mubr.f32.gmra.mrb[74].mxu1 %v2977_v55  ;;  %v3478_v55 = vld [vmem:[#allocation16 + $0x70] sm:$0xff] }
 0x44b   : > { %v7886_v16 = vmul.f32 %v2872_v44, %v2075_v24  ;;  %5927 = vmatpush3.bf16.msra.mxu1 %v7867_v46 }
 0x44c   : > { %v2978_v51 = vmul.f32 %v2872_v44, %v2077_v5  ;;  %v2080_v29 = vpop.f32.mrb[26].mxu1  ;;  %v7890_v27 = vpop.f32.mrb[42].mxu0  ;;  %5929 = vmatprep.subr.bf16.mxu1 %v7880_v4  ;;  %v7935_v5 = vpack.c.bf16 %v3479_v63, %v3478_v55  ;;  %v7991_v55 = vld [vmem:[%s7210_s6 + $0x20] sm:$0xff] }
 0x44d   : > { %v2081_v7 = vadd.f32 %v2080_v29, %v7827_v14  ;;  %v2082_v30 = vpop.f32.mrb[27].mxu1  ;;  %v7896_v40 = vpop.f32.mrb[43].mxu0  ;;  %v7940_v29 = vld [vmem:[%s7210_s6] sm:$0xff]  ;;  %9064 = vst [vmem:[#allocation55_spill] sm:$0xff] %v7991_v55 }
 0x44e   : > { %v2083_v36 = vadd.f32 %v2082_v30, %v7831_v17  ;;  %5230 = vmatprep.mubr.f32.mxu1 %v2978_v51  ;;  %9051 = vst [vmem:[#allocation42_spill] sm:$0xff] %v7935_v5 }
 0x44f   : > { %v7899_v37 = vmul.f32 %v2873_v31, %v2081_v7  ;;  %5931 = vmatpush3.bf16.msra.mxu1 %v7880_v4 }
 0x450   : > { %v2979_v42 = vmul.f32 %v2873_v31, %v2083_v36  ;;  %v2086_v58 = vpop.f32.mrb[28].mxu1  ;;  %v7903_v45 = vpop.f32.mrb[44].mxu0  ;;  %5933 = vmatprep.subr.bf16.mxu1 %v7893_v8 }
 0x451   : > { %v2087_v19 = vadd.f32 %v2086_v58, %v7827_v14  ;;  %v2088_v41 = vpop.f32.mrb[29].mxu1  ;;  %v7909_v49 = vpop.f32.mrb[45].mxu0 }
 0x452   : > { %v2089_v57 = vadd.f32 %v2088_v41, %v7831_v17  ;;  %5231 = vmatmul.mubr.f32.gmra.mrb[76].mxu1 %v2979_v42  ;;  %v7961_v42 = vld [vmem:[%s7210_s6 + $0x98] sm:$0xff]  ;;  %v7970_v41 = vld [vmem:[%s7210_s6 + $0x90] sm:$0xff] }
 0x453   : > { %v7912_v18 = vmul.f32 %v2874_v20, %v2087_v19  ;;  %5935 = vmatpush3.bf16.msra.mxu1 %v7893_v8  ;;  %9056 = vst [vmem:[#allocation47_spill] sm:$0xff] %v7961_v42  ;;  %9059 = vst [vmem:[#allocation50_spill] sm:$0xff] %v7970_v41  ;;  %v1969_v8 = vsub.s32 2, %v7331_v25 }
 0x454   : > { %v2980_v48 = vmul.f32 %v2874_v20, %v2089_v57  ;;  %v2092_v38 = vpop.f32.mrb[30].mxu1  ;;  %v7916_v21 = vpop.f32.mrb[46].mxu0  ;;  %5937 = vmatprep.subr.bf16.mxu1 %v7906_v43 }
 0x455   : > { %v2093_v32 = vadd.f32 %v2092_v38, %v7827_v14  ;;  %v2094_v22 = vpop.f32.mrb[31].mxu1  ;;  %v7922_v39 = vpop.f32.mrb[47].mxu0  ;;  %v7933_v14 = vld [vmem:[%s7210_s6 + $0x88] sm:$0xff] }
 0x456   : > { %v2095_v44 = vadd.f32 %v2094_v22, %v7831_v17  ;;  %5233 = vmatprep.mubr.f32.mxu1 %v2980_v48  ;;  %v7983_v38 = vld [vmem:[%s7210_s6 + $0x28] sm:$0xff] }
 0x457   : > { %v7925_v24 = vmul.f32 %v2875_v61, %v2093_v32  ;;  %5939 = vmatpush3.bf16.msra.mxu1 %v7906_v43 }
 0x458   : > { %v2981_v60 = vmul.f32 %v2875_v61, %v2095_v44  ;;  %v4772_v56 = vpop.f32.mrb[32].mxu1  ;;  %5941 = vmatprep.subr.bf16.mxu1 %v7919_v0  ;;  %v7937_v51 = vpop.f32.mrb[48].mxu0  ;;  %v7986_v61 = vld [vmem:[%s7210_s6 + $0xa8] sm:$0xff] }
 0x459   : > { %9052 = vst [vmem:[#allocation43_spill] sm:$0xff] %v7937_v51  ;;  %v4773_v17 = vpop.f32.mrb[33].mxu1  ;;  %v7944_v31 = vmul.f32 %v7937_v51, %v7933_v14  ;;  %v7948_v7 = vmul.f32 %v7937_v51, %v7930_v10  ;;  %v7950_v30 = vpop.f32.mrb[49].mxu0  ;;  %9062 = vst [vmem:[#allocation53_spill] sm:$0xff] %v7986_v61 }
 0x45a   : > { %9054 = vst [vmem:[#allocation45_spill] sm:$0xff] %v7950_v30  ;;  %v7952_v26 = vadd.f32 %v4773_v17, %v4772_v56  ;;  %5234 = vmatmul.mubr.f32.gmra.mrb[78].mxu1 %v2981_v60  ;;  %v7956_v33 = vmul.f32 %v7940_v29, %v7950_v30  ;;  %v8002_v60 = vld [vmem:[%s7210_s6 + $0xa0] sm:$0xff] }
 0x45b   : > { %9053 = vst [vmem:[#allocation44_spill] sm:$0xff] %v7944_v31  ;;  %5943 = vmatpush3.bf16.msra.mxu1 %v7919_v0  ;;  %9067 = vst [vmem:[#allocation58_spill] sm:$0xff] %v8002_v60 }
 0x45c   : > { %9055 = vst [vmem:[#allocation46_spill] sm:$0xff] %v7956_v33  ;;  %v4775_v36 = vpop.f32.mrb[34].mxu1  ;;  %5945 = vmatprep.subr.bf16.mxu1 %v7935_v5  ;;  %v7963_v58 = vpop.f32.mrb[50].mxu0 }
 0x45d   : > { %9057 = vst [vmem:[#allocation48_spill] sm:$0xff] %v7963_v58  ;;  %v4776_v20 = vpop.f32.mrb[35].mxu1  ;;  %v7967_v19 = vmul.f32 %v7963_v58, %v7961_v42  ;;  %v7972_v54 = vpop.f32.mrb[51].mxu0 }
 0x45e   : > { %9060 = vst [vmem:[#allocation51_spill] sm:$0xff] %v7972_v54  ;;  %v7974_v52 = vadd.f32 %v4776_v20, %v4775_v36  ;;  %v7978_v57 = vmul.f32 %v7970_v41, %v7972_v54 }
 0x45f   : > { %9058 = vst [vmem:[#allocation49_spill] sm:$0xff] %v7967_v19  ;;  %5947 = vmatpush3.bf16.msra.mxu1 %v7935_v5  ;;  %v8020_v19 = vld [vmem:[%s7210_s6 + $0xb8] sm:$0xff]  ;;  %v8025_v5 = vld [vmem:[%s7210_s6 + $0x30] sm:$0xff] }
 0x460   : > { %9061 = vst [vmem:[#allocation52_spill] sm:$0xff] %v7978_v57  ;;  %v4778_v48 = vpop.f32.mrb[36].mxu1  ;;  %5981 = vmatprep.subr.bf16.mxu1 %v7808_v34  ;;  %v7988_v32 = vpop.f32.mrb[52].mxu0  ;;  %9071 = vst [vmem:[#allocation62_spill] sm:$0xff] %v8020_v19 }
 0x461   : > { %9063 = vst [vmem:[#allocation54_spill] sm:$0xff] %v7988_v32  ;;  %v4779_v22 = vpop.f32.mrb[37].mxu1  ;;  %v7995_v63 = vmul.f32 %v7988_v32, %v7986_v61  ;;  %v7999_v44 = vmul.f32 %v7988_v32, %v7983_v38  ;;  %v8004_v56 = vpop.f32.mrb[53].mxu0 }
 0x462   : > { %9068 = vst [vmem:[#allocation59_spill] sm:$0xff] %v8004_v56  ;;  %v8006_v17 = vadd.f32 %v4779_v22, %v4778_v48  ;;  %v8010_v36 = vmul.f32 %v8002_v60, %v8004_v56  ;;  %v8014_v20 = vmul.f32 %v7991_v55, %v8004_v56 }
 0x463   : > { %9065 = vst [vmem:[#allocation56_spill] sm:$0xff] %v7995_v63  ;;  %9066 = vst [vmem:[#allocation57_spill] sm:$0xff] %v7999_v44  ;;  %v8017_v63 = vld [vmem:[%s7210_s6 + $0x38] sm:$0xff] }
 0x464   : > { %9069 = vst [vmem:[#allocation60_spill] sm:$0xff] %v8010_v36  ;;  %9070 = vst [vmem:[#allocation61_spill] sm:$0xff] %v8014_v20  ;;  %v4781_v62 = vpop.f32.mrb[38].mxu1  ;;  %v8022_v57 = vpop.f32.mrb[54].mxu0  ;;  %v8036_v36 = vld [vmem:[%s7210_s6 + $0xb0] sm:$0xff] }
 0x465   : > { %9072 = vst [vmem:[#allocation63_spill] sm:$0xff] %v8022_v57  ;;  %v4782_v31 = vpop.f32.mrb[39].mxu1  ;;  %v8029_v48 = vmul.f32 %v8022_v57, %v8020_v19  ;;  %v8033_v22 = vmul.f32 %v8022_v57, %v8017_v63  ;;  %9075 = vst [vmem:[#allocation66_spill] sm:$0xff] %v8036_v36  ;;  %v8038_v0 = vpop.f32.mrb[55].mxu0  ;;  %v8095_v57 = vld [vmem:[%s7210_s6 + $0x18] sm:$0xff] }
 0x466   : > { %9076 = vst [vmem:[#allocation67_spill] sm:$0xff] %v8038_v0  ;;  %v8040_v20 = vadd.f32 %v4782_v31, %v4781_v62  ;;  %v8044_v44 = vmul.f32 %v8036_v36, %v8038_v0  ;;  %v8048_v60 = vmul.f32 %v8025_v5, %v8038_v0 }
 0x467   : > { %9073 = vst [vmem:[#allocation64_spill] sm:$0xff] %v8029_v48  ;;  %9074 = vst [vmem:[#allocation65_spill] sm:$0xff] %v8033_v22 }
 0x468   : > { %9077 = vst [vmem:[#allocation68_spill] sm:$0xff] %v8040_v20  ;;  %9078 = vst [vmem:[#allocation69_spill] sm:$0xff] %v8044_v44  ;;  %v4784_v19 = vpop.f32.mrb[40].mxu1  ;;  %v1970_v44 = vrot.slane %v7818_v13, %v1969_v8 }
 0x469   : > { %9079 = vst [vmem:[#allocation70_spill] sm:$0xff] %v8048_v60  ;;  %v4785_v48 = vpop.f32.mrb[41].mxu1 }
 0x46a   : > { %v8050_v43 = vadd.f32 %v4785_v48, %v4784_v19  ;;  %v2170_v19 = vadd.f32 %v7843_v28, %v1970_v44  ;;  %v2164_v48 = vadd.f32 %v7834_v35, %v1970_v44  ;;  %v1977_v28 = vsub.s32 4, %v7331_v25 }
 0x46b   : > { %v2176_v35 = vadd.f32 %v7852_v11, %v1970_v44  ;;  %v3067_v11 = vld [vmem:[#allocation12 + $0x28] sm:$0xff] }
 0x46c   : > { %9080 = vst [vmem:[#allocation71_spill] sm:$0xff] %v8050_v43  ;;  %v4787_v61 = vpop.f32.mrb[42].mxu1 }
 0x46d   : > { %v4788_v22 = vpop.f32.mrb[43].mxu1 }
 0x46e   : > { %v8052_v41 = vadd.f32 %v4788_v22, %v4787_v61  ;;  %v1973_v61 = vsub.s32 3, %v7331_v25 }
 0x470   : > { %9081 = vst [vmem:[#allocation72_spill] sm:$0xff] %v8052_v41  ;;  %v4790_v62 = vpop.f32.mrb[44].mxu1 }
 0x471   : > { %v4791_v31 = vpop.f32.mrb[45].mxu1 }
 0x472   : > { %v8055_v20 = vadd.f32 %v4791_v31, %v4790_v62 }
 0x474   : > { %9082 = vst [vmem:[#allocation73_spill] sm:$0xff] %v8055_v20  ;;  %v4793_v36 = vpop.f32.mrb[46].mxu1  ;;  %v3069_v20 = vld [vmem:[#allocation12 + $0x38] sm:$0xff] }
 0x475   : > { %v4794_v0 = vpop.f32.mrb[47].mxu1 }
 0x476   : > { %v8058_v60 = vadd.f32 %v4794_v0, %v4793_v36  ;;  %v2182_v0 = vadd.f32 %v7864_v15, %v1970_v44  ;;  %v8076_v36 = vld [vmem:[%s7210_s6 + $0x10] sm:$0xff] }
 0x478   : > { %9083 = vst [vmem:[#allocation74_spill] sm:$0xff] %v8058_v60  ;;  %v5052_v43 = vpop.f32.mrb[48].mxu1 }
 0x479   : > { %v8064_v22 = vmul.f32 %v5052_v43, %v7849_v47  ;;  %v8066_v41 = vmul.f32 %v5052_v43, %v2170_v19  ;;  %v2415_v62 = vpop.f32.mrb[49].mxu1  ;;  %v3064_v43 = vld [vmem:[#allocation12 + $0x10] sm:$0xff]  ;;  %v3065_v19 = vld [vmem:[#allocation12 + $0x18] sm:$0xff] }
 0x47a   : > { %v8069_v31 = vmul.f32 %v7840_v9, %v2415_v62  ;;  %v8071_v8 = vmul.f32 %v2415_v62, %v2164_v48  ;;  %v1974_v9 = vrot.slane %v7818_v13, %v1973_v61  ;;  %v2194_v61 = vadd.f32 %v7890_v27, %v1970_v44 }
 0x47b   : > { %9084 = vst [vmem:[#allocation75_spill] sm:$0xff] %v8064_v22  ;;  %9085 = vst [vmem:[#allocation76_spill] sm:$0xff] %v8066_v41  ;;  %v3066_v22 = vld [vmem:[#allocation12 + $0x20] sm:$0xff]  ;;  %v3457_v48 = vmul.f32 %v8066_v41, %v7930_v10  ;;  %v8099_v41 = vrot.slane %v7818_v13, %v1977_v28 }
 0x47c   : > { %9086 = vst [vmem:[#allocation77_spill] sm:$0xff] %v8069_v31  ;;  %v5055_v60 = vpop.f32.mrb[50].mxu1  ;;  %v3456_v47 = vmul.f32 %v8071_v8, %v7940_v29  ;;  %v3068_v31 = vld [vmem:[#allocation12 + $0x30] sm:$0xff]  ;;  %v8112_v27 = vadd.f32 %v7837_v2, %v1974_v9 }
 0x47d   : > { %v8085_v15 = vmul.f32 %v5055_v60, %v7873_v50  ;;  %v8087_v25 = vmul.f32 %v5055_v60, %v2182_v0  ;;  %v2425_v62 = vpop.f32.mrb[51].mxu1  ;;  %v8101_v50 = vpack.c.bf16 %v3065_v19, %v3064_v43  ;;  %v2188_v60 = vadd.f32 %v7877_v59, %v1970_v44 }
 0x47e   : > { %v8090_v42 = vmul.f32 %v7860_v3, %v2425_v62  ;;  %v8092_v33 = vmul.f32 %v2425_v62, %v2176_v35  ;;  %5268 = vmatprep.mubr.f32.mxu1 %v3456_v47  ;;  %v8107_v35 = vpack.c.bf16 %v3067_v11, %v3066_v22  ;;  %v8109_v47 = vpack.c.bf16 %v3069_v20, %v3068_v31  ;;  %v8170_v11 = vld [vmem:[%s7210_s6 + $0x80] sm:$0xff] }
 0x47f   : > { %9087 = vst [vmem:[#allocation78_spill] sm:$0xff] %v8085_v15  ;;  %9088 = vst [vmem:[#allocation79_spill] sm:$0xff] %v8087_v25  ;;  %5269 = vmatmul.mubr.f32.vlgmr.msra.gmra.mrb[80].mxu1 %v3457_v48  ;;  %v3459_v59 = vmul.f32 %v8087_v25, %v8095_v57  ;;  %v8123_v22 = vadd.f32 %v7846_v12, %v1974_v9  ;;  %v8126_v20 = vadd.f32 %v7857_v1, %v1974_v9 }
 0x480   : > { %9089 = vst [vmem:[#allocation80_spill] sm:$0xff] %v8090_v42  ;;  %9090 = vst [vmem:[#allocation81_spill] sm:$0xff] %v8101_v50  ;;  %5983 = vmatpush3.bf16.msra.mxu1 %v7808_v34  ;;  %v5058_v0 = vpop.f32.mrb[52].mxu1  ;;  %v3458_v3 = vmul.f32 %v8092_v33, %v8076_v36  ;;  %v8134_v31 = vadd.f32 %v7870_v53, %v1974_v9  ;;  %v8137_v19 = vadd.f32 %v7883_v23, %v1974_v9  ;;  %v8151_v53 = vld [vmem:[%s7210_s6 + $0x48] sm:$0xff] }
 0x481   : > { %9091 = vst [vmem:[#allocation82_spill] sm:$0xff] %v8107_v35  ;;  %9092 = vst [vmem:[#allocation83_spill] sm:$0xff] %v8109_v47  ;;  %v8115_v13 = vmul.f32 %v5058_v0, %v7899_v37  ;;  %v8117_v28 = vmul.f32 %v5058_v0, %v2194_v61  ;;  %v2435_v43 = vpop.f32.mrb[53].mxu1  ;;  %5985 = vmatprep.subr.bf16.mxu1 %v7854_v6  ;;  %v8140_v48 = vadd.f32 %v7896_v40, %v1974_v9 }
 0x482   : > { %9093 = vst [vmem:[#allocation84_spill] sm:$0xff] %v8112_v27  ;;  %9096 = vst [vmem:[#allocation87_spill] sm:$0xff] %v8126_v20  ;;  %v8129_v2 = vmul.f32 %v7886_v16, %v2435_v43  ;;  %v8131_v37 = vmul.f32 %v2435_v43, %v2188_v60  ;;  %5271 = vmatprep.mubr.f32.mxu1 %v3458_v3  ;;  %v2206_v12 = vadd.f32 %v7916_v21, %v1970_v44  ;;  %v8184_v3 = vld [vmem:[%s7210_s6 + $0x58] sm:$0xff]  ;;  %v8187_v43 = vld [vmem:[%s7210_s6 + $0x50] sm:$0xff] }
 0x483   : > { %9094 = vst [vmem:[#allocation85_spill] sm:$0xff] %v8115_v13  ;;  %9095 = vst [vmem:[#allocation86_spill] sm:$0xff] %v8117_v28  ;;  %5272 = vmatmul.mubr.f32.gmra.mrb[82].mxu1 %v3459_v59  ;;  %v2200_v1 = vadd.f32 %v7903_v45, %v1970_v44  ;;  %v8145_v16 = vadd.f32 %v7909_v49, %v1974_v9  ;;  %v8148_v62 = vadd.f32 %v7922_v39, %v1974_v9  ;;  %v8167_v9 = vld [vmem:[%s7210_s6 + $0x40] sm:$0xff] }
 0x484   : > { %9097 = vst [vmem:[#allocation88_spill] sm:$0xff] %v8129_v2  ;;  %9098 = vst [vmem:[#allocation89_spill] sm:$0xff] %v8131_v37  ;;  %5987 = vmatpush3.bf16.msra.mxu1 %v7854_v6  ;;  %v5061_v23 = vpop.f32.mrb[54].mxu1  ;;  %v3460_v40 = vmul.f32 %v8131_v37, %v7991_v55  ;;  %v3461_v39 = vmul.f32 %v8117_v28, %v7983_v38  ;;  %v2927_v44 = vmul.f32 %v7937_v51, %v8151_v53  ;;  %v8239_v2 = vld [vmem:[%s7210_s6 + $0x60] sm:$0xff] }
 0x485   : > { %9099 = vst [vmem:[#allocation90_spill] sm:$0xff] %v8134_v31  ;;  %9100 = vst [vmem:[#allocation91_spill] sm:$0xff] %v8137_v19  ;;  %v8157_v21 = vmul.f32 %v5061_v23, %v7925_v24  ;;  %v8159_v45 = vmul.f32 %v5061_v23, %v2206_v12  ;;  %v2445_v49 = vpop.f32.mrb[55].mxu1  ;;  %5989 = vmatprep.subr.bf16.mxu1 %v7867_v46  ;;  %v2926_v60 = vmul.f32 %v8167_v9, %v7950_v30  ;;  %v8200_v23 = vld [vmem:[%s7210_s6 + $0x68] sm:$0xff] }
 0x486   : > { %9101 = vst [vmem:[#allocation92_spill] sm:$0xff] %v8140_v48  ;;  %9102 = vst [vmem:[#allocation93_spill] sm:$0xff] %v8145_v16  ;;  %v8173_v61 = vmul.f32 %v7912_v18, %v2445_v49  ;;  %v8175_v24 = vmul.f32 %v2445_v49, %v2200_v1  ;;  %5274 = vmatprep.mubr.f32.mxu1 %v3460_v40  ;;  %v8181_v0 = vmul.f32 %v8170_v11, %v7950_v30  ;;  %v9121_v48 = vld [vmem:[#allocation67_spill] sm:$0xff] }
 0x487   : > { %9103 = vst [vmem:[#allocation94_spill] sm:$0xff] %v8148_v62  ;;  %9104 = vst [vmem:[#allocation95_spill] sm:$0xff] %v8157_v21  ;;  %v8191_v59 = vadd.f32 %v7952_v26, %v8099_v41  ;;  %5275 = vmatmul.mubr.f32.gmra.mrb[84].mxu1 %v3461_v39  ;;  %v2929_v18 = vmul.f32 %v7963_v58, %v8184_v3  ;;  %v3041_v12 = vmul.f32 %v7963_v58, %v8095_v57  ;;  %v8251_v62 = vld [vmem:[%s7210_s6 + $0x78] sm:$0xff] }
 0x488   : > { %9105 = vst [vmem:[#allocation96_spill] sm:$0xff] %v8173_v61  ;;  %v2928_v1 = vmul.f32 %v8187_v43, %v7972_v54  ;;  %v8204_v40 = vadd.f32 %v7974_v52, %v8099_v41  ;;  %5991 = vmatpush3.bf16.msra.mxu1 %v7867_v46  ;;  %v8207_v26 = vpop.f32.mrb[56].mxu1  ;;  %v3462_v49 = vmul.f32 %v8175_v24, %v8025_v5 }
 0x489   : > { %9106 = vst [vmem:[#allocation97_spill] sm:$0xff] %v8207_v26  ;;  %v3040_v39 = vmul.f32 %v8076_v36, %v7972_v54  ;;  %v2931_v58 = vmul.f32 %v7988_v32, %v8200_v23  ;;  %v2919_v30 = vmul.f32 %v8207_v26, %v7930_v10  ;;  %v8219_v52 = vmul.f32 %v8207_v26, %v7933_v14  ;;  %v8223_v21 = vpop.f32.mrb[57].mxu1 }
 0x48a   : > { %v3047_v51 = vmul.f32 %v8207_v26, %v8151_v53  ;;  %9107 = vst [vmem:[#allocation98_spill] sm:$0xff] %v8223_v21  ;;  %5993 = vmatprep.subr.bf16.mxu1 %v7880_v4  ;;  %v3463_v54 = vmul.f32 %v8159_v45, %v8017_v63  ;;  %v2918_v32 = vmul.f32 %v7940_v29, %v8223_v21 }
 0x48b   : > { %v8232_v61 = vmul.f32 %v8170_v11, %v8223_v21  ;;  %v3046_v13 = vmul.f32 %v8167_v9, %v8223_v21  ;;  %5277 = vmatprep.mubr.f32.mxu1 %v3462_v49  ;;  %v3755_v26 = vmul.f32 %v8167_v9, %v8071_v8  ;;  %v8243_v15 = vadd.f32 %v8006_v17, %v8099_v41  ;;  %v9109_v17 = vld [vmem:[#allocation63_spill] sm:$0xff] }
 0x48c   : > { %v8245_v42 = vadd.f32 %v2927_v44, %v2919_v30  ;;  %v3055_v47 = vsub.f32 %v7948_v7, %v3047_v51  ;;  %5278 = vmatmul.mubr.f32.gmra.mrb[86].mxu1 %v3463_v54  ;;  %v2930_v16 = vmul.f32 %v8239_v2, %v8004_v56  ;;  %v8253_v49 = vadd.f32 %v2926_v60, %v2918_v32  ;;  %v8256_v21 = vpop.f32.mrb[58].mxu1  ;;  %v9110_v44 = vld [vmem:[#allocation46_spill] sm:$0xff]  ;;  %v9112_v54 = vld [vmem:[#allocation47_spill] sm:$0xff] }
 0x48d   : > { %5995 = vmatpush3.bf16.msra.mxu1 %v7880_v4  ;;  %9108 = vst [vmem:[#allocation99_spill] sm:$0xff] %v8256_v21  ;;  %5356 = vmatprep.mubr.f32.mxu1 %v3755_v26  ;;  %v2933_v30 = vmul.f32 %v9109_v17, %v8251_v62  ;;  %v3054_v35 = vsub.f32 %v9110_v44, %v3046_v13  ;;  %v8272_v56 = vpop.f32.mrb[59].mxu1  ;;  %v9115_v26 = vld [vmem:[#allocation39_spill] sm:$0xff] }
 0x48e   : > { %v8262_v51 = vmul.f32 %v3055_v47, %v8204_v40  ;;  %v2921_v7 = vmul.f32 %v8256_v21, %v8095_v57  ;;  %v8268_v32 = vmul.f32 %v8256_v21, %v9112_v54  ;;  %v3049_v60 = vmul.f32 %v8256_v21, %v8184_v3  ;;  %9114 = vst [vmem:[#allocation100_spill] sm:$0xff] %v8272_v56  ;;  %v9116_v47 = vld [vmem:[#allocation50_spill] sm:$0xff]  ;;  %v9119_v21 = vld [vmem:[#allocation68_spill] sm:$0xff] }
 0x48f   : > { %5997 = vmatprep.subr.bf16.mxu1 %v9115_v26  ;;  %v2920_v13 = vmul.f32 %v8076_v36, %v8272_v56  ;;  %v8279_v44 = vmul.f32 %v9116_v47, %v8272_v56  ;;  %v3048_v17 = vmul.f32 %v8187_v43, %v8272_v56  ;;  %v8287_v4 = vmul.f32 %v3054_v35, %v8191_v59  ;;  %v9123_v56 = vld [vmem:[#allocation72_spill] sm:$0xff] }
 0x490   : > { %9111 = vst [vmem:[#allocation46_spill] sm:$0xff] %v8262_v51  ;;  %9113 = vst [vmem:[#allocation47_spill] sm:$0xff] %v8268_v32  ;;  %v8284_v51 = vld [vmem:[%s7210_s6 + $0x70] sm:$0xff]  ;;  %v8291_v32 = vadd.f32 %v9119_v21, %v8099_v41  ;;  %v8293_v19 = vadd.f32 %v2929_v18, %v2921_v7  ;;  %v3057_v46 = vsub.f32 %v3041_v12, %v3049_v60  ;;  %v8308_v21 = vpop.f32.mrb[60].mxu1 }
 0x491   : > { %9117 = vst [vmem:[#allocation50_spill] sm:$0xff] %v8279_v44  ;;  %9118 = vst [vmem:[#allocation101_spill] sm:$0xff] %v8287_v4  ;;  %v2932_v31 = vmul.f32 %v8284_v51, %v9121_v48  ;;  %v9122_v44 = vld [vmem:[#allocation71_spill] sm:$0xff]  ;;  %v8303_v20 = vadd.f32 %v9123_v56, %v8099_v41  ;;  %v8305_v35 = vadd.f32 %v2928_v1, %v2920_v13  ;;  %5999 = vmatpush3.bf16.msra.mxu1 %v9115_v26  ;;  %v9125_v48 = vld [vmem:[#allocation53_spill] sm:$0xff] }
 0x492   : > { %9120 = vst [vmem:[#allocation68_spill] sm:$0xff] %v8291_v32  ;;  %v8299_v50 = vadd.f32 %v9122_v44, %v8099_v41  ;;  %9124 = vst [vmem:[#allocation71_spill] sm:$0xff] %v8308_v21  ;;  %v3056_v18 = vsub.f32 %v3040_v39, %v3048_v17  ;;  %v2923_v7 = vmul.f32 %v8308_v21, %v7983_v38  ;;  %v8318_v44 = vpop.f32.mrb[61].mxu1  ;;  %v9128_v56 = vld [vmem:[#allocation40_spill] sm:$0xff]  ;;  %v9130_v17 = vld [vmem:[#allocation58_spill] sm:$0xff] }
 0x493   : > { %v8314_v12 = vmul.f32 %v8308_v21, %v9125_v48  ;;  %v3051_v60 = vmul.f32 %v8308_v21, %v8200_v23  ;;  %9127 = vst [vmem:[#allocation53_spill] sm:$0xff] %v8318_v44  ;;  %6001 = vmatprep.subr.bf16.mxu1 %v9128_v56  ;;  %v8322_v1 = vmul.f32 %v3057_v46, %v8291_v32  ;;  %v9133_v21 = vld [vmem:[#allocation73_spill] sm:$0xff]  ;;  %v9134_v46 = vld [vmem:[#allocation74_spill] sm:$0xff] }
 0x494   : > { %v2922_v39 = vmul.f32 %v7991_v55, %v8318_v44  ;;  %v8328_v13 = vmul.f32 %v9130_v17, %v8318_v44  ;;  %v3050_v4 = vmul.f32 %v8239_v2, %v8318_v44  ;;  %v8333_v26 = vmul.f32 %v3056_v18, %v8243_v15  ;;  %v9135_v55 = vld [vmem:[#allocation57_spill] sm:$0xff]  ;;  %v9136_v17 = vld [vmem:[#allocation76_spill] sm:$0xff]  ;;  %v8351_v18 = vpop.f32.mrb[62].mxu1 }
 0x495   : > { %9126 = vst [vmem:[#allocation72_spill] sm:$0xff] %v8314_v12  ;;  %9129 = vst [vmem:[#allocation102_spill] sm:$0xff] %v8322_v1  ;;  %v8337_v12 = vadd.f32 %v9133_v21, %v8099_v41  ;;  %v8341_v1 = vadd.f32 %v9134_v46, %v8099_v41  ;;  %v8343_v32 = vadd.f32 %v2931_v58, %v2923_v7  ;;  %6003 = vmatpush3.bf16.msra.mxu1 %v9128_v56  ;;  %v9139_v44 = vld [vmem:[#allocation61_spill] sm:$0xff]  ;;  %v9140_v7 = vld [vmem:[#allocation62_spill] sm:$0xff] }
 0x496   : > { %9131 = vst [vmem:[#allocation103_spill] sm:$0xff] %v8328_v13  ;;  %9132 = vst [vmem:[#allocation104_spill] sm:$0xff] %v8333_v26  ;;  %v3059_v6 = vsub.f32 %v9135_v55, %v3051_v60  ;;  %v3756_v13 = vmul.f32 %v8151_v53, %v9136_v17  ;;  %v8348_v27 = vadd.f32 %v2930_v16, %v2922_v39  ;;  %v8366_v60 = vpop.f32.mrb[63].mxu1  ;;  %v9143_v39 = vld [vmem:[#allocation41_spill] sm:$0xff] }
 0x497   : > { %9137 = vst [vmem:[#allocation73_spill] sm:$0xff] %v8351_v18  ;;  %v8355_v21 = vmul.f32 %v8170_v11, %v8071_v8  ;;  %v3058_v41 = vsub.f32 %v9139_v44, %v3050_v4  ;;  %v2925_v58 = vmul.f32 %v8351_v18, %v8017_v63  ;;  %v8362_v55 = vmul.f32 %v8351_v18, %v9140_v7  ;;  %v9145_v8 = vld [vmem:[#allocation66_spill] sm:$0xff] }
 0x498   : > { %v3053_v16 = vmul.f32 %v8351_v18, %v8251_v62  ;;  %9142 = vst [vmem:[#allocation61_spill] sm:$0xff] %v8366_v60  ;;  %6005 = vmatprep.subr.bf16.mxu1 %v9143_v39  ;;  %v8370_v46 = vmul.f32 %v3059_v6, %v8303_v20  ;;  %v2924_v4 = vmul.f32 %v8025_v5, %v8366_v60 }
 0x499   : > { %9138 = vst [vmem:[#allocation74_spill] sm:$0xff] %v8355_v21  ;;  %9141 = vst [vmem:[#allocation57_spill] sm:$0xff] %v8362_v55  ;;  %v8376_v44 = vmul.f32 %v9145_v8, %v8366_v60  ;;  %v3052_v26 = vmul.f32 %v8284_v51, %v8366_v60  ;;  %v8381_v17 = vmul.f32 %v3058_v41, %v8299_v50  ;;  %6007 = vmatpush3.bf16.msra.mxu1 %v9143_v39 }
 0x49a   : > { %9144 = vst [vmem:[#allocation62_spill] sm:$0xff] %v8370_v46  ;;  %v8383_v18 = vadd.f32 %v2933_v30, %v2925_v58  ;;  %v3757_v56 = vmul.f32 %v8187_v43, %v8092_v33  ;;  %v3758_v6 = vmul.f32 %v8184_v3, %v8087_v25  ;;  %v9148_v46 = vld [vmem:[#allocation65_spill] sm:$0xff]  ;;  %v8390_v21 = vadd.f32 %v2932_v31, %v2924_v4  ;;  %v9150_v58 = vld [vmem:[#allocation70_spill] sm:$0xff] }
 0x49b   : > { %9146 = vst [vmem:[#allocation41_spill] sm:$0xff] %v8376_v44  ;;  %9147 = vst [vmem:[#allocation66_spill] sm:$0xff] %v8381_v17  ;;  %v3061_v55 = vsub.f32 %v9148_v46, %v3053_v16  ;;  %v8393_v44 = vpop.f32.mrb[64].mxu1  ;;  %v3759_v41 = vmul.f32 %v8239_v2, %v8131_v37  ;;  %v8399_v30 = vmul.f32 %v8200_v23, %v8117_v28  ;;  %v9151_v4 = vld [vmem:[#allocation42_spill] sm:$0xff] }
 0x49c   : > { %9149 = vst [vmem:[#allocation65_spill] sm:$0xff] %v8393_v44  ;;  %v3060_v60 = vsub.f32 %v9150_v58, %v3052_v26  ;;  %v2943_v17 = vmul.f32 %v8393_v44, %v7933_v14  ;;  %v2991_v31 = vmul.f32 %v8393_v44, %v8151_v53  ;;  %v3023_v16 = vmul.f32 %v8393_v44, %v7930_v10  ;;  %v8408_v46 = vpop.f32.mrb[65].mxu1  ;;  %v9154_v44 = vld [vmem:[#allocation44_spill] sm:$0xff] }
 0x49d   : > { %6009 = vmatprep.subr.bf16.mxu1 %v9151_v4  ;;  %v8412_v37 = vmul.f32 %v3061_v55, %v8341_v1  ;;  %v2942_v28 = vmul.f32 %v8170_v11, %v8408_v46  ;;  %v2990_v26 = vmul.f32 %v8167_v9, %v8408_v46  ;;  %v8420_v58 = vmul.f32 %v7940_v29, %v8408_v46  ;;  %v8433_v9 = vpop.f32.mrb[66].mxu1 }
 0x49e   : > { %v8423_v53 = vmul.f32 %v3060_v60, %v8337_v12  ;;  %v2951_v10 = vadd.f32 %v2943_v17, %v8245_v42  ;;  %v3007_v25 = vsub.f32 %v2991_v31, %v9154_v44  ;;  %v3031_v55 = vsub.f32 %v8219_v52, %v3023_v16  ;;  %6011 = vmatpush3.bf16.msra.mxu1 %v9151_v4 }
 0x49f   : > { %9152 = vst [vmem:[#allocation70_spill] sm:$0xff] %v8412_v37  ;;  %v8430_v37 = vmul.f32 %v8251_v62, %v8159_v45  ;;  %v2950_v29 = vadd.f32 %v2942_v28, %v8253_v49  ;;  %v8438_v11 = vmul.f32 %v8284_v51, %v8175_v24  ;;  %v3006_v42 = vsub.f32 %v2990_v26, %v8181_v0  ;;  %v8451_v28 = vpop.f32.mrb[67].mxu1 }
 0x4a0   : > { %9153 = vst [vmem:[#allocation42_spill] sm:$0xff] %v8423_v53  ;;  %v2959_v52 = vmul.f32 0.57735026, %v2951_v10  ;;  %v8444_v60 = vmul.f32 %v3007_v25, %v8204_v40  ;;  %v8447_v44 = vmul.f32 %v3031_v55, %v8204_v40  ;;  %v2945_v31 = vmul.f32 %v8433_v9, %v9112_v54  ;;  %9155 = vst [vmem:[#allocation44_spill] sm:$0xff] %v8451_v28 }
 0x4a1   : > { %6045 = vmatprep.subr.bf16.mxu1 %v7808_v34  ;;  %v2993_v0 = vmul.f32 %v8433_v9, %v8184_v3  ;;  %v8458_v49 = vmul.f32 %v8433_v9, %v8095_v57  ;;  %v2944_v25 = vmul.f32 %v9116_v47, %v8451_v28  ;;  %v2992_v40 = vmul.f32 %v8187_v43, %v8451_v28  ;;  %v8471_v57 = vpop.f32.mrb[68].mxu1  ;;  %v9157_v43 = vld [vmem:[#allocation52_spill] sm:$0xff] }
 0x4a2   : > { %v2967_v16 = vmul.f32 %v2959_v52, %v8123_v22  ;;  %v8467_v26 = vmul.f32 %v8076_v36, %v8451_v28  ;;  %5357 = vmatmul.mubr.f32.vlgmr.msra.gmra.mrb[88].mxu1 %v3756_v13  ;;  %v2958_v10 = vmul.f32 0.57735026, %v2950_v29  ;;  %v2953_v3 = vadd.f32 %v2945_v31, %v8293_v19  ;;  %9156 = vst [vmem:[#allocation105_spill] sm:$0xff] %v8471_v57 }
 0x4a3   : > { %5359 = vmatprep.mubr.f32.mxu1 %v3757_v56  ;;  %6047 = vmatpush3.bf16.msra.mxu1 %v7808_v34  ;;  %v2952_v55 = vadd.f32 %v2944_v25, %v8305_v35  ;;  %v8475_v17 = vmul.f32 %v3006_v42, %v8191_v59  ;;  %v3008_v22 = vsub.f32 %v2992_v40, %v9157_v43  ;;  %v8486_v34 = vpop.f32.mrb[69].mxu1  ;;  %v9159_v56 = vld [vmem:[#allocation84_spill] sm:$0xff]  ;;  %v9161_v42 = vld [vmem:[#allocation58_spill] sm:$0xff]  ;;  %v9162_v25 = vld [vmem:[#allocation55_spill] sm:$0xff] }
 0x4a4   : > { %v2947_v36 = vmul.f32 %v8471_v57, %v9125_v48  ;;  %v2995_v13 = vmul.f32 %v8471_v57, %v8200_v23  ;;  %v8484_v19 = vmul.f32 %v8471_v57, %v7983_v38  ;;  %9158 = vst [vmem:[#allocation52_spill] sm:$0xff] %v8486_v34  ;;  %v2966_v29 = vmul.f32 %v2958_v10, %v9159_v56  ;;  %v9160_v35 = vld [vmem:[#allocation36_spill] sm:$0xff]  ;;  %v9163_v56 = vld [vmem:[#allocation49_spill] sm:$0xff]  ;;  %v8503_v57 = vpop.f32.mrb[70].mxu1 }
 0x4a5   : > { %6049 = vmatprep.subr.bf16.mxu1 %v9160_v35  ;;  %v2946_v52 = vmul.f32 %v9161_v42, %v8486_v34  ;;  %v2994_v31 = vmul.f32 %v8239_v2, %v8486_v34  ;;  %v8496_v40 = vmul.f32 %v9162_v25, %v8486_v34  ;;  %v2960_v23 = vmul.f32 0.57735026, %v2952_v55  ;;  %v9164_v2 = vld [vmem:[#allocation87_spill] sm:$0xff]  ;;  %v9165_v34 = vld [vmem:[#allocation60_spill] sm:$0xff] }
 0x4a6   : > { %5136 = vmatprep.mubr.f32.mxu0 %v2966_v29  ;;  %5360 = vmatmul.mubr.f32.gmra.mrb[90].mxu1 %v3758_v6  ;;  %v2961_v38 = vmul.f32 0.57735026, %v2953_v3  ;;  %v2955_v43 = vadd.f32 %v2947_v36, %v8343_v32  ;;  %v8500_v10 = vmul.f32 %v3008_v22, %v8243_v15  ;;  %v3009_v53 = vsub.f32 %v2993_v0, %v9163_v56  ;;  %v9166_v29 = vld [vmem:[#allocation35_spill] sm:$0xff]  ;;  %v8516_v0 = vpop.f32.mrb[71].mxu1  ;;  %v9167_v36 = vld [vmem:[#allocation81_spill] sm:$0xff] }
 0x4a7   : > { %5137 = vmatmul.mubr.f32.vlgmr.msra.gmra.mrb[56].mxu0 %v2967_v16  ;;  %5362 = vmatprep.mubr.f32.mxu1 %v3759_v41  ;;  %v2968_v28 = vmul.f32 %v2960_v23, %v9164_v2  ;;  %v2954_v25 = vadd.f32 %v2946_v52, %v8348_v27  ;;  %v3010_v55 = vsub.f32 %v2994_v31, %v9165_v34  ;;  %v9170_v52 = vld [vmem:[#allocation92_spill] sm:$0xff] }
 0x4a8   : > { %5855 = vmatpush3.bf16.msra.mxu0 %v9166_v29  ;;  %6051 = vmatpush3.bf16.msra.mxu1 %v9160_v35  ;;  %v2949_v32 = vmul.f32 %v8503_v57, %v9140_v7  ;;  %v2997_v6 = vmul.f32 %v8503_v57, %v8251_v62  ;;  %v3029_v41 = vmul.f32 %v8503_v57, %v8017_v63  ;;  %v2963_v16 = vmul.f32 0.57735026, %v2955_v43  ;;  %v9168_v62 = vld [vmem:[#allocation37_spill] sm:$0xff]  ;;  %v9169_v63 = vld [vmem:[#allocation90_spill] sm:$0xff] }
 0x4a9   : > { %v2948_v27 = vmul.f32 %v9145_v8, %v8516_v0  ;;  %v2996_v3 = vmul.f32 %v8284_v51, %v8516_v0  ;;  %v3028_v22 = vmul.f32 %v8025_v5, %v8516_v0  ;;  %5139 = vmatprep.mubr.f32.mxu0 %v2968_v28  ;;  %5857 = vmatprep.subr.bf16.mxu0 %v9167_v36  ;;  %v2962_v34 = vmul.f32 0.57735026, %v2954_v25  ;;  %v9171_v51 = vld [vmem:[#allocation91_spill] sm:$0xff]  ;;  %v9172_v28 = vld [vmem:[#allocation68_spill] sm:$0xff]  ;;  %v9174_v29 = vld [vmem:[#allocation69_spill] sm:$0xff] }
 0x4aa   : > { %5363 = vmatmul.mubr.f32.gmra.mrb[92].mxu1 %v8399_v30  ;;  %6053 = vmatprep.subr.bf16.mxu1 %v9168_v62  ;;  %v2969_v35 = vmul.f32 %v2961_v38, %v9169_v63  ;;  %v2971_v31 = vmul.f32 %v2963_v16, %v9170_v52  ;;  %v2957_v23 = vadd.f32 %v2949_v32, %v8383_v18  ;;  %v9173_v38 = vld [vmem:[#allocation56_spill] sm:$0xff]  ;;  %v9177_v16 = vld [vmem:[#allocation50_spill] sm:$0xff] }
 0x4ab   : > { %5365 = vmatprep.mubr.f32.mxu1 %v8438_v11  ;;  %v2970_v43 = vmul.f32 %v2962_v34, %v9171_v51  ;;  %v2956_v5 = vadd.f32 %v2948_v27, %v8390_v21  ;;  %v8534_v56 = vmul.f32 %v3009_v53, %v9172_v28  ;;  %v8537_v2 = vmul.f32 %v3010_v55, %v8299_v50  ;;  %v9175_v32 = vld [vmem:[#allocation64_spill] sm:$0xff]  ;;  %v9178_v34 = vld [vmem:[#allocation47_spill] sm:$0xff] }
 0x4ac   : > { %5140 = vmatmul.mubr.f32.gmra.mrb[58].mxu0 %v2969_v35  ;;  %6055 = vmatpush3.bf16.msra.mxu1 %v9168_v62  ;;  %v2965_v30 = vmul.f32 0.57735026, %v2957_v23  ;;  %v3011_v25 = vsub.f32 %v2995_v13, %v9173_v38  ;;  %v3012_v18 = vsub.f32 %v2996_v3, %v9174_v29  ;;  %v3013_v11 = vsub.f32 %v2997_v6, %v9175_v32  ;;  %v9179_v62 = vld [vmem:[#allocation82_spill] sm:$0xff]  ;;  %v3070_v35 = vld [vmem:[#allocation12 + $0x40] sm:$0xff]  ;;  %v9186_v38 = vld [vmem:[#allocation41_spill] sm:$0xff] }
 0x4ad   : > { %5859 = vmatpush3.bf16.msra.mxu0 %v9167_v36  ;;  %5142 = vmatprep.mubr.f32.mxu0 %v2970_v43  ;;  %v2964_v21 = vmul.f32 0.57735026, %v2956_v5  ;;  %v9176_v53 = vsub.f32 %v8232_v61, %v8420_v58  ;;  %v3032_v27 = vsub.f32 %v9177_v16, %v8467_v26  ;;  %v3033_v13 = vsub.f32 %v9178_v34, %v8458_v49  ;;  %v9180_v6 = vld [vmem:[#allocation94_spill] sm:$0xff]  ;;  %v9183_v58 = vld [vmem:[#allocation93_spill] sm:$0xff]  ;;  %v3071_v49 = vld [vmem:[#allocation12 + $0x48] sm:$0xff] }
 0x4ae   : > { %5861 = vmatprep.subr.bf16.mxu0 %v9179_v62  ;;  %5366 = vmatmul.mubr.f32.gmra.mrb[94].mxu1 %v8430_v37  ;;  %v2973_v3 = vmul.f32 %v2965_v30, %v9180_v6  ;;  %v8558_v36 = vmul.f32 %v3011_v25, %v8303_v20  ;;  %v8561_v63 = vmul.f32 %v3012_v18, %v8337_v12  ;;  %v9181_v61 = vld [vmem:[#allocation38_spill] sm:$0xff]  ;;  %v9184_v51 = vld [vmem:[#allocation103_spill] sm:$0xff]  ;;  %v9185_v5 = vld [vmem:[#allocation72_spill] sm:$0xff] }
 0x4af   : > { %v8548_v55 = vmul.f32 %v9176_v53, %v8191_v59  ;;  %6057 = vmatprep.subr.bf16.mxu1 %v9181_v61  ;;  %v9182_v59 = vld [vmem:[#allocation74_spill] sm:$0xff]  ;;  %v2972_v26 = vmul.f32 %v2964_v21, %v9183_v58  ;;  %v8567_v52 = vmul.f32 %v3013_v11, %v8341_v1  ;;  %v8570_v37 = vmul.f32 %v3032_v27, %v8243_v15  ;;  %v9187_v29 = vld [vmem:[#allocation57_spill] sm:$0xff]  ;;  %v9188_v18 = vld [vmem:[#allocation83_spill] sm:$0xff] }
 0x4b0   : > { %5444 = vmatprep.mubr.f32.mxu1 %v9182_v59  ;;  %5143 = vmatmul.mubr.f32.gmra.mrb[60].mxu0 %v2971_v31  ;;  %v8574_v23 = vmul.f32 %v3033_v13, %v9172_v28  ;;  %v3034_v43 = vsub.f32 %v9184_v51, %v8496_v40  ;;  %v3035_v30 = vsub.f32 %v9185_v5, %v8484_v19  ;;  %v9189_v31 = vld [vmem:[#allocation39_spill] sm:$0xff]  ;;  %v3072_v11 = vld [vmem:[#allocation12 + $0x50] sm:$0xff]  ;;  %v3073_v19 = vld [vmem:[#allocation12 + $0x58] sm:$0xff] }
 0x4b1   : > { %6059 = vmatpush3.bf16.msra.mxu1 %v9181_v61  ;;  %5863 = vmatpush3.bf16.msra.mxu0 %v9179_v62  ;;  %v3036_v25 = vsub.f32 %v9186_v38, %v3028_v22  ;;  %v3037_v15 = vsub.f32 %v9187_v29, %v3029_v41  ;;  %v5868_v32 = vpack.c.bf16 %v3071_v49, %v3070_v35  ;;  %v9190_v41 = vld [vmem:[#allocation77_spill] sm:$0xff]  ;;  %v3074_v53 = vld [vmem:[#allocation12 + $0x60] sm:$0xff]  ;;  %v3075_v16 = vld [vmem:[#allocation12 + $0x68] sm:$0xff] }
 0x4b2   : > { %5145 = vmatprep.mubr.f32.mxu0 %v2972_v26  ;;  %5865 = vmatprep.subr.bf16.mxu0 %v9188_v18  ;;  %v8586_v28 = vmul.f32 %v3034_v43, %v8299_v50  ;;  %v8589_v40 = vmul.f32 %v3035_v30, %v8303_v20  ;;  %v9191_v50 = vld [vmem:[#allocation40_spill] sm:$0xff]  ;;  %v5872_v20 = vpack.c.bf16 %v3073_v19, %v3072_v11  ;;  %v3077_v27 = vld [vmem:[#allocation12 + $0x78] sm:$0xff]  ;;  %v3601_v13 = vld [vmem:[#allocation18] sm:$0xff] }
 0x4b3   : > { %6061 = vmatprep.subr.bf16.mxu1 %v9189_v31  ;;  %v8592_v21 = vmul.f32 %v3036_v25, %v8337_v12  ;;  %v8595_v22 = vmul.f32 %v3037_v15, %v8341_v1  ;;  %v5876_v12 = vpack.c.bf16 %v3075_v16, %v3074_v53  ;;  %v3076_v1 = vld [vmem:[#allocation12 + $0x70] sm:$0xff]  ;;  %v3602_v62 = vld [vmem:[#allocation18 + $0x8] sm:$0xff]  ;;  %v4056_v61 = vmul.f32 %v9116_v47, %v8092_v33  ;;  %v3604_v58 = vld [vmem:[#allocation18 + $0x18] sm:$0xff] }
 0x4b4   : > { %5146 = vmatmul.mubr.f32.gmra.mrb[62].mxu0 %v2973_v3  ;;  %v5880_v34 = vpack.c.bf16 %v3077_v27, %v3076_v1  ;;  %v9192_v6 = vld [vmem:[#allocation76_spill] sm:$0xff]  ;;  %v8610_v59 = vpack.c.bf16 %v3602_v62, %v3601_v13  ;;  %v9193_v26 = vld [vmem:[#allocation79_spill] sm:$0xff]  ;;  %v9197_v5 = vld [vmem:[#allocation86_spill] sm:$0xff] }
 0x4b5   : > { %6063 = vmatpush3.bf16.msra.mxu1 %v9189_v31  ;;  %5867 = vmatpush3.bf16.msra.mxu0 %v9188_v18  ;;  %v4055_v3 = vmul.f32 %v7933_v14, %v9192_v6  ;;  %v4057_v35 = vmul.f32 %v9112_v54, %v9193_v26  ;;  %v3605_v51 = vld [vmem:[#allocation18 + $0x20] sm:$0xff]  ;;  %v3606_v33 = vld [vmem:[#allocation18 + $0x28] sm:$0xff]  ;;  %v4059_v54 = vmul.f32 %v9125_v48, %v9197_v5  ;;  %v3607_v38 = vld [vmem:[#allocation18 + $0x30] sm:$0xff] }
 0x4b6   : > { %5180 = vmatprep.mubr.f32.mxu0 %v9190_v41  ;;  %5869 = vmatprep.subr.bf16.mxu0 %v5868_v32  ;;  %v9195_v47 = vld [vmem:[#allocation75_spill] sm:$0xff]  ;;  %v9196_v43 = vld [vmem:[#allocation80_spill] sm:$0xff]  ;;  %v8627_v30 = vpack.c.bf16 %v3606_v33, %v3605_v51  ;;  %v3608_v25 = vld [vmem:[#allocation18 + $0x38] sm:$0xff]  ;;  %v4061_v48 = vmul.f32 %v9140_v7, %v8159_v45 }
 0x4b7   : > { %6065 = vmatprep.subr.bf16.mxu1 %v9191_v50  ;;  %v9198_v29 = vld [vmem:[#allocation78_spill] sm:$0xff]  ;;  %v9199_v15 = vld [vmem:[#allocation88_spill] sm:$0xff]  ;;  %v8635_v18 = vpack.c.bf16 %v3608_v25, %v3607_v38  ;;  %v9200_v31 = vld [vmem:[#allocation85_spill] sm:$0xff] }
 0x4b8   : > { %v3611_v19 = vld [vmem:[#allocation18 + $0x50] sm:$0xff]  ;;  %v3612_v41 = vld [vmem:[#allocation18 + $0x58] sm:$0xff]  ;;  %v3613_v7 = vld [vmem:[#allocation18 + $0x60] sm:$0xff] }
 0x4b9   : > { %6067 = vmatpush3.bf16.msra.mxu1 %v9191_v50  ;;  %5871 = vmatpush3.bf16.msra.mxu0 %v5868_v32  ;;  %v9201_v32 = vld [vmem:[#allocation96_spill] sm:$0xff]  ;;  %v9202_v50 = vld [vmem:[#allocation95_spill] sm:$0xff]  ;;  %v8644_v45 = vpack.c.bf16 %v3612_v41, %v3611_v19  ;;  %v3615_v16 = vld [vmem:[#allocation18 + $0x70] sm:$0xff] }
 0x4ba   : > { %6069 = vmatprep.subr.bf16.mxu1 %v9143_v39  ;;  %5873 = vmatprep.subr.bf16.mxu0 %v5872_v20  ;;  %v9209_v27 = vld [vmem:[#allocation99_spill] sm:$0xff]  ;;  %v9210_v13 = vld [vmem:[#allocation48_spill] sm:$0xff]  ;;  %v9214_v26 = vld [vmem:[#allocation46_spill] sm:$0xff] }
 0x4bb   : > { %v9217_v51 = vld [vmem:[#allocation54_spill] sm:$0xff]  ;;  %v9219_v5 = vld [vmem:[#allocation53_spill] sm:$0xff]  ;;  %v9221_v38 = vld [vmem:[#allocation52_spill] sm:$0xff] }
 0x4bd   : > { %6071 = vmatpush3.bf16.msra.mxu1 %v9143_v39  ;;  %5875 = vmatpush3.bf16.msra.mxu0 %v5872_v20  ;;  %v3603_v39 = vld [vmem:[#allocation18 + $0x10] sm:$0xff]  ;;  %v3614_v20 = vld [vmem:[#allocation18 + $0x68] sm:$0xff] }
 0x4be   : > { %6073 = vmatprep.subr.bf16.mxu1 %v9151_v4  ;;  %5877 = vmatprep.subr.bf16.mxu0 %v5876_v12  ;;  %v8617_v49 = vpack.c.bf16 %v3604_v58, %v3603_v39  ;;  %v5972_v53 = vpack.c.bf16 %v3614_v20, %v3613_v7  ;;  %v9213_v39 = vld [vmem:[#allocation44_spill] sm:$0xff]  ;;  %v9229_v7 = vld [vmem:[#allocation67_spill] sm:$0xff] }
 0x4c1   : > { %6075 = vmatpush3.bf16.msra.mxu1 %v9151_v4  ;;  %5879 = vmatpush3.bf16.msra.mxu0 %v5876_v12  ;;  %v9194_v4 = vld [vmem:[#allocation89_spill] sm:$0xff]  ;;  %v3616_v12 = vld [vmem:[#allocation18 + $0x78] sm:$0xff] }
 0x4c2   : > { %5881 = vmatprep.subr.bf16.mxu0 %v5880_v34  ;;  %v4058_v14 = vmul.f32 %v9161_v42, %v9194_v4  ;;  %v4060_v42 = vmul.f32 %v9145_v8, %v8175_v24  ;;  %v3609_v24 = vld [vmem:[#allocation18 + $0x40] sm:$0xff]  ;;  %v3610_v8 = vld [vmem:[#allocation18 + $0x48] sm:$0xff]  ;;  %v8648_v1 = vpack.c.bf16 %v3616_v12, %v3615_v16  ;;  %v9230_v16 = vld [vmem:[#allocation70_spill] sm:$0xff] }
 0x4c3   : > { %v5964_v11 = vpack.c.bf16 %v3610_v8, %v3609_v24  ;;  %v9215_v4 = vld [vmem:[#allocation104_spill] sm:$0xff]  ;;  %v9225_v24 = vld [vmem:[#allocation42_spill] sm:$0xff] }
 0x4c4   : > { %5445 = vmatmul.mubr.f32.vlgmr.msra.gmra.mrb[96].mxu1 %v4055_v3  ;;  %v9211_v3 = vld [vmem:[#allocation100_spill] sm:$0xff] }
 0x4c5   : > { %5447 = vmatprep.mubr.f32.mxu1 %v4056_v61  ;;  %5883 = vmatpush3.bf16.msra.mxu0 %v5880_v34 }
 0x4c6   : > { %5949 = vmatprep.subr.bf16.mxu0 %v8610_v59 }
 0x4c8   : > { %5448 = vmatmul.mubr.f32.gmra.mrb[98].mxu1 %v4057_v35  ;;  %5181 = vmatmul.mubr.f32.vlgmr.msra.gmra.mrb[56].mxu0 %v9195_v47  ;;  %v9218_v47 = vld [vmem:[#allocation105_spill] sm:$0xff] }
 0x4c9   : > { %5450 = vmatprep.mubr.f32.mxu1 %v4058_v14  ;;  %5183 = vmatprep.mubr.f32.mxu0 %v9196_v43 }
 0x4ca   : > { %5951 = vmatpush3.bf16.msra.mxu0 %v8610_v59 }
 0x4cb   : > { %5953 = vmatprep.subr.bf16.mxu0 %v8617_v49 }
 0x4cc   : > { %5451 = vmatmul.mubr.f32.gmra.mrb[100].mxu1 %v4059_v54  ;;  %5184 = vmatmul.mubr.f32.gmra.mrb[58].mxu0 %v9198_v29  ;;  %v9222_v29 = vld [vmem:[#allocation102_spill] sm:$0xff] }
 0x4cd   : > { %5453 = vmatprep.mubr.f32.mxu1 %v4060_v42  ;;  %5186 = vmatprep.mubr.f32.mxu0 %v9199_v15  ;;  %v9220_v42 = vld [vmem:[#allocation59_spill] sm:$0xff]  ;;  %v9223_v15 = vld [vmem:[#allocation66_spill] sm:$0xff] }
 0x4ce   : > { %5955 = vmatpush3.bf16.msra.mxu0 %v8617_v49 }
 0x4cf   : > { %5957 = vmatprep.subr.bf16.mxu0 %v8627_v30 }
 0x4d0   : > { %5454 = vmatmul.mubr.f32.gmra.mrb[102].mxu1 %v4061_v48  ;;  %5187 = vmatmul.mubr.f32.gmra.mrb[60].mxu0 %v9200_v31  ;;  %v9224_v48 = vld [vmem:[#allocation62_spill] sm:$0xff]  ;;  %v9226_v31 = vld [vmem:[#allocation73_spill] sm:$0xff] }
 0x4d1   : > { %5189 = vmatprep.mubr.f32.mxu0 %v9201_v32 }
 0x4d2   : > { %5959 = vmatpush3.bf16.msra.mxu0 %v8627_v30 }
 0x4d3   : > { %5961 = vmatprep.subr.bf16.mxu0 %v8635_v18 }
 0x4d4   : > { %5190 = vmatmul.mubr.f32.gmra.mrb[62].mxu0 %v9202_v50  ;;  %v9228_v50 = vld [vmem:[#allocation61_spill] sm:$0xff] }
 0x4d5   : > { %5312 = vmatprep.mubr.f32.mxu0 %v8475_v17  ;;  %v9203_v17 = vld [vmem:[#allocation101_spill] sm:$0xff] }
 0x4d6   : > { %5963 = vmatpush3.bf16.msra.mxu0 %v8635_v18 }
 0x4d7   : > { %5965 = vmatprep.subr.bf16.mxu0 %v5964_v11 }
 0x4da   : > { %5967 = vmatpush3.bf16.msra.mxu0 %v5964_v11 }
 0x4db   : > { %5969 = vmatprep.subr.bf16.mxu0 %v8644_v45 }
 0x4de   : > { %5971 = vmatpush3.bf16.msra.mxu0 %v8644_v45 }
 0x4df   : > { %5973 = vmatprep.subr.bf16.mxu0 %v5972_v53 }
 0x4e2   : > { %5975 = vmatpush3.bf16.msra.mxu0 %v5972_v53 }
 0x4e3   : > { %5977 = vmatprep.subr.bf16.mxu0 %v8648_v1 }
 0x4e6   : > { %5979 = vmatpush3.bf16.msra.mxu0 %v8648_v1 }
 0x4e7   : > { %6013 = vmatprep.subr.bf16.mxu0 %v8610_v59 }
 0x4e9   : > { %5313 = vmatmul.mubr.f32.vlgmr.msra.gmra.mrb[64].mxu0 %v8444_v60 }
 0x4ea   : > { %5315 = vmatprep.mubr.f32.mxu0 %v8500_v10  ;;  %6015 = vmatpush3.bf16.msra.mxu0 %v8610_v59  ;;  %v9204_v10 = vld [vmem:[#allocation97_spill] sm:$0xff] }
 0x4eb   : > { %6017 = vmatprep.subr.bf16.mxu0 %v8617_v49 }
 0x4ed   : > { %5316 = vmatmul.mubr.f32.gmra.mrb[66].mxu0 %v8534_v56 }
 0x4ee   : > { %5318 = vmatprep.mubr.f32.mxu0 %v8537_v2  ;;  %6019 = vmatpush3.bf16.msra.mxu0 %v8617_v49  ;;  %v9205_v2 = vld [vmem:[#allocation43_spill] sm:$0xff] }
 0x4ef   : > { %6021 = vmatprep.subr.bf16.mxu0 %v8627_v30 }
 0x4f1   : > { %5319 = vmatmul.mubr.f32.gmra.mrb[68].mxu0 %v8558_v36  ;;  %v9206_v36 = vld [vmem:[#allocation65_spill] sm:$0xff] }
 0x4f2   : > { %5321 = vmatprep.mubr.f32.mxu0 %v8561_v63  ;;  %6023 = vmatpush3.bf16.msra.mxu0 %v8627_v30 }
 0x4f3   : > { %6025 = vmatprep.subr.bf16.mxu0 %v8635_v18 }
 0x4f5   : > { %5322 = vmatmul.mubr.f32.gmra.mrb[70].mxu0 %v8567_v52  ;;  %v9207_v52 = vld [vmem:[#allocation98_spill] sm:$0xff] }
 0x4f6   : > { %6027 = vmatpush3.bf16.msra.mxu0 %v8635_v18  ;;  %5400 = vmatprep.mubr.f32.mxu0 %v8548_v55 }
 0x4f7   : > { %6029 = vmatprep.subr.bf16.mxu0 %v5964_v11 }
 0x4fa   : > { %6031 = vmatpush3.bf16.msra.mxu0 %v5964_v11 }
 0x4fb   : > { %6033 = vmatprep.subr.bf16.mxu0 %v8644_v45 }
 0x4fe   : > { %6035 = vmatpush3.bf16.msra.mxu0 %v8644_v45 }
 0x4ff   : > { %6037 = vmatprep.subr.bf16.mxu0 %v5972_v53 }
 0x502   : > { %6039 = vmatpush3.bf16.msra.mxu0 %v5972_v53 }
 0x503   : > { %6041 = vmatprep.subr.bf16.mxu0 %v8648_v1 }
 0x506   : > { %6043 = vmatpush3.bf16.msra.mxu0 %v8648_v1 }
 0x507   : > { %6077 = vmatprep.subr.bf16.mxu0 %v8610_v59 }
 0x509   : > { %5401 = vmatmul.mubr.f32.vlgmr.msra.gmra.mrb[72].mxu0 %v8447_v44 }
 0x50a   : > { %5403 = vmatprep.mubr.f32.mxu0 %v8570_v37  ;;  %6079 = vmatpush3.bf16.msra.mxu0 %v8610_v59  ;;  %v9212_v59 = vld [vmem:[#allocation51_spill] sm:$0xff] }
 0x50b   : > { %6081 = vmatprep.subr.bf16.mxu0 %v8617_v49 }
 0x50d   : > { %5404 = vmatmul.mubr.f32.gmra.mrb[74].mxu0 %v8574_v23  ;;  %v9208_v23 = vld [vmem:[#allocation45_spill] sm:$0xff] }
 0x50e   : > { %5406 = vmatprep.mubr.f32.mxu0 %v8586_v28  ;;  %6083 = vmatpush3.bf16.msra.mxu0 %v8617_v49  ;;  %v9216_v49 = vld [vmem:[#allocation71_spill] sm:$0xff] }
 0x50f   : > { %6085 = vmatprep.subr.bf16.mxu0 %v8627_v30 }
 0x511   : > { %5407 = vmatmul.mubr.f32.gmra.mrb[76].mxu0 %v8589_v40 }
 0x512   : > { %5409 = vmatprep.mubr.f32.mxu0 %v8592_v21  ;;  %6087 = vmatpush3.bf16.msra.mxu0 %v8627_v30 }
 0x513   : > { %6089 = vmatprep.subr.bf16.mxu0 %v8635_v18 }
 0x515   : > { %5410 = vmatmul.mubr.f32.gmra.mrb[78].mxu0 %v8595_v22  ;;  %v5226_v60 = vpop.f32.mrb[72].mxu1 }
 0x516   : > { %6091 = vmatpush3.bf16.msra.mxu0 %v8635_v18  ;;  %5488 = vmatprep.mubr.f32.mxu0 %v9203_v17  ;;  %v3409_v44 = vpop.f32.mrb[73].mxu1  ;;  %v3449_v56 = vmul.f32 %v5226_v60, %v9204_v10  ;;  %v3748_v55 = vmul.f32 %v5226_v60, %v9205_v2  ;;  %v8691_v63 = vmul.f32 %v5226_v60, %v9206_v36 }
 0x517   : > { %6093 = vmatprep.subr.bf16.mxu0 %v5964_v11  ;;  %v3448_v37 = vmul.f32 %v3409_v44, %v9207_v52  ;;  %v3747_v28 = vmul.f32 %v3409_v44, %v9208_v23  ;;  %v8697_v40 = vmul.f32 %v3409_v44, %v8408_v46 }
 0x51a   : > { %6095 = vmatpush3.bf16.msra.mxu0 %v5964_v11  ;;  %v9227_v11 = vld [vmem:[#allocation63_spill] sm:$0xff] }
 0x51b   : > { %6097 = vmatprep.subr.bf16.mxu0 %v8644_v45 }
 0x51d   : > { %v5229_v21 = vpop.f32.mrb[74].mxu1 }
 0x51e   : > { %6099 = vmatpush3.bf16.msra.mxu0 %v8644_v45  ;;  %v3419_v22 = vpop.f32.mrb[75].mxu1  ;;  %v3451_v34 = vmul.f32 %v5229_v21, %v9209_v27  ;;  %v3750_v62 = vmul.f32 %v5229_v21, %v9210_v13  ;;  %v8703_v6 = vmul.f32 %v5229_v21, %v8433_v9 }
 0x51f   : > { %6101 = vmatprep.subr.bf16.mxu0 %v5972_v53  ;;  %v3450_v61 = vmul.f32 %v3419_v22, %v9211_v3  ;;  %v3749_v46 = vmul.f32 %v3419_v22, %v9212_v59  ;;  %v8709_v58 = vmul.f32 %v3419_v22, %v9213_v39 }
 0x522   : > { %6103 = vmatpush3.bf16.msra.mxu0 %v5972_v53 }
 0x523   : > { %6105 = vmatprep.subr.bf16.mxu0 %v8648_v1 }
 0x525   : > { %v5232_v35 = vpop.f32.mrb[76].mxu1 }
 0x526   : > { %6107 = vmatpush3.bf16.msra.mxu0 %v8648_v1  ;;  %v3429_v14 = vpop.f32.mrb[77].mxu1  ;;  %v3453_v9 = vmul.f32 %v5232_v35, %v9216_v49  ;;  %v3752_v33 = vmul.f32 %v5232_v35, %v9217_v51  ;;  %v8717_v43 = vmul.f32 %v5232_v35, %v9218_v47 }
 0x527   : > { %v3452_v54 = vmul.f32 %v3429_v14, %v9219_v5  ;;  %v3751_v30 = vmul.f32 %v3429_v14, %v9220_v42  ;;  %v8722_v25 = vmul.f32 %v3429_v14, %v9221_v38 }
 0x529   : > { %5489 = vmatmul.mubr.f32.vlgmr.msra.gmra.mrb[80].mxu0 %v9214_v26 }
 0x52a   : > { %5491 = vmatprep.mubr.f32.mxu0 %v9215_v4 }
 0x52d   : > { %5492 = vmatmul.mubr.f32.gmra.mrb[82].mxu0 %v9222_v29  ;;  %v5235_v18 = vpop.f32.mrb[78].mxu1 }
 0x52e   : > { %5494 = vmatprep.mubr.f32.mxu0 %v9223_v15  ;;  %v3439_v8 = vpop.f32.mrb[79].mxu1  ;;  %v3455_v32 = vmul.f32 %v5235_v18, %v9226_v31  ;;  %v3754_v19 = vmul.f32 %v5235_v18, %v9227_v11  ;;  %v8731_v41 = vmul.f32 %v5235_v18, %v8503_v57 }
 0x52f   : > { %v3454_v45 = vmul.f32 %v3439_v8, %v9228_v50  ;;  %v3753_v20 = vmul.f32 %v3439_v8, %v9229_v7  ;;  %v8736_v53 = vmul.f32 %v3439_v8, %v8516_v0 }
 0x531   : > { %5495 = vmatmul.mubr.f32.gmra.mrb[84].mxu0 %v9224_v48 }
 0x532   : > { %5497 = vmatprep.mubr.f32.mxu0 %v9225_v24 }
 0x535   : > { %5498 = vmatmul.mubr.f32.gmra.mrb[86].mxu0 %v9230_v16 }
 0x552   : > { %v5270_v12 = vpop.f32.mrb[80].mxu1 }
 0x553   : > { %v8739_v1 = vadd.f32 %v5270_v12, %v3449_v56  ;;  %v3546_v17 = vpop.f32.mrb[81].mxu1 }
 0x554   : > { %v8741_v60 = vadd.f32 %v3546_v17, %v3448_v37 }
 0x556   : > { %v5273_v44 = vpop.f32.mrb[82].mxu1 }
 0x557   : > { %v8743_v10 = vadd.f32 %v5273_v44, %v3451_v34  ;;  %v3556_v57 = vpop.f32.mrb[83].mxu1 }
 0x558   : > { %v8745_v2 = vadd.f32 %v3556_v57, %v3450_v61 }
 0x55a   : > { %v5276_v36 = vpop.f32.mrb[84].mxu1 }
 0x55b   : > { %v8747_v52 = vadd.f32 %v5276_v36, %v3453_v9  ;;  %v3566_v23 = vpop.f32.mrb[85].mxu1 }
 0x55c   : > { %v8749_v0 = vadd.f32 %v3566_v23, %v3452_v54 }
 0x55f   : > { %v5279_v21 = vpop.f32.mrb[86].mxu1 }
 0x560   : > { %v8751_v22 = vadd.f32 %v5279_v21, %v3455_v32  ;;  %v3576_v56 = vpop.f32.mrb[87].mxu1 }
 0x561   : > { %v8753_v27 = vadd.f32 %v3576_v56, %v3454_v45 }
 0x575   : > { %v5358_v37 = vpop.f32.mrb[88].mxu1 }
 0x576   : > { %v8755_v13 = vadd.f32 %v5358_v37, %v3748_v55  ;;  %v3845_v34 = vpop.f32.mrb[89].mxu1 }
 0x577   : > { %v8757_v3 = vadd.f32 %v3845_v34, %v3747_v28 }
 0x579   : > { %v5361_v61 = vpop.f32.mrb[90].mxu1 }
 0x57a   : > { %v8759_v59 = vadd.f32 %v5361_v61, %v3750_v62  ;;  %v3855_v39 = vpop.f32.mrb[91].mxu1 }
 0x57b   : > { %v8761_v26 = vadd.f32 %v3855_v39, %v3749_v46 }
 0x57d   : > { %v5364_v35 = vpop.f32.mrb[92].mxu1 }
 0x57e   : > { %v8763_v4 = vadd.f32 %v5364_v35, %v3752_v33  ;;  %v3865_v14 = vpop.f32.mrb[93].mxu1  ;;  %v4706_v33 = vld [vmem:[%s9231_s27] ss:$0 sm:$0xff] }
 0x57f   : > { %v8765_v49 = vadd.f32 %v3865_v14, %v3751_v30 }
 0x581   : > { %v5367_v9 = vpop.f32.mrb[94].mxu1 }
 0x582   : > { %v8767_v51 = vadd.f32 %v5367_v9, %v3754_v19  ;;  %v3875_v55 = vpop.f32.mrb[95].mxu1 }
 0x583   : > { %v8769_v47 = vadd.f32 %v3875_v55, %v3753_v20 }
 0x597   : > { %v5446_v28 = vpop.f32.mrb[96].mxu1 }
 0x598   : > { %v8772_v62 = vadd.f32 %v5446_v28, %v8691_v63  ;;  %v4144_v5 = vpop.f32.mrb[97].mxu1 }
 0x599   : > { %v8775_v46 = vadd.f32 %v4144_v5, %v8697_v40 }
 0x59b   : > { %v5449_v54 = vpop.f32.mrb[98].mxu1  ;;  %v5182_v42 = vpop.f32.mrb[56].mxu0 }
 0x59c   : > { %v8781_v30 = vadd.f32 %v5449_v54, %v8703_v6  ;;  %v4154_v38 = vpop.f32.mrb[99].mxu1  ;;  %v3312_v29 = vadd.f32 %v5182_v42, %v4706_v33  ;;  %v3265_v15 = vpop.f32.mrb[57].mxu0 }
 0x59d   : > { %v8784_v48 = vadd.f32 %v4154_v38, %v8709_v58  ;;  %v3311_v63 = vadd.f32 %v4706_v33, %v3265_v15 }
 0x59e   : > { %3320 = vst [vmem:[%s8788_s1 + $0x8] sm:$0xff] %v3312_v29 }
 0x59f   : > { %v5452_v40 = vpop.f32.mrb[100].mxu1  ;;  %3319 = vst [vmem:[%s8788_s1] sm:$0xff] %v3311_v63  ;;  %v5185_v18 = vpop.f32.mrb[58].mxu0 }
 0x5a0   : > { %v8793_v6 = vadd.f32 %v5452_v40, %v8717_v43  ;;  %v4164_v24 = vpop.f32.mrb[101].mxu1  ;;  %v3314_v58 = vadd.f32 %v5185_v18, %v4706_v33  ;;  %v3275_v8 = vpop.f32.mrb[59].mxu0 }
 0x5a1   : > { %v8796_v31 = vadd.f32 %v4164_v24, %v8722_v25  ;;  %v3313_v32 = vadd.f32 %v4706_v33, %v3275_v8 }
 0x5a2   : > { %3322 = vst [vmem:[%s8788_s1 + $0x18] sm:$0xff] %v3314_v58 }
 0x5a3   : > { %v5455_v11 = vpop.f32.mrb[102].mxu1  ;;  %3321 = vst [vmem:[%s8788_s1 + $0x10] sm:$0xff] %v3313_v32  ;;  %v5188_v19 = vpop.f32.mrb[60].mxu0 }
 0x5a4   : > { %v8801_v50 = vadd.f32 %v5455_v11, %v8731_v41  ;;  %v4174_v43 = vpop.f32.mrb[103].mxu1  ;;  %v3316_v45 = vadd.f32 %v5188_v19, %v4706_v33  ;;  %v3285_v7 = vpop.f32.mrb[61].mxu0 }
 0x5a5   : > { %v8804_v20 = vadd.f32 %v4174_v43, %v8736_v53  ;;  %v3315_v16 = vadd.f32 %v4706_v33, %v3285_v7 }
 0x5a6   : > { %3324 = vst [vmem:[%s8788_s1 + $0x28] sm:$0xff] %v3316_v45 }
 0x5a7   : > { %3323 = vst [vmem:[%s8788_s1 + $0x20] sm:$0xff] %v3315_v16  ;;  %v5191_v25 = vpop.f32.mrb[62].mxu0 }
 0x5a8   : > { %v3318_v12 = vadd.f32 %v5191_v25, %v4706_v33  ;;  %v3295_v17 = vpop.f32.mrb[63].mxu0 }
 0x5a9   : > { %v3317_v44 = vadd.f32 %v4706_v33, %v3295_v17 }
 0x5aa   : > { %3326 = vst [vmem:[%s8788_s1 + $0x38] sm:$0xff] %v3318_v12 }
 0x5ab   : > { %3325 = vst [vmem:[%s8788_s1 + $0x30] sm:$0xff] %v3317_v44 }
 0x5bc   : > { %v5314_v41 = vpop.f32.mrb[64].mxu0 }
 0x5bd   : > { %v3723_v57 = vmul.f32 0.70710677, %v5314_v41  ;;  %v3683_v36 = vpop.f32.mrb[65].mxu0 }
 0x5be   : > { %v3722_v23 = vmul.f32 0.70710677, %v3683_v36 }
 0x5bf   : > { %v3731_v53 = vadd.f32 %v3723_v57, %v8739_v1 }
 0x5c0   : > { %v3730_v21 = vadd.f32 %v3722_v23, %v8741_v60  ;;  %v5317_v56 = vpop.f32.mrb[66].mxu0 }
 0x5c1   : > { %4708 = vst [vmem:[%s8788_s1 + $0x48] sm:$0xff] %v3731_v53  ;;  %v3725_v37 = vmul.f32 0.70710677, %v5317_v56  ;;  %v3693_v34 = vpop.f32.mrb[67].mxu0 }
 0x5c2   : > { %4707 = vst [vmem:[%s8788_s1 + $0x40] sm:$0xff] %v3730_v21  ;;  %v3724_v61 = vmul.f32 0.70710677, %v3693_v34 }
 0x5c3   : > { %v3733_v39 = vadd.f32 %v3725_v37, %v8743_v10 }
 0x5c4   : > { %v3732_v35 = vadd.f32 %v3724_v61, %v8745_v2  ;;  %v5320_v14 = vpop.f32.mrb[68].mxu0 }
 0x5c5   : > { %4710 = vst [vmem:[%s8788_s1 + $0x58] sm:$0xff] %v3733_v39  ;;  %v3727_v9 = vmul.f32 0.70710677, %v5320_v14  ;;  %v3703_v1 = vpop.f32.mrb[69].mxu0 }
 0x5c6   : > { %4709 = vst [vmem:[%s8788_s1 + $0x50] sm:$0xff] %v3732_v35  ;;  %v3726_v60 = vmul.f32 0.70710677, %v3703_v1 }
 0x5c7   : > { %v3735_v55 = vadd.f32 %v3727_v9, %v8747_v52 }
 0x5c8   : > { %v3734_v28 = vadd.f32 %v3726_v60, %v8749_v0  ;;  %v5323_v5 = vpop.f32.mrb[70].mxu0 }
 0x5c9   : > { %4712 = vst [vmem:[%s8788_s1 + $0x68] sm:$0xff] %v3735_v55  ;;  %v3729_v33 = vmul.f32 0.70710677, %v5323_v5  ;;  %v3713_v54 = vpop.f32.mrb[71].mxu0 }
 0x5ca   : > { %4711 = vst [vmem:[%s8788_s1 + $0x60] sm:$0xff] %v3734_v28  ;;  %v3728_v10 = vmul.f32 0.70710677, %v3713_v54 }
 0x5cb   : > { %v3737_v2 = vadd.f32 %v3729_v33, %v8751_v22 }
 0x5cc   : > { %v3736_v42 = vadd.f32 %v3728_v10, %v8753_v27 }
 0x5cd   : > { %4714 = vst [vmem:[%s8788_s1 + $0x78] sm:$0xff] %v3737_v2 }
 0x5ce   : > { %4713 = vst [vmem:[%s8788_s1 + $0x70] sm:$0xff] %v3736_v42 }
 0x5dc   : > { %v5402_v38 = vpop.f32.mrb[72].mxu0 }
 0x5dd   : > { %v4022_v29 = vmul.f32 0.70710677, %v5402_v38  ;;  %v3982_v52 = vpop.f32.mrb[73].mxu0 }
 0x5de   : > { %v4021_v0 = vmul.f32 0.70710677, %v3982_v52 }
 0x5df   : > { %v4030_v15 = vadd.f32 %v4022_v29, %v8755_v13 }
 0x5e0   : > { %v4029_v63 = vadd.f32 %v4021_v0, %v8757_v3  ;;  %v5405_v40 = vpop.f32.mrb[74].mxu0 }
 0x5e1   : > { %4716 = vst [vmem:[%s8788_s1 + $0x88] sm:$0xff] %v4030_v15  ;;  %v4024_v18 = vmul.f32 0.70710677, %v5405_v40  ;;  %v3992_v24 = vpop.f32.mrb[75].mxu0 }
 0x5e2   : > { %4715 = vst [vmem:[%s8788_s1 + $0x80] sm:$0xff] %v4029_v63  ;;  %v4023_v22 = vmul.f32 0.70710677, %v3992_v24 }
 0x5e3   : > { %v4032_v27 = vadd.f32 %v4024_v18, %v8759_v59 }
 0x5e4   : > { %v4031_v58 = vadd.f32 %v4023_v22, %v8761_v26  ;;  %v5408_v8 = vpop.f32.mrb[76].mxu0 }
 0x5e5   : > { %4718 = vst [vmem:[%s8788_s1 + $0x98] sm:$0xff] %v4032_v27  ;;  %v4026_v32 = vmul.f32 0.70710677, %v5408_v8  ;;  %v4002_v13 = vpop.f32.mrb[77].mxu0 }
 0x5e6   : > { %4717 = vst [vmem:[%s8788_s1 + $0x90] sm:$0xff] %v4031_v58  ;;  %v4025_v3 = vmul.f32 0.70710677, %v4002_v13 }
 0x5e7   : > { %v4034_v11 = vadd.f32 %v4026_v32, %v8763_v4 }
 0x5e8   : > { %v4033_v19 = vadd.f32 %v4025_v3, %v8765_v49  ;;  %v5411_v43 = vpop.f32.mrb[78].mxu0 }
 0x5e9   : > { %4720 = vst [vmem:[%s8788_s1 + $0xa8] sm:$0xff] %v4034_v11  ;;  %v4028_v45 = vmul.f32 0.70710677, %v5411_v43  ;;  %v4012_v7 = vpop.f32.mrb[79].mxu0 }
 0x5ea   : > { %4719 = vst [vmem:[%s8788_s1 + $0xa0] sm:$0xff] %v4033_v19  ;;  %v4027_v59 = vmul.f32 0.70710677, %v4012_v7 }
 0x5eb   : > { %v4036_v26 = vadd.f32 %v4028_v45, %v8767_v51 }
 0x5ec   : > { %v4035_v16 = vadd.f32 %v4027_v59, %v8769_v47 }
 0x5ed   : > { %4722 = vst [vmem:[%s8788_s1 + $0xb8] sm:$0xff] %v4036_v26 }
 0x5ee   : > { %4721 = vst [vmem:[%s8788_s1 + $0xb0] sm:$0xff] %v4035_v16 }
 0x5fc   : > { %v5490_v25 = vpop.f32.mrb[80].mxu0 }
 0x5fd   : > { %v4321_v12 = vmul.f32 0.70710677, %v5490_v25  ;;  %v4281_v4 = vpop.f32.mrb[81].mxu0 }
 0x5fe   : > { %v4320_v49 = vmul.f32 0.70710677, %v4281_v4 }
 0x5ff   : > { %v4329_v17 = vadd.f32 %v4321_v12, %v8772_v62 }
 0x600   : > { %v4328_v44 = vadd.f32 %v4320_v49, %v8775_v46  ;;  %v5493_v41 = vpop.f32.mrb[82].mxu0 }
 0x601   : > { %4724 = vst [vmem:[%s8788_s1 + $0xc8] sm:$0xff] %v4329_v17  ;;  %v4323_v57 = vmul.f32 0.70710677, %v5493_v41  ;;  %v4291_v36 = vpop.f32.mrb[83].mxu0 }
 0x602   : > { %4723 = vst [vmem:[%s8788_s1 + $0xc0] sm:$0xff] %v4328_v44  ;;  %v4322_v51 = vmul.f32 0.70710677, %v4291_v36 }
 0x603   : > { %v4331_v47 = vadd.f32 %v4323_v57, %v8781_v30 }
 0x604   : > { %v4330_v23 = vadd.f32 %v4322_v51, %v8784_v48  ;;  %v5496_v53 = vpop.f32.mrb[84].mxu0 }
 0x605   : > { %4726 = vst [vmem:[%s8788_s1 + $0xd8] sm:$0xff] %v4331_v47  ;;  %v4325_v21 = vmul.f32 0.70710677, %v5496_v53  ;;  %v4301_v62 = vpop.f32.mrb[85].mxu0 }
 0x606   : > { %4725 = vst [vmem:[%s8788_s1 + $0xd0] sm:$0xff] %v4330_v23  ;;  %v4324_v46 = vmul.f32 0.70710677, %v4301_v62 }
 0x607   : > { %v4333_v56 = vadd.f32 %v4325_v21, %v8793_v6 }
 0x608   : > { %v4332_v37 = vadd.f32 %v4324_v46, %v8796_v31  ;;  %v5499_v34 = vpop.f32.mrb[86].mxu0 }
 0x609   : > { %4728 = vst [vmem:[%s8788_s1 + $0xe8] sm:$0xff] %v4333_v56  ;;  %v4327_v61 = vmul.f32 0.70710677, %v5499_v34  ;;  %v4311_v39 = vpop.f32.mrb[87].mxu0 }
 0x60a   : > { %4727 = vst [vmem:[%s8788_s1 + $0xe0] sm:$0xff] %v4332_v37  ;;  %v4326_v30 = vmul.f32 0.70710677, %v4311_v39 }
 0x60b   : > { %v4335_v48 = vadd.f32 %v4327_v61, %v8801_v50 }
 0x60c   : > { %v4334_v35 = vadd.f32 %v4326_v30, %v8804_v20 }
 0x60d   : > { %4730 = vst [vmem:[%s8788_s1 + $0xf8] sm:$0xff] %v4335_v48 }
 0x60e   : > { %4729 = vst [vmem:[%s8788_s1 + $0xf0] sm:$0xff] %v4334_v35 }
 0x60f   : > { %s9232_s22 = sld [smem:[#allocation33_spill]]  ;;  %s4739_s20 = sshll.u32 %s9029_s21, 10 }
 0x610   : > { %s4375_s14 = sshll.u32 %s8788_s1, 4  ;;  %s9233_s2 = sld [smem:[#allocation116_spill]]  ;;  %s4376_s14 = int_to_ptr.vmem [resolvable:$true] %s4375_s14 }
 0x611   : > { %s6683_s26 = smov 1024   ;;  %s6684_s0 = smov 4096  }
 0x612   : > { %s6685_s23 = smov 8   ;;  %s6686_s5 = smov 128  }
 0x613   : > { %s6687_s21 = smov [#allocation20]   ;;  %s6688_s7 = smov 0  }
 0x615   : > { %p9234_p5 = scmp.ne.s32.totalorder %s9232_s22, 0 }
 0x616   : > { %s4358_s18 = scalar_lea.hbm %s9233_s2, %s4739_s20 }
 0x617   : > { %6152 = sst [smem:[#allocation21]] (%p9234_p5), %s6683_s26 }
 0x618   : > { %6153 = sst [smem:[#allocation21 + $0x1]] (%p9234_p5), %s6684_s0 }
 0x619   : > { %6154 = sst [smem:[#allocation21 + $0x2]] (%p9234_p5), %s6685_s23 }
 0x61a   : > { %6155 = sst [smem:[#allocation21 + $0x3]] (%p9234_p5), %s6686_s5 }
 0x61b   : > { %6156 = sst [smem:[#allocation21 + $0x4]] (%p9234_p5), %s6686_s5 }
 0x61c   : > { %6157 = sst [smem:[#allocation21 + $0x5]] (%p9234_p5), %s6685_s23 }
 0x61d   : > { %6158 = dma.general (%p9234_p5), %s4376_s14, 4096, %s4358_s18, %s4346_s4, %s6687_s21, [#allocation21], %s6688_s7, 0  }
 0x61e PF: > { %s9235_s11 = sld [smem:[#allocation28_spill]]  ;;  %s9236_s10 = sld [smem:[#allocation34_spill]] }
 0x61f   : > { %p6205_p11 = scmp.ge.s32.totalorder %s6663_s30, 2 }
 0x624   : > { %s4403_s6 = sand.u32 1, %s9235_s11   ;;  %p9237_p13 = scmp.ne.s32.totalorder %s9236_s10, 0 }
 0x625   : > { %s4404_s25 = scalar_lea.sflag [#allocation6], %s4403_s6 }
 0x626   : > { %p6186_p12 = pnand %p6205_p11, %p9237_p13 }
 0x628   : > { %6646 = dma.done.wait (!%p6186_p12), %s4404_s25, 4096  }
 0x629   : > { %6648 = vsyncadd (!%p6186_p12), %s4404_s25, 4294963200  ;;  %s9238_s30 = sld [smem:[#allocation30_spill]]  ;;  %s9239_s1 = sld [smem:[#allocation31_spill]] }
 0x62a   : > { %s9240_s27 = smov %s6655_s28  ;;  %s9241_s28 = smov %s6659_s29 }
 0x62f   : > { %p35_p6 = scmp.ge.s32.totalorder %s9238_s30, 6   ;;  %s9242_s29 = smov %s9239_s1 }
 0x631   :  { %37 = sbr.rel (!%p35_p6) target bundleno = 21 (0x15), region = 277 }
 0x638   :  { %4409 = vsyncpa [#allocation5], 1 }
 0x639   :  { %4411 = vsyncpa [#allocation5 + $0x1], 1 }
 0x63a   :  { %4412 = vsyncpa [#allocation8], 1 }
 0x63b   :  { %4413 = vsyncpa [#allocation11], 1 }
 0x63c   :  { %4414 = vsyncpa [#allocation14], 1 }
 0x63d   :  { %4415 = vsyncpa [#allocation17], 1 }
 0x63e   :  { %4416 = vsyncpa [#allocation6], 1 }
 0x63f   :  { %4418 = vsyncpa [#allocation6 + $0x1], 1 }

</bundles_post_ra>
